<compile_context>
chip_gen: v6e
topology: v6e:2x2x1
jax: 0.10.0
libtpu: 0.0.40
codegen_flags: <defaults>
</compile_context>

<pallas_src>
import math

import jax
import jax.numpy as jnp
from jax import lax
from jax.experimental import pallas as pl
from jax.experimental.pallas import tpu as pltpu


# ----------------------------- Pallas kernel -------------------------------------

def seq2seq_kernel(enc_x_ref, enc_mask_ref, dec_x0_ref, emb_dest_ref,
                   e_wih0_ref, e_whh0_ref, e_b0_ref, e_w1_ref, e_b1_ref,
                   d_w0_ref, d_b0_ref, d_w1_ref, d_b1_ref,
                   w_lin_ref, b_lin_ref,
                   out_ref):
    S, B, _ = enc_mask_ref.shape
    H = e_whh0_ref.shape[0]
    V2 = w_lin_ref.shape[1]
    T = out_ref.shape[1] // V2

    def gates_to_hc(gates, c):
        """gates: (B, 4H), columns pre-permuted to (i, f, o, g)."""
        sig = jax.nn.sigmoid(gates[:, :3 * H])          # one wide EUP pass (i, f, o)
        i = sig[:, 0 * H:1 * H]
        f = sig[:, 1 * H:2 * H]
        o = sig[:, 2 * H:3 * H]
        g = jnp.tanh(gates[:, 3 * H:4 * H])             # one EUP pass (g)
        c_new = f * c + i * g
        h_new = o * jnp.tanh(c_new)
        return h_new, c_new

    # -------- Encoder: 2-layer LSTM, masked like pack_padded_sequence --------
    e_whh0 = e_whh0_ref[...]
    e_b0 = e_b0_ref[...]
    e_w1 = e_w1_ref[...]
    e_b1 = e_b1_ref[...]

    # Hoisted layer-0 input projection: one batched (S*B, E) x (E, 4H) MXU pass.
    x0_all = jnp.dot(enc_x_ref[...], e_wih0_ref[...],
                     preferred_element_type=jnp.float32) + e_b0       # (S*B, 4H)

    zeros_bh = jnp.zeros((B, H), jnp.float32)
    h0, c0, h1, c1 = zeros_bh, zeros_bh, zeros_bh, zeros_bh

    for t in range(S):
        m_t = enc_mask_ref[t] > 0.0                                   # (B, 1) bool
        g0 = x0_all[t * B:(t + 1) * B, :] + jnp.dot(
            h0, e_whh0, preferred_element_type=jnp.float32)
        h0n, c0n = gates_to_hc(g0, c0)
        g1 = jnp.dot(jnp.concatenate([h0n, h1], axis=-1), e_w1,
                     preferred_element_type=jnp.float32) + e_b1
        h1n, c1n = gates_to_hc(g1, c1)
        # freeze state where the sequence already ended (single vselect per state)
        h0 = jnp.where(m_t, h0n, h0)
        c0 = jnp.where(m_t, c0n, c0)
        h1 = jnp.where(m_t, h1n, h1)
        c1 = jnp.where(m_t, c1n, c1)

    # -------- Decoder: greedy (teacher_forcing_ratio = 0) --------
    d_w0 = d_w0_ref[...]
    d_b0 = d_b0_ref[...]
    d_w1 = d_w1_ref[...]
    d_b1 = d_b1_ref[...]
    w_lin = w_lin_ref[...]
    b_lin = b_lin_ref[...]
    emb_dest = emb_dest_ref[...]

    x = dec_x0_ref[...]                                               # (B, E)
    lane_idx = lax.broadcasted_iota(jnp.int32, (B, V2), 1)
    logit_slabs = [jnp.zeros((B, V2), jnp.float32)]                   # outputs[0] = 0

    for t in range(1, T):
        g0 = jnp.dot(jnp.concatenate([x, h0], axis=-1), d_w0,
                     preferred_element_type=jnp.float32) + d_b0
        h0, c0 = gates_to_hc(g0, c0)
        g1 = jnp.dot(jnp.concatenate([h0, h1], axis=-1), d_w1,
                     preferred_element_type=jnp.float32) + d_b1
        h1, c1 = gates_to_hc(g1, c1)
        logits = jnp.dot(h1, w_lin, preferred_element_type=jnp.float32) + b_lin  # (B, V2)
        logit_slabs.append(logits)
        # first-index argmax (reusing mx) -> one-hot -> embedding lookup as a matmul
        mx = jnp.max(logits, axis=-1, keepdims=True)
        pred = jnp.min(jnp.where(logits == mx, lane_idx, V2), axis=-1, keepdims=True)
        onehot = (lane_idx == pred).astype(jnp.float32)                # (B, V2)
        x = jnp.dot(onehot, emb_dest, preferred_element_type=jnp.float32)  # (B, E)

    # Single lane-dense writeback: (B, T*V2) = (8, 128), one unmasked store.
    out_ref[...] = jnp.concatenate(logit_slabs, axis=-1)


# ----------------------------- Wrapper (glue) -------------------------------------

def encoder_decoder_forward(params, orig, dest, orig_lengths):
    """orig: (S, B) int32, dest: (T, B) int32, orig_lengths: (B,) int32."""
    S, B = orig.shape
    T, _ = dest.shape
    V2, E = params["emb_dest"].shape
    H = params["e_whh0"].shape[0]

    def perm(w):
        # PyTorch gate order (i, f, g, o) -> kernel order (i, f, o, g) along last axis.
        return jnp.concatenate([w[..., :2 * H], w[..., 3 * H:], w[..., 2 * H:3 * H]],
                               axis=-1)

    # Glue: embedding gathers + length mask (token ids are known host-side inputs).
    enc_x = params["emb_orig"][orig].reshape(S * B, E)                 # (S*B, E)
    enc_mask = (jnp.arange(S)[:, None] < orig_lengths[None, :])
    enc_mask = enc_mask.astype(jnp.float32)[:, :, None]                # (S, B, 1)
    dec_x0 = params["emb_dest"][dest[0]]                               # (B, E)

    # Gate-permuted and (for fused cells) input/hidden-stacked weights.
    e_wih0 = perm(params["e_wih0"])                                    # (E, 4H)
    e_whh0 = perm(params["e_whh0"])                                    # (H, 4H)
    e_b0 = perm(params["e_b0"])
    e_w1 = jnp.concatenate([perm(params["e_wih1"]), perm(params["e_whh1"])], axis=0)  # (2H,4H)
    e_b1 = perm(params["e_b1"])
    d_w0 = jnp.concatenate([perm(params["d_wih0"]), perm(params["d_whh0"])], axis=0)  # (E+H,4H)
    d_b0 = perm(params["d_b0"])
    d_w1 = jnp.concatenate([perm(params["d_wih1"]), perm(params["d_whh1"])], axis=0)  # (2H,4H)
    d_b1 = perm(params["d_b1"])

    kernel_args = (enc_x, enc_mask, dec_x0, params["emb_dest"],
                   e_wih0, e_whh0, e_b0, e_w1, e_b1,
                   d_w0, d_b0, d_w1, d_b1,
                   params["w_lin"], params["b_lin"])

    vmem = pl.BlockSpec(memory_space=pltpu.MemorySpace.VMEM)
    out_flat = pl.pallas_call(
        seq2seq_kernel,
        out_shape=jax.ShapeDtypeStruct((B, T * V2), jnp.float32),     # lane-dense slab
        in_specs=[vmem] * len(kernel_args),
        out_specs=vmem,
    )(*kernel_args)

    # (B, T*V2) -> (T, B, V2)
    return out_flat.reshape(B, T, V2).transpose(1, 0, 2)


# ----------------------------- Params & reference ---------------------------------

def init_params(key, V1, V2, E, H):
    keys = jax.random.split(key, 20)
    k = 1.0 / math.sqrt(H)

    def uni(kk, shape):
        return jax.random.uniform(kk, shape, jnp.float32, -k, k)

    p = {}
    p["emb_orig"] = jax.random.normal(keys[0], (V1, E), jnp.float32)
    p["emb_dest"] = jax.random.normal(keys[1], (V2, E), jnp.float32)
    # encoder LSTM (2 layers); weights stored (in, 4H); bias = b_ih + b_hh
    p["e_wih0"] = uni(keys[2], (E, 4 * H)); p["e_whh0"] = uni(keys[3], (H, 4 * H))
    p["e_b0"] = uni(keys[4], (1, 4 * H)) + uni(keys[5], (1, 4 * H))
    p["e_wih1"] = uni(keys[6], (H, 4 * H)); p["e_whh1"] = uni(keys[7], (H, 4 * H))
    p["e_b1"] = uni(keys[8], (1, 4 * H)) + uni(keys[9], (1, 4 * H))
    # decoder LSTM (2 layers)
    p["d_wih0"] = uni(keys[10], (E, 4 * H)); p["d_whh0"] = uni(keys[11], (H, 4 * H))
    p["d_b0"] = uni(keys[12], (1, 4 * H)) + uni(keys[13], (1, 4 * H))
    p["d_wih1"] = uni(keys[14], (H, 4 * H)); p["d_whh1"] = uni(keys[15], (H, 4 * H))
    p["d_b1"] = uni(keys[16], (1, 4 * H)) + uni(keys[17], (1, 4 * H))
    # output projection
    p["w_lin"] = uni(keys[18], (H, V2))
    p["b_lin"] = uni(keys[19], (1, V2))
    return p


def reference_forward(params, orig, dest, orig_lengths):
    """Pure-JAX mirror of the PyTorch module (teacher_forcing_ratio=0)."""
    S, B = orig.shape
    T, _ = dest.shape
    V2, _E = params["emb_dest"].shape
    H = params["e_whh0"].shape[0]

    def cell(x, h, c, wih, whh, b):
        gates = x @ wih + h @ whh + b
        i = jax.nn.sigmoid(gates[:, :H]); f = jax.nn.sigmoid(gates[:, H:2 * H])
        g = jnp.tanh(gates[:, 2 * H:3 * H]); o = jax.nn.sigmoid(gates[:, 3 * H:])
        c = f * c + i * g
        return o * jnp.tanh(c), c

    enc_x = params["emb_orig"][orig]
    h0 = c0 = h1 = c1 = jnp.zeros((B, H), jnp.float32)
    for t in range(S):
        m = (t < orig_lengths).astype(jnp.float32)[:, None]
        h0n, c0n = cell(enc_x[t], h0, c0, params["e_wih0"], params["e_whh0"], params["e_b0"])
        h1n, c1n = cell(h0n, h1, c1, params["e_wih1"], params["e_whh1"], params["e_b1"])
        h0 = m * h0n + (1 - m) * h0; c0 = m * c0n + (1 - m) * c0
        h1 = m * h1n + (1 - m) * h1; c1 = m * c1n + (1 - m) * c1

    outs = [jnp.zeros((B, V2), jnp.float32)]
    x = params["emb_dest"][dest[0]]
    for t in range(1, T):
        h0, c0 = cell(x, h0, c0, params["d_wih0"], params["d_whh0"], params["d_b0"])
        h1, c1 = cell(h0, h1, c1, params["d_wih1"], params["d_whh1"], params["d_b1"])
        logits = h1 @ params["w_lin"] + params["b_lin"]
        outs.append(logits)
        pred = jnp.argmax(logits, axis=1)
        x = params["emb_dest"][pred]
    return jnp.stack(outs, axis=0)


# ----------------------------------- main -----------------------------------------

if __name__ == "__main__":
    # small shapes: vocab=16, embed=16, hidden=32, seq=8, batch=8
    V1, V2, E, H = 16, 16, 16, 32
    S, T, B = 8, 8, 8

    key = jax.random.PRNGKey(0)
    pkey, k_orig, k_dest, k_len = jax.random.split(key, 4)
    params = init_params(pkey, V1, V2, E, H)

    orig = jax.random.randint(k_orig, (S, B), 0, V1, jnp.int32)
    dest = jax.random.randint(k_dest, (T, B), 0, V2, jnp.int32)
    orig_lengths = jax.random.randint(k_len, (B,), 1, S + 1, jnp.int32)

    out = encoder_decoder_forward(params, orig, dest, orig_lengths)
    out = jax.block_until_ready(out)

    ref = reference_forward(params, orig, dest, orig_lengths)
    assert out.shape == (T, B, V2)
    assert jnp.allclose(out, ref, atol=1e-2, rtol=1e-2), "Pallas kernel mismatch vs JAX reference"

    print("KERNEL_OK")
</pallas_src>

<mosaic_0001>
module attributes {stable_mosaic.version = 11 : i64} {
  func.func @seq2seq_kernel(%arg0: memref<64x16xf32, #tpu.memory_space<vmem>>, %arg1: memref<8x8x1xf32, #tpu.memory_space<vmem>>, %arg2: memref<8x16xf32, #tpu.memory_space<vmem>>, %arg3: memref<16x16xf32, #tpu.memory_space<vmem>>, %arg4: memref<16x128xf32, #tpu.memory_space<vmem>>, %arg5: memref<32x128xf32, #tpu.memory_space<vmem>>, %arg6: memref<1x128xf32, #tpu.memory_space<vmem>>, %arg7: memref<64x128xf32, #tpu.memory_space<vmem>>, %arg8: memref<1x128xf32, #tpu.memory_space<vmem>>, %arg9: memref<48x128xf32, #tpu.memory_space<vmem>>, %arg10: memref<1x128xf32, #tpu.memory_space<vmem>>, %arg11: memref<64x128xf32, #tpu.memory_space<vmem>>, %arg12: memref<1x128xf32, #tpu.memory_space<vmem>>, %arg13: memref<32x16xf32, #tpu.memory_space<vmem>>, %arg14: memref<1x16xf32, #tpu.memory_space<vmem>>, %arg15: memref<8x128xf32, #tpu.memory_space<vmem>>) attributes {dimension_semantics = [], scalar_prefetch = 0 : i64, scratch_operands = 0 : i64, tpu.core_type = #tpu.core_type<tc>} {
    %c0 = arith.constant 0 : index
    %c0_0 = arith.constant 0 : index
    %0 = vector.load %arg5[%c0, %c0_0] : memref<32x128xf32, #tpu.memory_space<vmem>>, vector<32x128xf32>
    %c0_1 = arith.constant 0 : index
    %c0_2 = arith.constant 0 : index
    %1 = vector.load %arg6[%c0_1, %c0_2] : memref<1x128xf32, #tpu.memory_space<vmem>>, vector<1x128xf32>
    %c0_3 = arith.constant 0 : index
    %c0_4 = arith.constant 0 : index
    %2 = vector.load %arg7[%c0_3, %c0_4] : memref<64x128xf32, #tpu.memory_space<vmem>>, vector<64x128xf32>
    %c0_5 = arith.constant 0 : index
    %c0_6 = arith.constant 0 : index
    %3 = vector.load %arg8[%c0_5, %c0_6] : memref<1x128xf32, #tpu.memory_space<vmem>>, vector<1x128xf32>
    %c0_7 = arith.constant 0 : index
    %c0_8 = arith.constant 0 : index
    %4 = vector.load %arg0[%c0_7, %c0_8] : memref<64x16xf32, #tpu.memory_space<vmem>>, vector<64x16xf32>
    %c0_9 = arith.constant 0 : index
    %c0_10 = arith.constant 0 : index
    %5 = vector.load %arg4[%c0_9, %c0_10] : memref<16x128xf32, #tpu.memory_space<vmem>>, vector<16x128xf32>
    %cst = arith.constant dense<0.000000e+00> : vector<64x128xf32>
    %6 = tpu.matmul %4, %5, %cst {dimension_numbers = #tpu.dot_dimension_numbers<[1], [0], [0], [1], [0, 0, 1, 1], [], []>} : vector<64x16xf32>, vector<16x128xf32>, vector<64x128xf32> -> vector<64x128xf32>
    %7 = vector.broadcast %1 : vector<1x128xf32> to vector<64x128xf32>
    %8 = arith.addf %6, %7 : vector<64x128xf32>
    %cst_11 = arith.constant 0.000000e+00 : f32
    %9 = vector.broadcast %cst_11 : f32 to vector<8x32xf32>
    %c0_12 = arith.constant 0 : index
    %c0_13 = arith.constant 0 : index
    %c0_14 = arith.constant 0 : index
    %10 = vector.load %arg1[%c0_12, %c0_13, %c0_14] : memref<8x8x1xf32, #tpu.memory_space<vmem>>, vector<1x8x1xf32>
    %11 = vector.shape_cast %10 : vector<1x8x1xf32> to vector<8x1xf32>
    %cst_15 = arith.constant 0.000000e+00 : f32
    %12 = vector.broadcast %cst_15 : f32 to vector<8x1xf32>
    %13 = arith.cmpf ogt, %11, %12 : vector<8x1xf32>
    %14 = vector.extract_strided_slice %8 {offsets = [0, 0], sizes = [8, 128], strides = [1, 1]} : vector<64x128xf32> to vector<8x128xf32>
    %cst_16 = arith.constant dense<0.000000e+00> : vector<8x128xf32>
    %15 = tpu.matmul %9, %0, %cst_16 {dimension_numbers = #tpu.dot_dimension_numbers<[1], [0], [0], [1], [0, 0, 1, 1], [], []>} : vector<8x32xf32>, vector<32x128xf32>, vector<8x128xf32> -> vector<8x128xf32>
    %16 = arith.addf %14, %15 : vector<8x128xf32>
    %17 = vector.extract_strided_slice %16 {offsets = [0, 0], sizes = [8, 96], strides = [1, 1]} : vector<8x128xf32> to vector<8x96xf32>
    %18 = arith.negf %17 : vector<8x96xf32>
    %19 = math.exp %18 : vector<8x96xf32>
    %cst_17 = arith.constant 1.000000e+00 : f32
    %20 = vector.broadcast %cst_17 : f32 to vector<8x96xf32>
    %21 = arith.addf %20, %19 : vector<8x96xf32>
    %22 = arith.divf %20, %21 : vector<8x96xf32>
    %23 = vector.extract_strided_slice %22 {offsets = [0, 0], sizes = [8, 32], strides = [1, 1]} : vector<8x96xf32> to vector<8x32xf32>
    %24 = vector.extract_strided_slice %22 {offsets = [0, 32], sizes = [8, 32], strides = [1, 1]} : vector<8x96xf32> to vector<8x32xf32>
    %25 = vector.extract_strided_slice %22 {offsets = [0, 64], sizes = [8, 32], strides = [1, 1]} : vector<8x96xf32> to vector<8x32xf32>
    %26 = vector.extract_strided_slice %16 {offsets = [0, 96], sizes = [8, 32], strides = [1, 1]} : vector<8x128xf32> to vector<8x32xf32>
    %27 = math.tanh %26 : vector<8x32xf32>
    %28 = arith.mulf %24, %9 : vector<8x32xf32>
    %29 = arith.mulf %23, %27 : vector<8x32xf32>
    %30 = arith.addf %28, %29 : vector<8x32xf32>
    %31 = math.tanh %30 : vector<8x32xf32>
    %32 = arith.mulf %25, %31 : vector<8x32xf32>
    %33 = tpu.concatenate %32, %9 in 1 : vector<8x32xf32>, vector<8x32xf32> -> vector<8x64xf32>
    %cst_18 = arith.constant dense<0.000000e+00> : vector<8x128xf32>
    %34 = tpu.matmul %33, %2, %cst_18 {dimension_numbers = #tpu.dot_dimension_numbers<[1], [0], [0], [1], [0, 0, 1, 1], [], []>} : vector<8x64xf32>, vector<64x128xf32>, vector<8x128xf32> -> vector<8x128xf32>
    %35 = vector.broadcast %3 : vector<1x128xf32> to vector<8x128xf32>
    %36 = arith.addf %34, %35 : vector<8x128xf32>
    %37 = vector.extract_strided_slice %36 {offsets = [0, 0], sizes = [8, 96], strides = [1, 1]} : vector<8x128xf32> to vector<8x96xf32>
    %38 = arith.negf %37 : vector<8x96xf32>
    %39 = math.exp %38 : vector<8x96xf32>
    %cst_19 = arith.constant 1.000000e+00 : f32
    %40 = vector.broadcast %cst_19 : f32 to vector<8x96xf32>
    %41 = arith.addf %40, %39 : vector<8x96xf32>
    %42 = arith.divf %40, %41 : vector<8x96xf32>
    %43 = vector.extract_strided_slice %42 {offsets = [0, 0], sizes = [8, 32], strides = [1, 1]} : vector<8x96xf32> to vector<8x32xf32>
    %44 = vector.extract_strided_slice %42 {offsets = [0, 32], sizes = [8, 32], strides = [1, 1]} : vector<8x96xf32> to vector<8x32xf32>
    %45 = vector.extract_strided_slice %42 {offsets = [0, 64], sizes = [8, 32], strides = [1, 1]} : vector<8x96xf32> to vector<8x32xf32>
    %46 = vector.extract_strided_slice %36 {offsets = [0, 96], sizes = [8, 32], strides = [1, 1]} : vector<8x128xf32> to vector<8x32xf32>
    %47 = math.tanh %46 : vector<8x32xf32>
    %48 = arith.mulf %44, %9 : vector<8x32xf32>
    %49 = arith.mulf %43, %47 : vector<8x32xf32>
    %50 = arith.addf %48, %49 : vector<8x32xf32>
    %51 = math.tanh %50 : vector<8x32xf32>
    %52 = arith.mulf %45, %51 : vector<8x32xf32>
    %53 = vector.shape_cast %13 : vector<8x1xi1> to vector<8x1xi1>
    %54 = vector.broadcast %53 : vector<8x1xi1> to vector<8x32xi1>
    %55 = arith.select %54, %32, %9 : vector<8x32xi1>, vector<8x32xf32>
    %56 = vector.shape_cast %13 : vector<8x1xi1> to vector<8x1xi1>
    %57 = vector.broadcast %56 : vector<8x1xi1> to vector<8x32xi1>
    %58 = arith.select %57, %30, %9 : vector<8x32xi1>, vector<8x32xf32>
    %59 = vector.shape_cast %13 : vector<8x1xi1> to vector<8x1xi1>
    %60 = vector.broadcast %59 : vector<8x1xi1> to vector<8x32xi1>
    %61 = arith.select %60, %52, %9 : vector<8x32xi1>, vector<8x32xf32>
    %62 = vector.shape_cast %13 : vector<8x1xi1> to vector<8x1xi1>
    %63 = vector.broadcast %62 : vector<8x1xi1> to vector<8x32xi1>
    %64 = arith.select %63, %50, %9 : vector<8x32xi1>, vector<8x32xf32>
    %c1 = arith.constant 1 : index
    %c0_20 = arith.constant 0 : index
    %c0_21 = arith.constant 0 : index
    %65 = vector.load %arg1[%c1, %c0_20, %c0_21] : memref<8x8x1xf32, #tpu.memory_space<vmem>>, vector<1x8x1xf32>
    %66 = vector.shape_cast %65 : vector<1x8x1xf32> to vector<8x1xf32>
    %cst_22 = arith.constant 0.000000e+00 : f32
    %67 = vector.broadcast %cst_22 : f32 to vector<8x1xf32>
    %68 = arith.cmpf ogt, %66, %67 : vector<8x1xf32>
    %69 = vector.extract_strided_slice %8 {offsets = [8, 0], sizes = [8, 128], strides = [1, 1]} : vector<64x128xf32> to vector<8x128xf32>
    %cst_23 = arith.constant dense<0.000000e+00> : vector<8x128xf32>
    %70 = tpu.matmul %55, %0, %cst_23 {dimension_numbers = #tpu.dot_dimension_numbers<[1], [0], [0], [1], [0, 0, 1, 1], [], []>} : vector<8x32xf32>, vector<32x128xf32>, vector<8x128xf32> -> vector<8x128xf32>
    %71 = arith.addf %69, %70 : vector<8x128xf32>
    %72 = vector.extract_strided_slice %71 {offsets = [0, 0], sizes = [8, 96], strides = [1, 1]} : vector<8x128xf32> to vector<8x96xf32>
    %73 = arith.negf %72 : vector<8x96xf32>
    %74 = math.exp %73 : vector<8x96xf32>
    %cst_24 = arith.constant 1.000000e+00 : f32
    %75 = vector.broadcast %cst_24 : f32 to vector<8x96xf32>
    %76 = arith.addf %75, %74 : vector<8x96xf32>
    %77 = arith.divf %75, %76 : vector<8x96xf32>
    %78 = vector.extract_strided_slice %77 {offsets = [0, 0], sizes = [8, 32], strides = [1, 1]} : vector<8x96xf32> to vector<8x32xf32>
    %79 = vector.extract_strided_slice %77 {offsets = [0, 32], sizes = [8, 32], strides = [1, 1]} : vector<8x96xf32> to vector<8x32xf32>
    %80 = vector.extract_strided_slice %77 {offsets = [0, 64], sizes = [8, 32], strides = [1, 1]} : vector<8x96xf32> to vector<8x32xf32>
    %81 = vector.extract_strided_slice %71 {offsets = [0, 96], sizes = [8, 32], strides = [1, 1]} : vector<8x128xf32> to vector<8x32xf32>
    %82 = math.tanh %81 : vector<8x32xf32>
    %83 = arith.mulf %79, %58 : vector<8x32xf32>
    %84 = arith.mulf %78, %82 : vector<8x32xf32>
    %85 = arith.addf %83, %84 : vector<8x32xf32>
    %86 = math.tanh %85 : vector<8x32xf32>
    %87 = arith.mulf %80, %86 : vector<8x32xf32>
    %88 = tpu.concatenate %87, %61 in 1 : vector<8x32xf32>, vector<8x32xf32> -> vector<8x64xf32>
    %cst_25 = arith.constant dense<0.000000e+00> : vector<8x128xf32>
    %89 = tpu.matmul %88, %2, %cst_25 {dimension_numbers = #tpu.dot_dimension_numbers<[1], [0], [0], [1], [0, 0, 1, 1], [], []>} : vector<8x64xf32>, vector<64x128xf32>, vector<8x128xf32> -> vector<8x128xf32>
    %90 = vector.broadcast %3 : vector<1x128xf32> to vector<8x128xf32>
    %91 = arith.addf %89, %90 : vector<8x128xf32>
    %92 = vector.extract_strided_slice %91 {offsets = [0, 0], sizes = [8, 96], strides = [1, 1]} : vector<8x128xf32> to vector<8x96xf32>
    %93 = arith.negf %92 : vector<8x96xf32>
    %94 = math.exp %93 : vector<8x96xf32>
    %cst_26 = arith.constant 1.000000e+00 : f32
    %95 = vector.broadcast %cst_26 : f32 to vector<8x96xf32>
    %96 = arith.addf %95, %94 : vector<8x96xf32>
    %97 = arith.divf %95, %96 : vector<8x96xf32>
    %98 = vector.extract_strided_slice %97 {offsets = [0, 0], sizes = [8, 32], strides = [1, 1]} : vector<8x96xf32> to vector<8x32xf32>
    %99 = vector.extract_strided_slice %97 {offsets = [0, 32], sizes = [8, 32], strides = [1, 1]} : vector<8x96xf32> to vector<8x32xf32>
    %100 = vector.extract_strided_slice %97 {offsets = [0, 64], sizes = [8, 32], strides = [1, 1]} : vector<8x96xf32> to vector<8x32xf32>
    %101 = vector.extract_strided_slice %91 {offsets = [0, 96], sizes = [8, 32], strides = [1, 1]} : vector<8x128xf32> to vector<8x32xf32>
    %102 = math.tanh %101 : vector<8x32xf32>
    %103 = arith.mulf %99, %64 : vector<8x32xf32>
    %104 = arith.mulf %98, %102 : vector<8x32xf32>
    %105 = arith.addf %103, %104 : vector<8x32xf32>
    %106 = math.tanh %105 : vector<8x32xf32>
    %107 = arith.mulf %100, %106 : vector<8x32xf32>
    %108 = vector.shape_cast %68 : vector<8x1xi1> to vector<8x1xi1>
    %109 = vector.broadcast %108 : vector<8x1xi1> to vector<8x32xi1>
    %110 = arith.select %109, %87, %55 : vector<8x32xi1>, vector<8x32xf32>
    %111 = vector.shape_cast %68 : vector<8x1xi1> to vector<8x1xi1>
    %112 = vector.broadcast %111 : vector<8x1xi1> to vector<8x32xi1>
    %113 = arith.select %112, %85, %58 : vector<8x32xi1>, vector<8x32xf32>
    %114 = vector.shape_cast %68 : vector<8x1xi1> to vector<8x1xi1>
    %115 = vector.broadcast %114 : vector<8x1xi1> to vector<8x32xi1>
    %116 = arith.select %115, %107, %61 : vector<8x32xi1>, vector<8x32xf32>
    %117 = vector.shape_cast %68 : vector<8x1xi1> to vector<8x1xi1>
    %118 = vector.broadcast %117 : vector<8x1xi1> to vector<8x32xi1>
    %119 = arith.select %118, %105, %64 : vector<8x32xi1>, vector<8x32xf32>
    %c2 = arith.constant 2 : index
    %c0_27 = arith.constant 0 : index
    %c0_28 = arith.constant 0 : index
    %120 = vector.load %arg1[%c2, %c0_27, %c0_28] : memref<8x8x1xf32, #tpu.memory_space<vmem>>, vector<1x8x1xf32>
    %121 = vector.shape_cast %120 : vector<1x8x1xf32> to vector<8x1xf32>
    %cst_29 = arith.constant 0.000000e+00 : f32
    %122 = vector.broadcast %cst_29 : f32 to vector<8x1xf32>
    %123 = arith.cmpf ogt, %121, %122 : vector<8x1xf32>
    %124 = vector.extract_strided_slice %8 {offsets = [16, 0], sizes = [8, 128], strides = [1, 1]} : vector<64x128xf32> to vector<8x128xf32>
    %cst_30 = arith.constant dense<0.000000e+00> : vector<8x128xf32>
    %125 = tpu.matmul %110, %0, %cst_30 {dimension_numbers = #tpu.dot_dimension_numbers<[1], [0], [0], [1], [0, 0, 1, 1], [], []>} : vector<8x32xf32>, vector<32x128xf32>, vector<8x128xf32> -> vector<8x128xf32>
    %126 = arith.addf %124, %125 : vector<8x128xf32>
    %127 = vector.extract_strided_slice %126 {offsets = [0, 0], sizes = [8, 96], strides = [1, 1]} : vector<8x128xf32> to vector<8x96xf32>
    %128 = arith.negf %127 : vector<8x96xf32>
    %129 = math.exp %128 : vector<8x96xf32>
    %cst_31 = arith.constant 1.000000e+00 : f32
    %130 = vector.broadcast %cst_31 : f32 to vector<8x96xf32>
    %131 = arith.addf %130, %129 : vector<8x96xf32>
    %132 = arith.divf %130, %131 : vector<8x96xf32>
    %133 = vector.extract_strided_slice %132 {offsets = [0, 0], sizes = [8, 32], strides = [1, 1]} : vector<8x96xf32> to vector<8x32xf32>
    %134 = vector.extract_strided_slice %132 {offsets = [0, 32], sizes = [8, 32], strides = [1, 1]} : vector<8x96xf32> to vector<8x32xf32>
    %135 = vector.extract_strided_slice %132 {offsets = [0, 64], sizes = [8, 32], strides = [1, 1]} : vector<8x96xf32> to vector<8x32xf32>
    %136 = vector.extract_strided_slice %126 {offsets = [0, 96], sizes = [8, 32], strides = [1, 1]} : vector<8x128xf32> to vector<8x32xf32>
    %137 = math.tanh %136 : vector<8x32xf32>
    %138 = arith.mulf %134, %113 : vector<8x32xf32>
    %139 = arith.mulf %133, %137 : vector<8x32xf32>
    %140 = arith.addf %138, %139 : vector<8x32xf32>
    %141 = math.tanh %140 : vector<8x32xf32>
    %142 = arith.mulf %135, %141 : vector<8x32xf32>
    %143 = tpu.concatenate %142, %116 in 1 : vector<8x32xf32>, vector<8x32xf32> -> vector<8x64xf32>
    %cst_32 = arith.constant dense<0.000000e+00> : vector<8x128xf32>
    %144 = tpu.matmul %143, %2, %cst_32 {dimension_numbers = #tpu.dot_dimension_numbers<[1], [0], [0], [1], [0, 0, 1, 1], [], []>} : vector<8x64xf32>, vector<64x128xf32>, vector<8x128xf32> -> vector<8x128xf32>
    %145 = vector.broadcast %3 : vector<1x128xf32> to vector<8x128xf32>
    %146 = arith.addf %144, %145 : vector<8x128xf32>
    %147 = vector.extract_strided_slice %146 {offsets = [0, 0], sizes = [8, 96], strides = [1, 1]} : vector<8x128xf32> to vector<8x96xf32>
    %148 = arith.negf %147 : vector<8x96xf32>
    %149 = math.exp %148 : vector<8x96xf32>
    %cst_33 = arith.constant 1.000000e+00 : f32
    %150 = vector.broadcast %cst_33 : f32 to vector<8x96xf32>
    %151 = arith.addf %150, %149 : vector<8x96xf32>
    %152 = arith.divf %150, %151 : vector<8x96xf32>
    %153 = vector.extract_strided_slice %152 {offsets = [0, 0], sizes = [8, 32], strides = [1, 1]} : vector<8x96xf32> to vector<8x32xf32>
    %154 = vector.extract_strided_slice %152 {offsets = [0, 32], sizes = [8, 32], strides = [1, 1]} : vector<8x96xf32> to vector<8x32xf32>
    %155 = vector.extract_strided_slice %152 {offsets = [0, 64], sizes = [8, 32], strides = [1, 1]} : vector<8x96xf32> to vector<8x32xf32>
    %156 = vector.extract_strided_slice %146 {offsets = [0, 96], sizes = [8, 32], strides = [1, 1]} : vector<8x128xf32> to vector<8x32xf32>
    %157 = math.tanh %156 : vector<8x32xf32>
    %158 = arith.mulf %154, %119 : vector<8x32xf32>
    %159 = arith.mulf %153, %157 : vector<8x32xf32>
    %160 = arith.addf %158, %159 : vector<8x32xf32>
    %161 = math.tanh %160 : vector<8x32xf32>
    %162 = arith.mulf %155, %161 : vector<8x32xf32>
    %163 = vector.shape_cast %123 : vector<8x1xi1> to vector<8x1xi1>
    %164 = vector.broadcast %163 : vector<8x1xi1> to vector<8x32xi1>
    %165 = arith.select %164, %142, %110 : vector<8x32xi1>, vector<8x32xf32>
    %166 = vector.shape_cast %123 : vector<8x1xi1> to vector<8x1xi1>
    %167 = vector.broadcast %166 : vector<8x1xi1> to vector<8x32xi1>
    %168 = arith.select %167, %140, %113 : vector<8x32xi1>, vector<8x32xf32>
    %169 = vector.shape_cast %123 : vector<8x1xi1> to vector<8x1xi1>
    %170 = vector.broadcast %169 : vector<8x1xi1> to vector<8x32xi1>
    %171 = arith.select %170, %162, %116 : vector<8x32xi1>, vector<8x32xf32>
    %172 = vector.shape_cast %123 : vector<8x1xi1> to vector<8x1xi1>
    %173 = vector.broadcast %172 : vector<8x1xi1> to vector<8x32xi1>
    %174 = arith.select %173, %160, %119 : vector<8x32xi1>, vector<8x32xf32>
    %c3 = arith.constant 3 : index
    %c0_34 = arith.constant 0 : index
    %c0_35 = arith.constant 0 : index
    %175 = vector.load %arg1[%c3, %c0_34, %c0_35] : memref<8x8x1xf32, #tpu.memory_space<vmem>>, vector<1x8x1xf32>
    %176 = vector.shape_cast %175 : vector<1x8x1xf32> to vector<8x1xf32>
    %cst_36 = arith.constant 0.000000e+00 : f32
    %177 = vector.broadcast %cst_36 : f32 to vector<8x1xf32>
    %178 = arith.cmpf ogt, %176, %177 : vector<8x1xf32>
    %179 = vector.extract_strided_slice %8 {offsets = [24, 0], sizes = [8, 128], strides = [1, 1]} : vector<64x128xf32> to vector<8x128xf32>
    %cst_37 = arith.constant dense<0.000000e+00> : vector<8x128xf32>
    %180 = tpu.matmul %165, %0, %cst_37 {dimension_numbers = #tpu.dot_dimension_numbers<[1], [0], [0], [1], [0, 0, 1, 1], [], []>} : vector<8x32xf32>, vector<32x128xf32>, vector<8x128xf32> -> vector<8x128xf32>
    %181 = arith.addf %179, %180 : vector<8x128xf32>
    %182 = vector.extract_strided_slice %181 {offsets = [0, 0], sizes = [8, 96], strides = [1, 1]} : vector<8x128xf32> to vector<8x96xf32>
    %183 = arith.negf %182 : vector<8x96xf32>
    %184 = math.exp %183 : vector<8x96xf32>
    %cst_38 = arith.constant 1.000000e+00 : f32
    %185 = vector.broadcast %cst_38 : f32 to vector<8x96xf32>
    %186 = arith.addf %185, %184 : vector<8x96xf32>
    %187 = arith.divf %185, %186 : vector<8x96xf32>
    %188 = vector.extract_strided_slice %187 {offsets = [0, 0], sizes = [8, 32], strides = [1, 1]} : vector<8x96xf32> to vector<8x32xf32>
    %189 = vector.extract_strided_slice %187 {offsets = [0, 32], sizes = [8, 32], strides = [1, 1]} : vector<8x96xf32> to vector<8x32xf32>
    %190 = vector.extract_strided_slice %187 {offsets = [0, 64], sizes = [8, 32], strides = [1, 1]} : vector<8x96xf32> to vector<8x32xf32>
    %191 = vector.extract_strided_slice %181 {offsets = [0, 96], sizes = [8, 32], strides = [1, 1]} : vector<8x128xf32> to vector<8x32xf32>
    %192 = math.tanh %191 : vector<8x32xf32>
    %193 = arith.mulf %189, %168 : vector<8x32xf32>
    %194 = arith.mulf %188, %192 : vector<8x32xf32>
    %195 = arith.addf %193, %194 : vector<8x32xf32>
    %196 = math.tanh %195 : vector<8x32xf32>
    %197 = arith.mulf %190, %196 : vector<8x32xf32>
    %198 = tpu.concatenate %197, %171 in 1 : vector<8x32xf32>, vector<8x32xf32> -> vector<8x64xf32>
    %cst_39 = arith.constant dense<0.000000e+00> : vector<8x128xf32>
    %199 = tpu.matmul %198, %2, %cst_39 {dimension_numbers = #tpu.dot_dimension_numbers<[1], [0], [0], [1], [0, 0, 1, 1], [], []>} : vector<8x64xf32>, vector<64x128xf32>, vector<8x128xf32> -> vector<8x128xf32>
    %200 = vector.broadcast %3 : vector<1x128xf32> to vector<8x128xf32>
    %201 = arith.addf %199, %200 : vector<8x128xf32>
    %202 = vector.extract_strided_slice %201 {offsets = [0, 0], sizes = [8, 96], strides = [1, 1]} : vector<8x128xf32> to vector<8x96xf32>
    %203 = arith.negf %202 : vector<8x96xf32>
    %204 = math.exp %203 : vector<8x96xf32>
    %cst_40 = arith.constant 1.000000e+00 : f32
    %205 = vector.broadcast %cst_40 : f32 to vector<8x96xf32>
    %206 = arith.addf %205, %204 : vector<8x96xf32>
    %207 = arith.divf %205, %206 : vector<8x96xf32>
    %208 = vector.extract_strided_slice %207 {offsets = [0, 0], sizes = [8, 32], strides = [1, 1]} : vector<8x96xf32> to vector<8x32xf32>
    %209 = vector.extract_strided_slice %207 {offsets = [0, 32], sizes = [8, 32], strides = [1, 1]} : vector<8x96xf32> to vector<8x32xf32>
    %210 = vector.extract_strided_slice %207 {offsets = [0, 64], sizes = [8, 32], strides = [1, 1]} : vector<8x96xf32> to vector<8x32xf32>
    %211 = vector.extract_strided_slice %201 {offsets = [0, 96], sizes = [8, 32], strides = [1, 1]} : vector<8x128xf32> to vector<8x32xf32>
    %212 = math.tanh %211 : vector<8x32xf32>
    %213 = arith.mulf %209, %174 : vector<8x32xf32>
    %214 = arith.mulf %208, %212 : vector<8x32xf32>
    %215 = arith.addf %213, %214 : vector<8x32xf32>
    %216 = math.tanh %215 : vector<8x32xf32>
    %217 = arith.mulf %210, %216 : vector<8x32xf32>
    %218 = vector.shape_cast %178 : vector<8x1xi1> to vector<8x1xi1>
    %219 = vector.broadcast %218 : vector<8x1xi1> to vector<8x32xi1>
    %220 = arith.select %219, %197, %165 : vector<8x32xi1>, vector<8x32xf32>
    %221 = vector.shape_cast %178 : vector<8x1xi1> to vector<8x1xi1>
    %222 = vector.broadcast %221 : vector<8x1xi1> to vector<8x32xi1>
    %223 = arith.select %222, %195, %168 : vector<8x32xi1>, vector<8x32xf32>
    %224 = vector.shape_cast %178 : vector<8x1xi1> to vector<8x1xi1>
    %225 = vector.broadcast %224 : vector<8x1xi1> to vector<8x32xi1>
    %226 = arith.select %225, %217, %171 : vector<8x32xi1>, vector<8x32xf32>
    %227 = vector.shape_cast %178 : vector<8x1xi1> to vector<8x1xi1>
    %228 = vector.broadcast %227 : vector<8x1xi1> to vector<8x32xi1>
    %229 = arith.select %228, %215, %174 : vector<8x32xi1>, vector<8x32xf32>
    %c4 = arith.constant 4 : index
    %c0_41 = arith.constant 0 : index
    %c0_42 = arith.constant 0 : index
    %230 = vector.load %arg1[%c4, %c0_41, %c0_42] : memref<8x8x1xf32, #tpu.memory_space<vmem>>, vector<1x8x1xf32>
    %231 = vector.shape_cast %230 : vector<1x8x1xf32> to vector<8x1xf32>
    %cst_43 = arith.constant 0.000000e+00 : f32
    %232 = vector.broadcast %cst_43 : f32 to vector<8x1xf32>
    %233 = arith.cmpf ogt, %231, %232 : vector<8x1xf32>
    %234 = vector.extract_strided_slice %8 {offsets = [32, 0], sizes = [8, 128], strides = [1, 1]} : vector<64x128xf32> to vector<8x128xf32>
    %cst_44 = arith.constant dense<0.000000e+00> : vector<8x128xf32>
    %235 = tpu.matmul %220, %0, %cst_44 {dimension_numbers = #tpu.dot_dimension_numbers<[1], [0], [0], [1], [0, 0, 1, 1], [], []>} : vector<8x32xf32>, vector<32x128xf32>, vector<8x128xf32> -> vector<8x128xf32>
    %236 = arith.addf %234, %235 : vector<8x128xf32>
    %237 = vector.extract_strided_slice %236 {offsets = [0, 0], sizes = [8, 96], strides = [1, 1]} : vector<8x128xf32> to vector<8x96xf32>
    %238 = arith.negf %237 : vector<8x96xf32>
    %239 = math.exp %238 : vector<8x96xf32>
    %cst_45 = arith.constant 1.000000e+00 : f32
    %240 = vector.broadcast %cst_45 : f32 to vector<8x96xf32>
    %241 = arith.addf %240, %239 : vector<8x96xf32>
    %242 = arith.divf %240, %241 : vector<8x96xf32>
    %243 = vector.extract_strided_slice %242 {offsets = [0, 0], sizes = [8, 32], strides = [1, 1]} : vector<8x96xf32> to vector<8x32xf32>
    %244 = vector.extract_strided_slice %242 {offsets = [0, 32], sizes = [8, 32], strides = [1, 1]} : vector<8x96xf32> to vector<8x32xf32>
    %245 = vector.extract_strided_slice %242 {offsets = [0, 64], sizes = [8, 32], strides = [1, 1]} : vector<8x96xf32> to vector<8x32xf32>
    %246 = vector.extract_strided_slice %236 {offsets = [0, 96], sizes = [8, 32], strides = [1, 1]} : vector<8x128xf32> to vector<8x32xf32>
    %247 = math.tanh %246 : vector<8x32xf32>
    %248 = arith.mulf %244, %223 : vector<8x32xf32>
    %249 = arith.mulf %243, %247 : vector<8x32xf32>
    %250 = arith.addf %248, %249 : vector<8x32xf32>
    %251 = math.tanh %250 : vector<8x32xf32>
    %252 = arith.mulf %245, %251 : vector<8x32xf32>
    %253 = tpu.concatenate %252, %226 in 1 : vector<8x32xf32>, vector<8x32xf32> -> vector<8x64xf32>
    %cst_46 = arith.constant dense<0.000000e+00> : vector<8x128xf32>
    %254 = tpu.matmul %253, %2, %cst_46 {dimension_numbers = #tpu.dot_dimension_numbers<[1], [0], [0], [1], [0, 0, 1, 1], [], []>} : vector<8x64xf32>, vector<64x128xf32>, vector<8x128xf32> -> vector<8x128xf32>
    %255 = vector.broadcast %3 : vector<1x128xf32> to vector<8x128xf32>
    %256 = arith.addf %254, %255 : vector<8x128xf32>
    %257 = vector.extract_strided_slice %256 {offsets = [0, 0], sizes = [8, 96], strides = [1, 1]} : vector<8x128xf32> to vector<8x96xf32>
    %258 = arith.negf %257 : vector<8x96xf32>
    %259 = math.exp %258 : vector<8x96xf32>
    %cst_47 = arith.constant 1.000000e+00 : f32
    %260 = vector.broadcast %cst_47 : f32 to vector<8x96xf32>
    %261 = arith.addf %260, %259 : vector<8x96xf32>
    %262 = arith.divf %260, %261 : vector<8x96xf32>
    %263 = vector.extract_strided_slice %262 {offsets = [0, 0], sizes = [8, 32], strides = [1, 1]} : vector<8x96xf32> to vector<8x32xf32>
    %264 = vector.extract_strided_slice %262 {offsets = [0, 32], sizes = [8, 32], strides = [1, 1]} : vector<8x96xf32> to vector<8x32xf32>
    %265 = vector.extract_strided_slice %262 {offsets = [0, 64], sizes = [8, 32], strides = [1, 1]} : vector<8x96xf32> to vector<8x32xf32>
    %266 = vector.extract_strided_slice %256 {offsets = [0, 96], sizes = [8, 32], strides = [1, 1]} : vector<8x128xf32> to vector<8x32xf32>
    %267 = math.tanh %266 : vector<8x32xf32>
    %268 = arith.mulf %264, %229 : vector<8x32xf32>
    %269 = arith.mulf %263, %267 : vector<8x32xf32>
    %270 = arith.addf %268, %269 : vector<8x32xf32>
    %271 = math.tanh %270 : vector<8x32xf32>
    %272 = arith.mulf %265, %271 : vector<8x32xf32>
    %273 = vector.shape_cast %233 : vector<8x1xi1> to vector<8x1xi1>
    %274 = vector.broadcast %273 : vector<8x1xi1> to vector<8x32xi1>
    %275 = arith.select %274, %252, %220 : vector<8x32xi1>, vector<8x32xf32>
    %276 = vector.shape_cast %233 : vector<8x1xi1> to vector<8x1xi1>
    %277 = vector.broadcast %276 : vector<8x1xi1> to vector<8x32xi1>
    %278 = arith.select %277, %250, %223 : vector<8x32xi1>, vector<8x32xf32>
    %279 = vector.shape_cast %233 : vector<8x1xi1> to vector<8x1xi1>
    %280 = vector.broadcast %279 : vector<8x1xi1> to vector<8x32xi1>
    %281 = arith.select %280, %272, %226 : vector<8x32xi1>, vector<8x32xf32>
    %282 = vector.shape_cast %233 : vector<8x1xi1> to vector<8x1xi1>
    %283 = vector.broadcast %282 : vector<8x1xi1> to vector<8x32xi1>
    %284 = arith.select %283, %270, %229 : vector<8x32xi1>, vector<8x32xf32>
    %c5 = arith.constant 5 : index
    %c0_48 = arith.constant 0 : index
    %c0_49 = arith.constant 0 : index
    %285 = vector.load %arg1[%c5, %c0_48, %c0_49] : memref<8x8x1xf32, #tpu.memory_space<vmem>>, vector<1x8x1xf32>
    %286 = vector.shape_cast %285 : vector<1x8x1xf32> to vector<8x1xf32>
    %cst_50 = arith.constant 0.000000e+00 : f32
    %287 = vector.broadcast %cst_50 : f32 to vector<8x1xf32>
    %288 = arith.cmpf ogt, %286, %287 : vector<8x1xf32>
    %289 = vector.extract_strided_slice %8 {offsets = [40, 0], sizes = [8, 128], strides = [1, 1]} : vector<64x128xf32> to vector<8x128xf32>
    %cst_51 = arith.constant dense<0.000000e+00> : vector<8x128xf32>
    %290 = tpu.matmul %275, %0, %cst_51 {dimension_numbers = #tpu.dot_dimension_numbers<[1], [0], [0], [1], [0, 0, 1, 1], [], []>} : vector<8x32xf32>, vector<32x128xf32>, vector<8x128xf32> -> vector<8x128xf32>
    %291 = arith.addf %289, %290 : vector<8x128xf32>
    %292 = vector.extract_strided_slice %291 {offsets = [0, 0], sizes = [8, 96], strides = [1, 1]} : vector<8x128xf32> to vector<8x96xf32>
    %293 = arith.negf %292 : vector<8x96xf32>
    %294 = math.exp %293 : vector<8x96xf32>
    %cst_52 = arith.constant 1.000000e+00 : f32
    %295 = vector.broadcast %cst_52 : f32 to vector<8x96xf32>
    %296 = arith.addf %295, %294 : vector<8x96xf32>
    %297 = arith.divf %295, %296 : vector<8x96xf32>
    %298 = vector.extract_strided_slice %297 {offsets = [0, 0], sizes = [8, 32], strides = [1, 1]} : vector<8x96xf32> to vector<8x32xf32>
    %299 = vector.extract_strided_slice %297 {offsets = [0, 32], sizes = [8, 32], strides = [1, 1]} : vector<8x96xf32> to vector<8x32xf32>
    %300 = vector.extract_strided_slice %297 {offsets = [0, 64], sizes = [8, 32], strides = [1, 1]} : vector<8x96xf32> to vector<8x32xf32>
    %301 = vector.extract_strided_slice %291 {offsets = [0, 96], sizes = [8, 32], strides = [1, 1]} : vector<8x128xf32> to vector<8x32xf32>
    %302 = math.tanh %301 : vector<8x32xf32>
    %303 = arith.mulf %299, %278 : vector<8x32xf32>
    %304 = arith.mulf %298, %302 : vector<8x32xf32>
    %305 = arith.addf %303, %304 : vector<8x32xf32>
    %306 = math.tanh %305 : vector<8x32xf32>
    %307 = arith.mulf %300, %306 : vector<8x32xf32>
    %308 = tpu.concatenate %307, %281 in 1 : vector<8x32xf32>, vector<8x32xf32> -> vector<8x64xf32>
    %cst_53 = arith.constant dense<0.000000e+00> : vector<8x128xf32>
    %309 = tpu.matmul %308, %2, %cst_53 {dimension_numbers = #tpu.dot_dimension_numbers<[1], [0], [0], [1], [0, 0, 1, 1], [], []>} : vector<8x64xf32>, vector<64x128xf32>, vector<8x128xf32> -> vector<8x128xf32>
    %310 = vector.broadcast %3 : vector<1x128xf32> to vector<8x128xf32>
    %311 = arith.addf %309, %310 : vector<8x128xf32>
    %312 = vector.extract_strided_slice %311 {offsets = [0, 0], sizes = [8, 96], strides = [1, 1]} : vector<8x128xf32> to vector<8x96xf32>
    %313 = arith.negf %312 : vector<8x96xf32>
    %314 = math.exp %313 : vector<8x96xf32>
    %cst_54 = arith.constant 1.000000e+00 : f32
    %315 = vector.broadcast %cst_54 : f32 to vector<8x96xf32>
    %316 = arith.addf %315, %314 : vector<8x96xf32>
    %317 = arith.divf %315, %316 : vector<8x96xf32>
    %318 = vector.extract_strided_slice %317 {offsets = [0, 0], sizes = [8, 32], strides = [1, 1]} : vector<8x96xf32> to vector<8x32xf32>
    %319 = vector.extract_strided_slice %317 {offsets = [0, 32], sizes = [8, 32], strides = [1, 1]} : vector<8x96xf32> to vector<8x32xf32>
    %320 = vector.extract_strided_slice %317 {offsets = [0, 64], sizes = [8, 32], strides = [1, 1]} : vector<8x96xf32> to vector<8x32xf32>
    %321 = vector.extract_strided_slice %311 {offsets = [0, 96], sizes = [8, 32], strides = [1, 1]} : vector<8x128xf32> to vector<8x32xf32>
    %322 = math.tanh %321 : vector<8x32xf32>
    %323 = arith.mulf %319, %284 : vector<8x32xf32>
    %324 = arith.mulf %318, %322 : vector<8x32xf32>
    %325 = arith.addf %323, %324 : vector<8x32xf32>
    %326 = math.tanh %325 : vector<8x32xf32>
    %327 = arith.mulf %320, %326 : vector<8x32xf32>
    %328 = vector.shape_cast %288 : vector<8x1xi1> to vector<8x1xi1>
    %329 = vector.broadcast %328 : vector<8x1xi1> to vector<8x32xi1>
    %330 = arith.select %329, %307, %275 : vector<8x32xi1>, vector<8x32xf32>
    %331 = vector.shape_cast %288 : vector<8x1xi1> to vector<8x1xi1>
    %332 = vector.broadcast %331 : vector<8x1xi1> to vector<8x32xi1>
    %333 = arith.select %332, %305, %278 : vector<8x32xi1>, vector<8x32xf32>
    %334 = vector.shape_cast %288 : vector<8x1xi1> to vector<8x1xi1>
    %335 = vector.broadcast %334 : vector<8x1xi1> to vector<8x32xi1>
    %336 = arith.select %335, %327, %281 : vector<8x32xi1>, vector<8x32xf32>
    %337 = vector.shape_cast %288 : vector<8x1xi1> to vector<8x1xi1>
    %338 = vector.broadcast %337 : vector<8x1xi1> to vector<8x32xi1>
    %339 = arith.select %338, %325, %284 : vector<8x32xi1>, vector<8x32xf32>
    %c6 = arith.constant 6 : index
    %c0_55 = arith.constant 0 : index
    %c0_56 = arith.constant 0 : index
    %340 = vector.load %arg1[%c6, %c0_55, %c0_56] : memref<8x8x1xf32, #tpu.memory_space<vmem>>, vector<1x8x1xf32>
    %341 = vector.shape_cast %340 : vector<1x8x1xf32> to vector<8x1xf32>
    %cst_57 = arith.constant 0.000000e+00 : f32
    %342 = vector.broadcast %cst_57 : f32 to vector<8x1xf32>
    %343 = arith.cmpf ogt, %341, %342 : vector<8x1xf32>
    %344 = vector.extract_strided_slice %8 {offsets = [48, 0], sizes = [8, 128], strides = [1, 1]} : vector<64x128xf32> to vector<8x128xf32>
    %cst_58 = arith.constant dense<0.000000e+00> : vector<8x128xf32>
    %345 = tpu.matmul %330, %0, %cst_58 {dimension_numbers = #tpu.dot_dimension_numbers<[1], [0], [0], [1], [0, 0, 1, 1], [], []>} : vector<8x32xf32>, vector<32x128xf32>, vector<8x128xf32> -> vector<8x128xf32>
    %346 = arith.addf %344, %345 : vector<8x128xf32>
    %347 = vector.extract_strided_slice %346 {offsets = [0, 0], sizes = [8, 96], strides = [1, 1]} : vector<8x128xf32> to vector<8x96xf32>
    %348 = arith.negf %347 : vector<8x96xf32>
    %349 = math.exp %348 : vector<8x96xf32>
    %cst_59 = arith.constant 1.000000e+00 : f32
    %350 = vector.broadcast %cst_59 : f32 to vector<8x96xf32>
    %351 = arith.addf %350, %349 : vector<8x96xf32>
    %352 = arith.divf %350, %351 : vector<8x96xf32>
    %353 = vector.extract_strided_slice %352 {offsets = [0, 0], sizes = [8, 32], strides = [1, 1]} : vector<8x96xf32> to vector<8x32xf32>
    %354 = vector.extract_strided_slice %352 {offsets = [0, 32], sizes = [8, 32], strides = [1, 1]} : vector<8x96xf32> to vector<8x32xf32>
    %355 = vector.extract_strided_slice %352 {offsets = [0, 64], sizes = [8, 32], strides = [1, 1]} : vector<8x96xf32> to vector<8x32xf32>
    %356 = vector.extract_strided_slice %346 {offsets = [0, 96], sizes = [8, 32], strides = [1, 1]} : vector<8x128xf32> to vector<8x32xf32>
    %357 = math.tanh %356 : vector<8x32xf32>
    %358 = arith.mulf %354, %333 : vector<8x32xf32>
    %359 = arith.mulf %353, %357 : vector<8x32xf32>
    %360 = arith.addf %358, %359 : vector<8x32xf32>
    %361 = math.tanh %360 : vector<8x32xf32>
    %362 = arith.mulf %355, %361 : vector<8x32xf32>
    %363 = tpu.concatenate %362, %336 in 1 : vector<8x32xf32>, vector<8x32xf32> -> vector<8x64xf32>
    %cst_60 = arith.constant dense<0.000000e+00> : vector<8x128xf32>
    %364 = tpu.matmul %363, %2, %cst_60 {dimension_numbers = #tpu.dot_dimension_numbers<[1], [0], [0], [1], [0, 0, 1, 1], [], []>} : vector<8x64xf32>, vector<64x128xf32>, vector<8x128xf32> -> vector<8x128xf32>
    %365 = vector.broadcast %3 : vector<1x128xf32> to vector<8x128xf32>
    %366 = arith.addf %364, %365 : vector<8x128xf32>
    %367 = vector.extract_strided_slice %366 {offsets = [0, 0], sizes = [8, 96], strides = [1, 1]} : vector<8x128xf32> to vector<8x96xf32>
    %368 = arith.negf %367 : vector<8x96xf32>
    %369 = math.exp %368 : vector<8x96xf32>
    %cst_61 = arith.constant 1.000000e+00 : f32
    %370 = vector.broadcast %cst_61 : f32 to vector<8x96xf32>
    %371 = arith.addf %370, %369 : vector<8x96xf32>
    %372 = arith.divf %370, %371 : vector<8x96xf32>
    %373 = vector.extract_strided_slice %372 {offsets = [0, 0], sizes = [8, 32], strides = [1, 1]} : vector<8x96xf32> to vector<8x32xf32>
    %374 = vector.extract_strided_slice %372 {offsets = [0, 32], sizes = [8, 32], strides = [1, 1]} : vector<8x96xf32> to vector<8x32xf32>
    %375 = vector.extract_strided_slice %372 {offsets = [0, 64], sizes = [8, 32], strides = [1, 1]} : vector<8x96xf32> to vector<8x32xf32>
    %376 = vector.extract_strided_slice %366 {offsets = [0, 96], sizes = [8, 32], strides = [1, 1]} : vector<8x128xf32> to vector<8x32xf32>
    %377 = math.tanh %376 : vector<8x32xf32>
    %378 = arith.mulf %374, %339 : vector<8x32xf32>
    %379 = arith.mulf %373, %377 : vector<8x32xf32>
    %380 = arith.addf %378, %379 : vector<8x32xf32>
    %381 = math.tanh %380 : vector<8x32xf32>
    %382 = arith.mulf %375, %381 : vector<8x32xf32>
    %383 = vector.shape_cast %343 : vector<8x1xi1> to vector<8x1xi1>
    %384 = vector.broadcast %383 : vector<8x1xi1> to vector<8x32xi1>
    %385 = arith.select %384, %362, %330 : vector<8x32xi1>, vector<8x32xf32>
    %386 = vector.shape_cast %343 : vector<8x1xi1> to vector<8x1xi1>
    %387 = vector.broadcast %386 : vector<8x1xi1> to vector<8x32xi1>
    %388 = arith.select %387, %360, %333 : vector<8x32xi1>, vector<8x32xf32>
    %389 = vector.shape_cast %343 : vector<8x1xi1> to vector<8x1xi1>
    %390 = vector.broadcast %389 : vector<8x1xi1> to vector<8x32xi1>
    %391 = arith.select %390, %382, %336 : vector<8x32xi1>, vector<8x32xf32>
    %392 = vector.shape_cast %343 : vector<8x1xi1> to vector<8x1xi1>
    %393 = vector.broadcast %392 : vector<8x1xi1> to vector<8x32xi1>
    %394 = arith.select %393, %380, %339 : vector<8x32xi1>, vector<8x32xf32>
    %c7 = arith.constant 7 : index
    %c0_62 = arith.constant 0 : index
    %c0_63 = arith.constant 0 : index
    %395 = vector.load %arg1[%c7, %c0_62, %c0_63] : memref<8x8x1xf32, #tpu.memory_space<vmem>>, vector<1x8x1xf32>
    %396 = vector.shape_cast %395 : vector<1x8x1xf32> to vector<8x1xf32>
    %cst_64 = arith.constant 0.000000e+00 : f32
    %397 = vector.broadcast %cst_64 : f32 to vector<8x1xf32>
    %398 = arith.cmpf ogt, %396, %397 : vector<8x1xf32>
    %399 = vector.extract_strided_slice %8 {offsets = [56, 0], sizes = [8, 128], strides = [1, 1]} : vector<64x128xf32> to vector<8x128xf32>
    %cst_65 = arith.constant dense<0.000000e+00> : vector<8x128xf32>
    %400 = tpu.matmul %385, %0, %cst_65 {dimension_numbers = #tpu.dot_dimension_numbers<[1], [0], [0], [1], [0, 0, 1, 1], [], []>} : vector<8x32xf32>, vector<32x128xf32>, vector<8x128xf32> -> vector<8x128xf32>
    %401 = arith.addf %399, %400 : vector<8x128xf32>
    %402 = vector.extract_strided_slice %401 {offsets = [0, 0], sizes = [8, 96], strides = [1, 1]} : vector<8x128xf32> to vector<8x96xf32>
    %403 = arith.negf %402 : vector<8x96xf32>
    %404 = math.exp %403 : vector<8x96xf32>
    %cst_66 = arith.constant 1.000000e+00 : f32
    %405 = vector.broadcast %cst_66 : f32 to vector<8x96xf32>
    %406 = arith.addf %405, %404 : vector<8x96xf32>
    %407 = arith.divf %405, %406 : vector<8x96xf32>
    %408 = vector.extract_strided_slice %407 {offsets = [0, 0], sizes = [8, 32], strides = [1, 1]} : vector<8x96xf32> to vector<8x32xf32>
    %409 = vector.extract_strided_slice %407 {offsets = [0, 32], sizes = [8, 32], strides = [1, 1]} : vector<8x96xf32> to vector<8x32xf32>
    %410 = vector.extract_strided_slice %407 {offsets = [0, 64], sizes = [8, 32], strides = [1, 1]} : vector<8x96xf32> to vector<8x32xf32>
    %411 = vector.extract_strided_slice %401 {offsets = [0, 96], sizes = [8, 32], strides = [1, 1]} : vector<8x128xf32> to vector<8x32xf32>
    %412 = math.tanh %411 : vector<8x32xf32>
    %413 = arith.mulf %409, %388 : vector<8x32xf32>
    %414 = arith.mulf %408, %412 : vector<8x32xf32>
    %415 = arith.addf %413, %414 : vector<8x32xf32>
    %416 = math.tanh %415 : vector<8x32xf32>
    %417 = arith.mulf %410, %416 : vector<8x32xf32>
    %418 = tpu.concatenate %417, %391 in 1 : vector<8x32xf32>, vector<8x32xf32> -> vector<8x64xf32>
    %cst_67 = arith.constant dense<0.000000e+00> : vector<8x128xf32>
    %419 = tpu.matmul %418, %2, %cst_67 {dimension_numbers = #tpu.dot_dimension_numbers<[1], [0], [0], [1], [0, 0, 1, 1], [], []>} : vector<8x64xf32>, vector<64x128xf32>, vector<8x128xf32> -> vector<8x128xf32>
    %420 = vector.broadcast %3 : vector<1x128xf32> to vector<8x128xf32>
    %421 = arith.addf %419, %420 : vector<8x128xf32>
    %422 = vector.extract_strided_slice %421 {offsets = [0, 0], sizes = [8, 96], strides = [1, 1]} : vector<8x128xf32> to vector<8x96xf32>
    %423 = arith.negf %422 : vector<8x96xf32>
    %424 = math.exp %423 : vector<8x96xf32>
    %cst_68 = arith.constant 1.000000e+00 : f32
    %425 = vector.broadcast %cst_68 : f32 to vector<8x96xf32>
    %426 = arith.addf %425, %424 : vector<8x96xf32>
    %427 = arith.divf %425, %426 : vector<8x96xf32>
    %428 = vector.extract_strided_slice %427 {offsets = [0, 0], sizes = [8, 32], strides = [1, 1]} : vector<8x96xf32> to vector<8x32xf32>
    %429 = vector.extract_strided_slice %427 {offsets = [0, 32], sizes = [8, 32], strides = [1, 1]} : vector<8x96xf32> to vector<8x32xf32>
    %430 = vector.extract_strided_slice %427 {offsets = [0, 64], sizes = [8, 32], strides = [1, 1]} : vector<8x96xf32> to vector<8x32xf32>
    %431 = vector.extract_strided_slice %421 {offsets = [0, 96], sizes = [8, 32], strides = [1, 1]} : vector<8x128xf32> to vector<8x32xf32>
    %432 = math.tanh %431 : vector<8x32xf32>
    %433 = arith.mulf %429, %394 : vector<8x32xf32>
    %434 = arith.mulf %428, %432 : vector<8x32xf32>
    %435 = arith.addf %433, %434 : vector<8x32xf32>
    %436 = math.tanh %435 : vector<8x32xf32>
    %437 = arith.mulf %430, %436 : vector<8x32xf32>
    %438 = vector.shape_cast %398 : vector<8x1xi1> to vector<8x1xi1>
    %439 = vector.broadcast %438 : vector<8x1xi1> to vector<8x32xi1>
    %440 = arith.select %439, %417, %385 : vector<8x32xi1>, vector<8x32xf32>
    %441 = vector.shape_cast %398 : vector<8x1xi1> to vector<8x1xi1>
    %442 = vector.broadcast %441 : vector<8x1xi1> to vector<8x32xi1>
    %443 = arith.select %442, %415, %388 : vector<8x32xi1>, vector<8x32xf32>
    %444 = vector.shape_cast %398 : vector<8x1xi1> to vector<8x1xi1>
    %445 = vector.broadcast %444 : vector<8x1xi1> to vector<8x32xi1>
    %446 = arith.select %445, %437, %391 : vector<8x32xi1>, vector<8x32xf32>
    %447 = vector.shape_cast %398 : vector<8x1xi1> to vector<8x1xi1>
    %448 = vector.broadcast %447 : vector<8x1xi1> to vector<8x32xi1>
    %449 = arith.select %448, %435, %394 : vector<8x32xi1>, vector<8x32xf32>
    %c0_69 = arith.constant 0 : index
    %c0_70 = arith.constant 0 : index
    %450 = vector.load %arg9[%c0_69, %c0_70] : memref<48x128xf32, #tpu.memory_space<vmem>>, vector<48x128xf32>
    %c0_71 = arith.constant 0 : index
    %c0_72 = arith.constant 0 : index
    %451 = vector.load %arg10[%c0_71, %c0_72] : memref<1x128xf32, #tpu.memory_space<vmem>>, vector<1x128xf32>
    %c0_73 = arith.constant 0 : index
    %c0_74 = arith.constant 0 : index
    %452 = vector.load %arg11[%c0_73, %c0_74] : memref<64x128xf32, #tpu.memory_space<vmem>>, vector<64x128xf32>
    %c0_75 = arith.constant 0 : index
    %c0_76 = arith.constant 0 : index
    %453 = vector.load %arg12[%c0_75, %c0_76] : memref<1x128xf32, #tpu.memory_space<vmem>>, vector<1x128xf32>
    %c0_77 = arith.constant 0 : index
    %c0_78 = arith.constant 0 : index
    %454 = vector.load %arg13[%c0_77, %c0_78] : memref<32x16xf32, #tpu.memory_space<vmem>>, vector<32x16xf32>
    %c0_79 = arith.constant 0 : index
    %c0_80 = arith.constant 0 : index
    %455 = vector.load %arg14[%c0_79, %c0_80] : memref<1x16xf32, #tpu.memory_space<vmem>>, vector<1x16xf32>
    %c0_81 = arith.constant 0 : index
    %c0_82 = arith.constant 0 : index
    %456 = vector.load %arg3[%c0_81, %c0_82] : memref<16x16xf32, #tpu.memory_space<vmem>>, vector<16x16xf32>
    %c0_83 = arith.constant 0 : index
    %c0_84 = arith.constant 0 : index
    %457 = vector.load %arg2[%c0_83, %c0_84] : memref<8x16xf32, #tpu.memory_space<vmem>>, vector<8x16xf32>
    %458 = tpu.iota {dimensions = array<i32: 1>} : vector<8x16xi32>
    %cst_85 = arith.constant 0.000000e+00 : f32
    %459 = vector.broadcast %cst_85 : f32 to vector<8x16xf32>
    %460 = tpu.concatenate %457, %440 in 1 : vector<8x16xf32>, vector<8x32xf32> -> vector<8x48xf32>
    %cst_86 = arith.constant dense<0.000000e+00> : vector<8x128xf32>
    %461 = tpu.matmul %460, %450, %cst_86 {dimension_numbers = #tpu.dot_dimension_numbers<[1], [0], [0], [1], [0, 0, 1, 1], [], []>} : vector<8x48xf32>, vector<48x128xf32>, vector<8x128xf32> -> vector<8x128xf32>
    %462 = vector.broadcast %451 : vector<1x128xf32> to vector<8x128xf32>
    %463 = arith.addf %461, %462 : vector<8x128xf32>
    %464 = vector.extract_strided_slice %463 {offsets = [0, 0], sizes = [8, 96], strides = [1, 1]} : vector<8x128xf32> to vector<8x96xf32>
    %465 = arith.negf %464 : vector<8x96xf32>
    %466 = math.exp %465 : vector<8x96xf32>
    %cst_87 = arith.constant 1.000000e+00 : f32
    %467 = vector.broadcast %cst_87 : f32 to vector<8x96xf32>
    %468 = arith.addf %467, %466 : vector<8x96xf32>
    %469 = arith.divf %467, %468 : vector<8x96xf32>
    %470 = vector.extract_strided_slice %469 {offsets = [0, 0], sizes = [8, 32], strides = [1, 1]} : vector<8x96xf32> to vector<8x32xf32>
    %471 = vector.extract_strided_slice %469 {offsets = [0, 32], sizes = [8, 32], strides = [1, 1]} : vector<8x96xf32> to vector<8x32xf32>
    %472 = vector.extract_strided_slice %469 {offsets = [0, 64], sizes = [8, 32], strides = [1, 1]} : vector<8x96xf32> to vector<8x32xf32>
    %473 = vector.extract_strided_slice %463 {offsets = [0, 96], sizes = [8, 32], strides = [1, 1]} : vector<8x128xf32> to vector<8x32xf32>
    %474 = math.tanh %473 : vector<8x32xf32>
    %475 = arith.mulf %471, %443 : vector<8x32xf32>
    %476 = arith.mulf %470, %474 : vector<8x32xf32>
    %477 = arith.addf %475, %476 : vector<8x32xf32>
    %478 = math.tanh %477 : vector<8x32xf32>
    %479 = arith.mulf %472, %478 : vector<8x32xf32>
    %480 = tpu.concatenate %479, %446 in 1 : vector<8x32xf32>, vector<8x32xf32> -> vector<8x64xf32>
    %cst_88 = arith.constant dense<0.000000e+00> : vector<8x128xf32>
    %481 = tpu.matmul %480, %452, %cst_88 {dimension_numbers = #tpu.dot_dimension_numbers<[1], [0], [0], [1], [0, 0, 1, 1], [], []>} : vector<8x64xf32>, vector<64x128xf32>, vector<8x128xf32> -> vector<8x128xf32>
    %482 = vector.broadcast %453 : vector<1x128xf32> to vector<8x128xf32>
    %483 = arith.addf %481, %482 : vector<8x128xf32>
    %484 = vector.extract_strided_slice %483 {offsets = [0, 0], sizes = [8, 96], strides = [1, 1]} : vector<8x128xf32> to vector<8x96xf32>
    %485 = arith.negf %484 : vector<8x96xf32>
    %486 = math.exp %485 : vector<8x96xf32>
    %cst_89 = arith.constant 1.000000e+00 : f32
    %487 = vector.broadcast %cst_89 : f32 to vector<8x96xf32>
    %488 = arith.addf %487, %486 : vector<8x96xf32>
    %489 = arith.divf %487, %488 : vector<8x96xf32>
    %490 = vector.extract_strided_slice %489 {offsets = [0, 0], sizes = [8, 32], strides = [1, 1]} : vector<8x96xf32> to vector<8x32xf32>
    %491 = vector.extract_strided_slice %489 {offsets = [0, 32], sizes = [8, 32], strides = [1, 1]} : vector<8x96xf32> to vector<8x32xf32>
    %492 = vector.extract_strided_slice %489 {offsets = [0, 64], sizes = [8, 32], strides = [1, 1]} : vector<8x96xf32> to vector<8x32xf32>
    %493 = vector.extract_strided_slice %483 {offsets = [0, 96], sizes = [8, 32], strides = [1, 1]} : vector<8x128xf32> to vector<8x32xf32>
    %494 = math.tanh %493 : vector<8x32xf32>
    %495 = arith.mulf %491, %449 : vector<8x32xf32>
    %496 = arith.mulf %490, %494 : vector<8x32xf32>
    %497 = arith.addf %495, %496 : vector<8x32xf32>
    %498 = math.tanh %497 : vector<8x32xf32>
    %499 = arith.mulf %492, %498 : vector<8x32xf32>
    %cst_90 = arith.constant dense<0.000000e+00> : vector<8x16xf32>
    %500 = tpu.matmul %499, %454, %cst_90 {dimension_numbers = #tpu.dot_dimension_numbers<[1], [0], [0], [1], [0, 0, 1, 1], [], []>} : vector<8x32xf32>, vector<32x16xf32>, vector<8x16xf32> -> vector<8x16xf32>
    %501 = vector.broadcast %455 : vector<1x16xf32> to vector<8x16xf32>
    %502 = arith.addf %500, %501 : vector<8x16xf32>
    %cst_91 = arith.constant dense<0xFF800000> : vector<8xf32>
    %503 = vector.multi_reduction <maximumf>, %502, %cst_91 [1] : vector<8x16xf32> to vector<8xf32>
    %504 = vector.shape_cast %503 : vector<8xf32> to vector<8x1xf32>
    %505 = vector.broadcast %504 : vector<8x1xf32> to vector<8x16xf32>
    %506 = arith.cmpf oeq, %502, %505 : vector<8x16xf32>
    %c16_i32 = arith.constant 16 : i32
    %507 = vector.broadcast %c16_i32 : i32 to vector<8x16xi32>
    %508 = arith.select %506, %458, %507 : vector<8x16xi1>, vector<8x16xi32>
    %cst_92 = arith.constant dense<2147483647> : vector<8xi32>
    %509 = vector.multi_reduction <minsi>, %508, %cst_92 [1] : vector<8x16xi32> to vector<8xi32>
    %510 = vector.shape_cast %509 : vector<8xi32> to vector<8x1xi32>
    %511 = vector.broadcast %510 : vector<8x1xi32> to vector<8x16xi32>
    %512 = arith.cmpi eq, %458, %511 : vector<8x16xi32>
    %513 = arith.extui %512 : vector<8x16xi1> to vector<8x16xi32>
    %514 = arith.sitofp %513 : vector<8x16xi32> to vector<8x16xf32>
    %cst_93 = arith.constant dense<0.000000e+00> : vector<8x16xf32>
    %515 = tpu.matmul %514, %456, %cst_93 {dimension_numbers = #tpu.dot_dimension_numbers<[1], [0], [0], [1], [0, 0, 1, 1], [], []>} : vector<8x16xf32>, vector<16x16xf32>, vector<8x16xf32> -> vector<8x16xf32>
    %516 = tpu.concatenate %515, %479 in 1 : vector<8x16xf32>, vector<8x32xf32> -> vector<8x48xf32>
    %cst_94 = arith.constant dense<0.000000e+00> : vector<8x128xf32>
    %517 = tpu.matmul %516, %450, %cst_94 {dimension_numbers = #tpu.dot_dimension_numbers<[1], [0], [0], [1], [0, 0, 1, 1], [], []>} : vector<8x48xf32>, vector<48x128xf32>, vector<8x128xf32> -> vector<8x128xf32>
    %518 = vector.broadcast %451 : vector<1x128xf32> to vector<8x128xf32>
    %519 = arith.addf %517, %518 : vector<8x128xf32>
    %520 = vector.extract_strided_slice %519 {offsets = [0, 0], sizes = [8, 96], strides = [1, 1]} : vector<8x128xf32> to vector<8x96xf32>
    %521 = arith.negf %520 : vector<8x96xf32>
    %522 = math.exp %521 : vector<8x96xf32>
    %cst_95 = arith.constant 1.000000e+00 : f32
    %523 = vector.broadcast %cst_95 : f32 to vector<8x96xf32>
    %524 = arith.addf %523, %522 : vector<8x96xf32>
    %525 = arith.divf %523, %524 : vector<8x96xf32>
    %526 = vector.extract_strided_slice %525 {offsets = [0, 0], sizes = [8, 32], strides = [1, 1]} : vector<8x96xf32> to vector<8x32xf32>
    %527 = vector.extract_strided_slice %525 {offsets = [0, 32], sizes = [8, 32], strides = [1, 1]} : vector<8x96xf32> to vector<8x32xf32>
    %528 = vector.extract_strided_slice %525 {offsets = [0, 64], sizes = [8, 32], strides = [1, 1]} : vector<8x96xf32> to vector<8x32xf32>
    %529 = vector.extract_strided_slice %519 {offsets = [0, 96], sizes = [8, 32], strides = [1, 1]} : vector<8x128xf32> to vector<8x32xf32>
    %530 = math.tanh %529 : vector<8x32xf32>
    %531 = arith.mulf %527, %477 : vector<8x32xf32>
    %532 = arith.mulf %526, %530 : vector<8x32xf32>
    %533 = arith.addf %531, %532 : vector<8x32xf32>
    %534 = math.tanh %533 : vector<8x32xf32>
    %535 = arith.mulf %528, %534 : vector<8x32xf32>
    %536 = tpu.concatenate %535, %499 in 1 : vector<8x32xf32>, vector<8x32xf32> -> vector<8x64xf32>
    %cst_96 = arith.constant dense<0.000000e+00> : vector<8x128xf32>
    %537 = tpu.matmul %536, %452, %cst_96 {dimension_numbers = #tpu.dot_dimension_numbers<[1], [0], [0], [1], [0, 0, 1, 1], [], []>} : vector<8x64xf32>, vector<64x128xf32>, vector<8x128xf32> -> vector<8x128xf32>
    %538 = vector.broadcast %453 : vector<1x128xf32> to vector<8x128xf32>
    %539 = arith.addf %537, %538 : vector<8x128xf32>
    %540 = vector.extract_strided_slice %539 {offsets = [0, 0], sizes = [8, 96], strides = [1, 1]} : vector<8x128xf32> to vector<8x96xf32>
    %541 = arith.negf %540 : vector<8x96xf32>
    %542 = math.exp %541 : vector<8x96xf32>
    %cst_97 = arith.constant 1.000000e+00 : f32
    %543 = vector.broadcast %cst_97 : f32 to vector<8x96xf32>
    %544 = arith.addf %543, %542 : vector<8x96xf32>
    %545 = arith.divf %543, %544 : vector<8x96xf32>
    %546 = vector.extract_strided_slice %545 {offsets = [0, 0], sizes = [8, 32], strides = [1, 1]} : vector<8x96xf32> to vector<8x32xf32>
    %547 = vector.extract_strided_slice %545 {offsets = [0, 32], sizes = [8, 32], strides = [1, 1]} : vector<8x96xf32> to vector<8x32xf32>
    %548 = vector.extract_strided_slice %545 {offsets = [0, 64], sizes = [8, 32], strides = [1, 1]} : vector<8x96xf32> to vector<8x32xf32>
    %549 = vector.extract_strided_slice %539 {offsets = [0, 96], sizes = [8, 32], strides = [1, 1]} : vector<8x128xf32> to vector<8x32xf32>
    %550 = math.tanh %549 : vector<8x32xf32>
    %551 = arith.mulf %547, %497 : vector<8x32xf32>
    %552 = arith.mulf %546, %550 : vector<8x32xf32>
    %553 = arith.addf %551, %552 : vector<8x32xf32>
    %554 = math.tanh %553 : vector<8x32xf32>
    %555 = arith.mulf %548, %554 : vector<8x32xf32>
    %cst_98 = arith.constant dense<0.000000e+00> : vector<8x16xf32>
    %556 = tpu.matmul %555, %454, %cst_98 {dimension_numbers = #tpu.dot_dimension_numbers<[1], [0], [0], [1], [0, 0, 1, 1], [], []>} : vector<8x32xf32>, vector<32x16xf32>, vector<8x16xf32> -> vector<8x16xf32>
    %557 = vector.broadcast %455 : vector<1x16xf32> to vector<8x16xf32>
    %558 = arith.addf %556, %557 : vector<8x16xf32>
    %cst_99 = arith.constant dense<0xFF800000> : vector<8xf32>
    %559 = vector.multi_reduction <maximumf>, %558, %cst_99 [1] : vector<8x16xf32> to vector<8xf32>
    %560 = vector.shape_cast %559 : vector<8xf32> to vector<8x1xf32>
    %561 = vector.broadcast %560 : vector<8x1xf32> to vector<8x16xf32>
    %562 = arith.cmpf oeq, %558, %561 : vector<8x16xf32>
    %c16_i32_100 = arith.constant 16 : i32
    %563 = vector.broadcast %c16_i32_100 : i32 to vector<8x16xi32>
    %564 = arith.select %562, %458, %563 : vector<8x16xi1>, vector<8x16xi32>
    %cst_101 = arith.constant dense<2147483647> : vector<8xi32>
    %565 = vector.multi_reduction <minsi>, %564, %cst_101 [1] : vector<8x16xi32> to vector<8xi32>
    %566 = vector.shape_cast %565 : vector<8xi32> to vector<8x1xi32>
    %567 = vector.broadcast %566 : vector<8x1xi32> to vector<8x16xi32>
    %568 = arith.cmpi eq, %458, %567 : vector<8x16xi32>
    %569 = arith.extui %568 : vector<8x16xi1> to vector<8x16xi32>
    %570 = arith.sitofp %569 : vector<8x16xi32> to vector<8x16xf32>
    %cst_102 = arith.constant dense<0.000000e+00> : vector<8x16xf32>
    %571 = tpu.matmul %570, %456, %cst_102 {dimension_numbers = #tpu.dot_dimension_numbers<[1], [0], [0], [1], [0, 0, 1, 1], [], []>} : vector<8x16xf32>, vector<16x16xf32>, vector<8x16xf32> -> vector<8x16xf32>
    %572 = tpu.concatenate %571, %535 in 1 : vector<8x16xf32>, vector<8x32xf32> -> vector<8x48xf32>
    %cst_103 = arith.constant dense<0.000000e+00> : vector<8x128xf32>
    %573 = tpu.matmul %572, %450, %cst_103 {dimension_numbers = #tpu.dot_dimension_numbers<[1], [0], [0], [1], [0, 0, 1, 1], [], []>} : vector<8x48xf32>, vector<48x128xf32>, vector<8x128xf32> -> vector<8x128xf32>
    %574 = vector.broadcast %451 : vector<1x128xf32> to vector<8x128xf32>
    %575 = arith.addf %573, %574 : vector<8x128xf32>
    %576 = vector.extract_strided_slice %575 {offsets = [0, 0], sizes = [8, 96], strides = [1, 1]} : vector<8x128xf32> to vector<8x96xf32>
    %577 = arith.negf %576 : vector<8x96xf32>
    %578 = math.exp %577 : vector<8x96xf32>
    %cst_104 = arith.constant 1.000000e+00 : f32
    %579 = vector.broadcast %cst_104 : f32 to vector<8x96xf32>
    %580 = arith.addf %579, %578 : vector<8x96xf32>
    %581 = arith.divf %579, %580 : vector<8x96xf32>
    %582 = vector.extract_strided_slice %581 {offsets = [0, 0], sizes = [8, 32], strides = [1, 1]} : vector<8x96xf32> to vector<8x32xf32>
    %583 = vector.extract_strided_slice %581 {offsets = [0, 32], sizes = [8, 32], strides = [1, 1]} : vector<8x96xf32> to vector<8x32xf32>
    %584 = vector.extract_strided_slice %581 {offsets = [0, 64], sizes = [8, 32], strides = [1, 1]} : vector<8x96xf32> to vector<8x32xf32>
    %585 = vector.extract_strided_slice %575 {offsets = [0, 96], sizes = [8, 32], strides = [1, 1]} : vector<8x128xf32> to vector<8x32xf32>
    %586 = math.tanh %585 : vector<8x32xf32>
    %587 = arith.mulf %583, %533 : vector<8x32xf32>
    %588 = arith.mulf %582, %586 : vector<8x32xf32>
    %589 = arith.addf %587, %588 : vector<8x32xf32>
    %590 = math.tanh %589 : vector<8x32xf32>
    %591 = arith.mulf %584, %590 : vector<8x32xf32>
    %592 = tpu.concatenate %591, %555 in 1 : vector<8x32xf32>, vector<8x32xf32> -> vector<8x64xf32>
    %cst_105 = arith.constant dense<0.000000e+00> : vector<8x128xf32>
    %593 = tpu.matmul %592, %452, %cst_105 {dimension_numbers = #tpu.dot_dimension_numbers<[1], [0], [0], [1], [0, 0, 1, 1], [], []>} : vector<8x64xf32>, vector<64x128xf32>, vector<8x128xf32> -> vector<8x128xf32>
    %594 = vector.broadcast %453 : vector<1x128xf32> to vector<8x128xf32>
    %595 = arith.addf %593, %594 : vector<8x128xf32>
    %596 = vector.extract_strided_slice %595 {offsets = [0, 0], sizes = [8, 96], strides = [1, 1]} : vector<8x128xf32> to vector<8x96xf32>
    %597 = arith.negf %596 : vector<8x96xf32>
    %598 = math.exp %597 : vector<8x96xf32>
    %cst_106 = arith.constant 1.000000e+00 : f32
    %599 = vector.broadcast %cst_106 : f32 to vector<8x96xf32>
    %600 = arith.addf %599, %598 : vector<8x96xf32>
    %601 = arith.divf %599, %600 : vector<8x96xf32>
    %602 = vector.extract_strided_slice %601 {offsets = [0, 0], sizes = [8, 32], strides = [1, 1]} : vector<8x96xf32> to vector<8x32xf32>
    %603 = vector.extract_strided_slice %601 {offsets = [0, 32], sizes = [8, 32], strides = [1, 1]} : vector<8x96xf32> to vector<8x32xf32>
    %604 = vector.extract_strided_slice %601 {offsets = [0, 64], sizes = [8, 32], strides = [1, 1]} : vector<8x96xf32> to vector<8x32xf32>
    %605 = vector.extract_strided_slice %595 {offsets = [0, 96], sizes = [8, 32], strides = [1, 1]} : vector<8x128xf32> to vector<8x32xf32>
    %606 = math.tanh %605 : vector<8x32xf32>
    %607 = arith.mulf %603, %553 : vector<8x32xf32>
    %608 = arith.mulf %602, %606 : vector<8x32xf32>
    %609 = arith.addf %607, %608 : vector<8x32xf32>
    %610 = math.tanh %609 : vector<8x32xf32>
    %611 = arith.mulf %604, %610 : vector<8x32xf32>
    %cst_107 = arith.constant dense<0.000000e+00> : vector<8x16xf32>
    %612 = tpu.matmul %611, %454, %cst_107 {dimension_numbers = #tpu.dot_dimension_numbers<[1], [0], [0], [1], [0, 0, 1, 1], [], []>} : vector<8x32xf32>, vector<32x16xf32>, vector<8x16xf32> -> vector<8x16xf32>
    %613 = vector.broadcast %455 : vector<1x16xf32> to vector<8x16xf32>
    %614 = arith.addf %612, %613 : vector<8x16xf32>
    %cst_108 = arith.constant dense<0xFF800000> : vector<8xf32>
    %615 = vector.multi_reduction <maximumf>, %614, %cst_108 [1] : vector<8x16xf32> to vector<8xf32>
    %616 = vector.shape_cast %615 : vector<8xf32> to vector<8x1xf32>
    %617 = vector.broadcast %616 : vector<8x1xf32> to vector<8x16xf32>
    %618 = arith.cmpf oeq, %614, %617 : vector<8x16xf32>
    %c16_i32_109 = arith.constant 16 : i32
    %619 = vector.broadcast %c16_i32_109 : i32 to vector<8x16xi32>
    %620 = arith.select %618, %458, %619 : vector<8x16xi1>, vector<8x16xi32>
    %cst_110 = arith.constant dense<2147483647> : vector<8xi32>
    %621 = vector.multi_reduction <minsi>, %620, %cst_110 [1] : vector<8x16xi32> to vector<8xi32>
    %622 = vector.shape_cast %621 : vector<8xi32> to vector<8x1xi32>
    %623 = vector.broadcast %622 : vector<8x1xi32> to vector<8x16xi32>
    %624 = arith.cmpi eq, %458, %623 : vector<8x16xi32>
    %625 = arith.extui %624 : vector<8x16xi1> to vector<8x16xi32>
    %626 = arith.sitofp %625 : vector<8x16xi32> to vector<8x16xf32>
    %cst_111 = arith.constant dense<0.000000e+00> : vector<8x16xf32>
    %627 = tpu.matmul %626, %456, %cst_111 {dimension_numbers = #tpu.dot_dimension_numbers<[1], [0], [0], [1], [0, 0, 1, 1], [], []>} : vector<8x16xf32>, vector<16x16xf32>, vector<8x16xf32> -> vector<8x16xf32>
    %628 = tpu.concatenate %627, %591 in 1 : vector<8x16xf32>, vector<8x32xf32> -> vector<8x48xf32>
    %cst_112 = arith.constant dense<0.000000e+00> : vector<8x128xf32>
    %629 = tpu.matmul %628, %450, %cst_112 {dimension_numbers = #tpu.dot_dimension_numbers<[1], [0], [0], [1], [0, 0, 1, 1], [], []>} : vector<8x48xf32>, vector<48x128xf32>, vector<8x128xf32> -> vector<8x128xf32>
    %630 = vector.broadcast %451 : vector<1x128xf32> to vector<8x128xf32>
    %631 = arith.addf %629, %630 : vector<8x128xf32>
    %632 = vector.extract_strided_slice %631 {offsets = [0, 0], sizes = [8, 96], strides = [1, 1]} : vector<8x128xf32> to vector<8x96xf32>
    %633 = arith.negf %632 : vector<8x96xf32>
    %634 = math.exp %633 : vector<8x96xf32>
    %cst_113 = arith.constant 1.000000e+00 : f32
    %635 = vector.broadcast %cst_113 : f32 to vector<8x96xf32>
    %636 = arith.addf %635, %634 : vector<8x96xf32>
    %637 = arith.divf %635, %636 : vector<8x96xf32>
    %638 = vector.extract_strided_slice %637 {offsets = [0, 0], sizes = [8, 32], strides = [1, 1]} : vector<8x96xf32> to vector<8x32xf32>
    %639 = vector.extract_strided_slice %637 {offsets = [0, 32], sizes = [8, 32], strides = [1, 1]} : vector<8x96xf32> to vector<8x32xf32>
    %640 = vector.extract_strided_slice %637 {offsets = [0, 64], sizes = [8, 32], strides = [1, 1]} : vector<8x96xf32> to vector<8x32xf32>
    %641 = vector.extract_strided_slice %631 {offsets = [0, 96], sizes = [8, 32], strides = [1, 1]} : vector<8x128xf32> to vector<8x32xf32>
    %642 = math.tanh %641 : vector<8x32xf32>
    %643 = arith.mulf %639, %589 : vector<8x32xf32>
    %644 = arith.mulf %638, %642 : vector<8x32xf32>
    %645 = arith.addf %643, %644 : vector<8x32xf32>
    %646 = math.tanh %645 : vector<8x32xf32>
    %647 = arith.mulf %640, %646 : vector<8x32xf32>
    %648 = tpu.concatenate %647, %611 in 1 : vector<8x32xf32>, vector<8x32xf32> -> vector<8x64xf32>
    %cst_114 = arith.constant dense<0.000000e+00> : vector<8x128xf32>
    %649 = tpu.matmul %648, %452, %cst_114 {dimension_numbers = #tpu.dot_dimension_numbers<[1], [0], [0], [1], [0, 0, 1, 1], [], []>} : vector<8x64xf32>, vector<64x128xf32>, vector<8x128xf32> -> vector<8x128xf32>
    %650 = vector.broadcast %453 : vector<1x128xf32> to vector<8x128xf32>
    %651 = arith.addf %649, %650 : vector<8x128xf32>
    %652 = vector.extract_strided_slice %651 {offsets = [0, 0], sizes = [8, 96], strides = [1, 1]} : vector<8x128xf32> to vector<8x96xf32>
    %653 = arith.negf %652 : vector<8x96xf32>
    %654 = math.exp %653 : vector<8x96xf32>
    %cst_115 = arith.constant 1.000000e+00 : f32
    %655 = vector.broadcast %cst_115 : f32 to vector<8x96xf32>
    %656 = arith.addf %655, %654 : vector<8x96xf32>
    %657 = arith.divf %655, %656 : vector<8x96xf32>
    %658 = vector.extract_strided_slice %657 {offsets = [0, 0], sizes = [8, 32], strides = [1, 1]} : vector<8x96xf32> to vector<8x32xf32>
    %659 = vector.extract_strided_slice %657 {offsets = [0, 32], sizes = [8, 32], strides = [1, 1]} : vector<8x96xf32> to vector<8x32xf32>
    %660 = vector.extract_strided_slice %657 {offsets = [0, 64], sizes = [8, 32], strides = [1, 1]} : vector<8x96xf32> to vector<8x32xf32>
    %661 = vector.extract_strided_slice %651 {offsets = [0, 96], sizes = [8, 32], strides = [1, 1]} : vector<8x128xf32> to vector<8x32xf32>
    %662 = math.tanh %661 : vector<8x32xf32>
    %663 = arith.mulf %659, %609 : vector<8x32xf32>
    %664 = arith.mulf %658, %662 : vector<8x32xf32>
    %665 = arith.addf %663, %664 : vector<8x32xf32>
    %666 = math.tanh %665 : vector<8x32xf32>
    %667 = arith.mulf %660, %666 : vector<8x32xf32>
    %cst_116 = arith.constant dense<0.000000e+00> : vector<8x16xf32>
    %668 = tpu.matmul %667, %454, %cst_116 {dimension_numbers = #tpu.dot_dimension_numbers<[1], [0], [0], [1], [0, 0, 1, 1], [], []>} : vector<8x32xf32>, vector<32x16xf32>, vector<8x16xf32> -> vector<8x16xf32>
    %669 = vector.broadcast %455 : vector<1x16xf32> to vector<8x16xf32>
    %670 = arith.addf %668, %669 : vector<8x16xf32>
    %cst_117 = arith.constant dense<0xFF800000> : vector<8xf32>
    %671 = vector.multi_reduction <maximumf>, %670, %cst_117 [1] : vector<8x16xf32> to vector<8xf32>
    %672 = vector.shape_cast %671 : vector<8xf32> to vector<8x1xf32>
    %673 = vector.broadcast %672 : vector<8x1xf32> to vector<8x16xf32>
    %674 = arith.cmpf oeq, %670, %673 : vector<8x16xf32>
    %c16_i32_118 = arith.constant 16 : i32
    %675 = vector.broadcast %c16_i32_118 : i32 to vector<8x16xi32>
    %676 = arith.select %674, %458, %675 : vector<8x16xi1>, vector<8x16xi32>
    %cst_119 = arith.constant dense<2147483647> : vector<8xi32>
    %677 = vector.multi_reduction <minsi>, %676, %cst_119 [1] : vector<8x16xi32> to vector<8xi32>
    %678 = vector.shape_cast %677 : vector<8xi32> to vector<8x1xi32>
    %679 = vector.broadcast %678 : vector<8x1xi32> to vector<8x16xi32>
    %680 = arith.cmpi eq, %458, %679 : vector<8x16xi32>
    %681 = arith.extui %680 : vector<8x16xi1> to vector<8x16xi32>
    %682 = arith.sitofp %681 : vector<8x16xi32> to vector<8x16xf32>
    %cst_120 = arith.constant dense<0.000000e+00> : vector<8x16xf32>
    %683 = tpu.matmul %682, %456, %cst_120 {dimension_numbers = #tpu.dot_dimension_numbers<[1], [0], [0], [1], [0, 0, 1, 1], [], []>} : vector<8x16xf32>, vector<16x16xf32>, vector<8x16xf32> -> vector<8x16xf32>
    %684 = tpu.concatenate %683, %647 in 1 : vector<8x16xf32>, vector<8x32xf32> -> vector<8x48xf32>
    %cst_121 = arith.constant dense<0.000000e+00> : vector<8x128xf32>
    %685 = tpu.matmul %684, %450, %cst_121 {dimension_numbers = #tpu.dot_dimension_numbers<[1], [0], [0], [1], [0, 0, 1, 1], [], []>} : vector<8x48xf32>, vector<48x128xf32>, vector<8x128xf32> -> vector<8x128xf32>
    %686 = vector.broadcast %451 : vector<1x128xf32> to vector<8x128xf32>
    %687 = arith.addf %685, %686 : vector<8x128xf32>
    %688 = vector.extract_strided_slice %687 {offsets = [0, 0], sizes = [8, 96], strides = [1, 1]} : vector<8x128xf32> to vector<8x96xf32>
    %689 = arith.negf %688 : vector<8x96xf32>
    %690 = math.exp %689 : vector<8x96xf32>
    %cst_122 = arith.constant 1.000000e+00 : f32
    %691 = vector.broadcast %cst_122 : f32 to vector<8x96xf32>
    %692 = arith.addf %691, %690 : vector<8x96xf32>
    %693 = arith.divf %691, %692 : vector<8x96xf32>
    %694 = vector.extract_strided_slice %693 {offsets = [0, 0], sizes = [8, 32], strides = [1, 1]} : vector<8x96xf32> to vector<8x32xf32>
    %695 = vector.extract_strided_slice %693 {offsets = [0, 32], sizes = [8, 32], strides = [1, 1]} : vector<8x96xf32> to vector<8x32xf32>
    %696 = vector.extract_strided_slice %693 {offsets = [0, 64], sizes = [8, 32], strides = [1, 1]} : vector<8x96xf32> to vector<8x32xf32>
    %697 = vector.extract_strided_slice %687 {offsets = [0, 96], sizes = [8, 32], strides = [1, 1]} : vector<8x128xf32> to vector<8x32xf32>
    %698 = math.tanh %697 : vector<8x32xf32>
    %699 = arith.mulf %695, %645 : vector<8x32xf32>
    %700 = arith.mulf %694, %698 : vector<8x32xf32>
    %701 = arith.addf %699, %700 : vector<8x32xf32>
    %702 = math.tanh %701 : vector<8x32xf32>
    %703 = arith.mulf %696, %702 : vector<8x32xf32>
    %704 = tpu.concatenate %703, %667 in 1 : vector<8x32xf32>, vector<8x32xf32> -> vector<8x64xf32>
    %cst_123 = arith.constant dense<0.000000e+00> : vector<8x128xf32>
    %705 = tpu.matmul %704, %452, %cst_123 {dimension_numbers = #tpu.dot_dimension_numbers<[1], [0], [0], [1], [0, 0, 1, 1], [], []>} : vector<8x64xf32>, vector<64x128xf32>, vector<8x128xf32> -> vector<8x128xf32>
    %706 = vector.broadcast %453 : vector<1x128xf32> to vector<8x128xf32>
    %707 = arith.addf %705, %706 : vector<8x128xf32>
    %708 = vector.extract_strided_slice %707 {offsets = [0, 0], sizes = [8, 96], strides = [1, 1]} : vector<8x128xf32> to vector<8x96xf32>
    %709 = arith.negf %708 : vector<8x96xf32>
    %710 = math.exp %709 : vector<8x96xf32>
    %cst_124 = arith.constant 1.000000e+00 : f32
    %711 = vector.broadcast %cst_124 : f32 to vector<8x96xf32>
    %712 = arith.addf %711, %710 : vector<8x96xf32>
    %713 = arith.divf %711, %712 : vector<8x96xf32>
    %714 = vector.extract_strided_slice %713 {offsets = [0, 0], sizes = [8, 32], strides = [1, 1]} : vector<8x96xf32> to vector<8x32xf32>
    %715 = vector.extract_strided_slice %713 {offsets = [0, 32], sizes = [8, 32], strides = [1, 1]} : vector<8x96xf32> to vector<8x32xf32>
    %716 = vector.extract_strided_slice %713 {offsets = [0, 64], sizes = [8, 32], strides = [1, 1]} : vector<8x96xf32> to vector<8x32xf32>
    %717 = vector.extract_strided_slice %707 {offsets = [0, 96], sizes = [8, 32], strides = [1, 1]} : vector<8x128xf32> to vector<8x32xf32>
    %718 = math.tanh %717 : vector<8x32xf32>
    %719 = arith.mulf %715, %665 : vector<8x32xf32>
    %720 = arith.mulf %714, %718 : vector<8x32xf32>
    %721 = arith.addf %719, %720 : vector<8x32xf32>
    %722 = math.tanh %721 : vector<8x32xf32>
    %723 = arith.mulf %716, %722 : vector<8x32xf32>
    %cst_125 = arith.constant dense<0.000000e+00> : vector<8x16xf32>
    %724 = tpu.matmul %723, %454, %cst_125 {dimension_numbers = #tpu.dot_dimension_numbers<[1], [0], [0], [1], [0, 0, 1, 1], [], []>} : vector<8x32xf32>, vector<32x16xf32>, vector<8x16xf32> -> vector<8x16xf32>
    %725 = vector.broadcast %455 : vector<1x16xf32> to vector<8x16xf32>
    %726 = arith.addf %724, %725 : vector<8x16xf32>
    %cst_126 = arith.constant dense<0xFF800000> : vector<8xf32>
    %727 = vector.multi_reduction <maximumf>, %726, %cst_126 [1] : vector<8x16xf32> to vector<8xf32>
    %728 = vector.shape_cast %727 : vector<8xf32> to vector<8x1xf32>
    %729 = vector.broadcast %728 : vector<8x1xf32> to vector<8x16xf32>
    %730 = arith.cmpf oeq, %726, %729 : vector<8x16xf32>
    %c16_i32_127 = arith.constant 16 : i32
    %731 = vector.broadcast %c16_i32_127 : i32 to vector<8x16xi32>
    %732 = arith.select %730, %458, %731 : vector<8x16xi1>, vector<8x16xi32>
    %cst_128 = arith.constant dense<2147483647> : vector<8xi32>
    %733 = vector.multi_reduction <minsi>, %732, %cst_128 [1] : vector<8x16xi32> to vector<8xi32>
    %734 = vector.shape_cast %733 : vector<8xi32> to vector<8x1xi32>
    %735 = vector.broadcast %734 : vector<8x1xi32> to vector<8x16xi32>
    %736 = arith.cmpi eq, %458, %735 : vector<8x16xi32>
    %737 = arith.extui %736 : vector<8x16xi1> to vector<8x16xi32>
    %738 = arith.sitofp %737 : vector<8x16xi32> to vector<8x16xf32>
    %cst_129 = arith.constant dense<0.000000e+00> : vector<8x16xf32>
    %739 = tpu.matmul %738, %456, %cst_129 {dimension_numbers = #tpu.dot_dimension_numbers<[1], [0], [0], [1], [0, 0, 1, 1], [], []>} : vector<8x16xf32>, vector<16x16xf32>, vector<8x16xf32> -> vector<8x16xf32>
    %740 = tpu.concatenate %739, %703 in 1 : vector<8x16xf32>, vector<8x32xf32> -> vector<8x48xf32>
    %cst_130 = arith.constant dense<0.000000e+00> : vector<8x128xf32>
    %741 = tpu.matmul %740, %450, %cst_130 {dimension_numbers = #tpu.dot_dimension_numbers<[1], [0], [0], [1], [0, 0, 1, 1], [], []>} : vector<8x48xf32>, vector<48x128xf32>, vector<8x128xf32> -> vector<8x128xf32>
    %742 = vector.broadcast %451 : vector<1x128xf32> to vector<8x128xf32>
    %743 = arith.addf %741, %742 : vector<8x128xf32>
    %744 = vector.extract_strided_slice %743 {offsets = [0, 0], sizes = [8, 96], strides = [1, 1]} : vector<8x128xf32> to vector<8x96xf32>
    %745 = arith.negf %744 : vector<8x96xf32>
    %746 = math.exp %745 : vector<8x96xf32>
    %cst_131 = arith.constant 1.000000e+00 : f32
    %747 = vector.broadcast %cst_131 : f32 to vector<8x96xf32>
    %748 = arith.addf %747, %746 : vector<8x96xf32>
    %749 = arith.divf %747, %748 : vector<8x96xf32>
    %750 = vector.extract_strided_slice %749 {offsets = [0, 0], sizes = [8, 32], strides = [1, 1]} : vector<8x96xf32> to vector<8x32xf32>
    %751 = vector.extract_strided_slice %749 {offsets = [0, 32], sizes = [8, 32], strides = [1, 1]} : vector<8x96xf32> to vector<8x32xf32>
    %752 = vector.extract_strided_slice %749 {offsets = [0, 64], sizes = [8, 32], strides = [1, 1]} : vector<8x96xf32> to vector<8x32xf32>
    %753 = vector.extract_strided_slice %743 {offsets = [0, 96], sizes = [8, 32], strides = [1, 1]} : vector<8x128xf32> to vector<8x32xf32>
    %754 = math.tanh %753 : vector<8x32xf32>
    %755 = arith.mulf %751, %701 : vector<8x32xf32>
    %756 = arith.mulf %750, %754 : vector<8x32xf32>
    %757 = arith.addf %755, %756 : vector<8x32xf32>
    %758 = math.tanh %757 : vector<8x32xf32>
    %759 = arith.mulf %752, %758 : vector<8x32xf32>
    %760 = tpu.concatenate %759, %723 in 1 : vector<8x32xf32>, vector<8x32xf32> -> vector<8x64xf32>
    %cst_132 = arith.constant dense<0.000000e+00> : vector<8x128xf32>
    %761 = tpu.matmul %760, %452, %cst_132 {dimension_numbers = #tpu.dot_dimension_numbers<[1], [0], [0], [1], [0, 0, 1, 1], [], []>} : vector<8x64xf32>, vector<64x128xf32>, vector<8x128xf32> -> vector<8x128xf32>
    %762 = vector.broadcast %453 : vector<1x128xf32> to vector<8x128xf32>
    %763 = arith.addf %761, %762 : vector<8x128xf32>
    %764 = vector.extract_strided_slice %763 {offsets = [0, 0], sizes = [8, 96], strides = [1, 1]} : vector<8x128xf32> to vector<8x96xf32>
    %765 = arith.negf %764 : vector<8x96xf32>
    %766 = math.exp %765 : vector<8x96xf32>
    %cst_133 = arith.constant 1.000000e+00 : f32
    %767 = vector.broadcast %cst_133 : f32 to vector<8x96xf32>
    %768 = arith.addf %767, %766 : vector<8x96xf32>
    %769 = arith.divf %767, %768 : vector<8x96xf32>
    %770 = vector.extract_strided_slice %769 {offsets = [0, 0], sizes = [8, 32], strides = [1, 1]} : vector<8x96xf32> to vector<8x32xf32>
    %771 = vector.extract_strided_slice %769 {offsets = [0, 32], sizes = [8, 32], strides = [1, 1]} : vector<8x96xf32> to vector<8x32xf32>
    %772 = vector.extract_strided_slice %769 {offsets = [0, 64], sizes = [8, 32], strides = [1, 1]} : vector<8x96xf32> to vector<8x32xf32>
    %773 = vector.extract_strided_slice %763 {offsets = [0, 96], sizes = [8, 32], strides = [1, 1]} : vector<8x128xf32> to vector<8x32xf32>
    %774 = math.tanh %773 : vector<8x32xf32>
    %775 = arith.mulf %771, %721 : vector<8x32xf32>
    %776 = arith.mulf %770, %774 : vector<8x32xf32>
    %777 = arith.addf %775, %776 : vector<8x32xf32>
    %778 = math.tanh %777 : vector<8x32xf32>
    %779 = arith.mulf %772, %778 : vector<8x32xf32>
    %cst_134 = arith.constant dense<0.000000e+00> : vector<8x16xf32>
    %780 = tpu.matmul %779, %454, %cst_134 {dimension_numbers = #tpu.dot_dimension_numbers<[1], [0], [0], [1], [0, 0, 1, 1], [], []>} : vector<8x32xf32>, vector<32x16xf32>, vector<8x16xf32> -> vector<8x16xf32>
    %781 = vector.broadcast %455 : vector<1x16xf32> to vector<8x16xf32>
    %782 = arith.addf %780, %781 : vector<8x16xf32>
    %cst_135 = arith.constant dense<0xFF800000> : vector<8xf32>
    %783 = vector.multi_reduction <maximumf>, %782, %cst_135 [1] : vector<8x16xf32> to vector<8xf32>
    %784 = vector.shape_cast %783 : vector<8xf32> to vector<8x1xf32>
    %785 = vector.broadcast %784 : vector<8x1xf32> to vector<8x16xf32>
    %786 = arith.cmpf oeq, %782, %785 : vector<8x16xf32>
    %c16_i32_136 = arith.constant 16 : i32
    %787 = vector.broadcast %c16_i32_136 : i32 to vector<8x16xi32>
    %788 = arith.select %786, %458, %787 : vector<8x16xi1>, vector<8x16xi32>
    %cst_137 = arith.constant dense<2147483647> : vector<8xi32>
    %789 = vector.multi_reduction <minsi>, %788, %cst_137 [1] : vector<8x16xi32> to vector<8xi32>
    %790 = vector.shape_cast %789 : vector<8xi32> to vector<8x1xi32>
    %791 = vector.broadcast %790 : vector<8x1xi32> to vector<8x16xi32>
    %792 = arith.cmpi eq, %458, %791 : vector<8x16xi32>
    %793 = arith.extui %792 : vector<8x16xi1> to vector<8x16xi32>
    %794 = arith.sitofp %793 : vector<8x16xi32> to vector<8x16xf32>
    %cst_138 = arith.constant dense<0.000000e+00> : vector<8x16xf32>
    %795 = tpu.matmul %794, %456, %cst_138 {dimension_numbers = #tpu.dot_dimension_numbers<[1], [0], [0], [1], [0, 0, 1, 1], [], []>} : vector<8x16xf32>, vector<16x16xf32>, vector<8x16xf32> -> vector<8x16xf32>
    %796 = tpu.concatenate %795, %759 in 1 : vector<8x16xf32>, vector<8x32xf32> -> vector<8x48xf32>
    %cst_139 = arith.constant dense<0.000000e+00> : vector<8x128xf32>
    %797 = tpu.matmul %796, %450, %cst_139 {dimension_numbers = #tpu.dot_dimension_numbers<[1], [0], [0], [1], [0, 0, 1, 1], [], []>} : vector<8x48xf32>, vector<48x128xf32>, vector<8x128xf32> -> vector<8x128xf32>
    %798 = vector.broadcast %451 : vector<1x128xf32> to vector<8x128xf32>
    %799 = arith.addf %797, %798 : vector<8x128xf32>
    %800 = vector.extract_strided_slice %799 {offsets = [0, 0], sizes = [8, 96], strides = [1, 1]} : vector<8x128xf32> to vector<8x96xf32>
    %801 = arith.negf %800 : vector<8x96xf32>
    %802 = math.exp %801 : vector<8x96xf32>
    %cst_140 = arith.constant 1.000000e+00 : f32
    %803 = vector.broadcast %cst_140 : f32 to vector<8x96xf32>
    %804 = arith.addf %803, %802 : vector<8x96xf32>
    %805 = arith.divf %803, %804 : vector<8x96xf32>
    %806 = vector.extract_strided_slice %805 {offsets = [0, 0], sizes = [8, 32], strides = [1, 1]} : vector<8x96xf32> to vector<8x32xf32>
    %807 = vector.extract_strided_slice %805 {offsets = [0, 32], sizes = [8, 32], strides = [1, 1]} : vector<8x96xf32> to vector<8x32xf32>
    %808 = vector.extract_strided_slice %805 {offsets = [0, 64], sizes = [8, 32], strides = [1, 1]} : vector<8x96xf32> to vector<8x32xf32>
    %809 = vector.extract_strided_slice %799 {offsets = [0, 96], sizes = [8, 32], strides = [1, 1]} : vector<8x128xf32> to vector<8x32xf32>
    %810 = math.tanh %809 : vector<8x32xf32>
    %811 = arith.mulf %807, %757 : vector<8x32xf32>
    %812 = arith.mulf %806, %810 : vector<8x32xf32>
    %813 = arith.addf %811, %812 : vector<8x32xf32>
    %814 = math.tanh %813 : vector<8x32xf32>
    %815 = arith.mulf %808, %814 : vector<8x32xf32>
    %816 = tpu.concatenate %815, %779 in 1 : vector<8x32xf32>, vector<8x32xf32> -> vector<8x64xf32>
    %cst_141 = arith.constant dense<0.000000e+00> : vector<8x128xf32>
    %817 = tpu.matmul %816, %452, %cst_141 {dimension_numbers = #tpu.dot_dimension_numbers<[1], [0], [0], [1], [0, 0, 1, 1], [], []>} : vector<8x64xf32>, vector<64x128xf32>, vector<8x128xf32> -> vector<8x128xf32>
    %818 = vector.broadcast %453 : vector<1x128xf32> to vector<8x128xf32>
    %819 = arith.addf %817, %818 : vector<8x128xf32>
    %820 = vector.extract_strided_slice %819 {offsets = [0, 0], sizes = [8, 96], strides = [1, 1]} : vector<8x128xf32> to vector<8x96xf32>
    %821 = arith.negf %820 : vector<8x96xf32>
    %822 = math.exp %821 : vector<8x96xf32>
    %cst_142 = arith.constant 1.000000e+00 : f32
    %823 = vector.broadcast %cst_142 : f32 to vector<8x96xf32>
    %824 = arith.addf %823, %822 : vector<8x96xf32>
    %825 = arith.divf %823, %824 : vector<8x96xf32>
    %826 = vector.extract_strided_slice %825 {offsets = [0, 0], sizes = [8, 32], strides = [1, 1]} : vector<8x96xf32> to vector<8x32xf32>
    %827 = vector.extract_strided_slice %825 {offsets = [0, 32], sizes = [8, 32], strides = [1, 1]} : vector<8x96xf32> to vector<8x32xf32>
    %828 = vector.extract_strided_slice %825 {offsets = [0, 64], sizes = [8, 32], strides = [1, 1]} : vector<8x96xf32> to vector<8x32xf32>
    %829 = vector.extract_strided_slice %819 {offsets = [0, 96], sizes = [8, 32], strides = [1, 1]} : vector<8x128xf32> to vector<8x32xf32>
    %830 = math.tanh %829 : vector<8x32xf32>
    %831 = arith.mulf %827, %777 : vector<8x32xf32>
    %832 = arith.mulf %826, %830 : vector<8x32xf32>
    %833 = arith.addf %831, %832 : vector<8x32xf32>
    %834 = math.tanh %833 : vector<8x32xf32>
    %835 = arith.mulf %828, %834 : vector<8x32xf32>
    %cst_143 = arith.constant dense<0.000000e+00> : vector<8x16xf32>
    %836 = tpu.matmul %835, %454, %cst_143 {dimension_numbers = #tpu.dot_dimension_numbers<[1], [0], [0], [1], [0, 0, 1, 1], [], []>} : vector<8x32xf32>, vector<32x16xf32>, vector<8x16xf32> -> vector<8x16xf32>
    %837 = vector.broadcast %455 : vector<1x16xf32> to vector<8x16xf32>
    %838 = arith.addf %836, %837 : vector<8x16xf32>
    %839 = tpu.concatenate %459, %502, %558, %614, %670, %726, %782, %838 in 1 : vector<8x16xf32>, vector<8x16xf32>, vector<8x16xf32>, vector<8x16xf32>, vector<8x16xf32>, vector<8x16xf32>, vector<8x16xf32>, vector<8x16xf32> -> vector<8x128xf32>
    %c0_144 = arith.constant 0 : index
    %c0_145 = arith.constant 0 : index
    %840 = vector.load %arg15[%c0_144, %c0_145] : memref<8x128xf32, #tpu.memory_space<vmem>>, vector<8x128xf32>
    tpu.vector_store %arg15[%c0_144, %c0_145], %839 {strides = array<i32>} : memref<8x128xf32, #tpu.memory_space<vmem>>, vector<8x128xf32>,
    return
  }
}

</mosaic_0001>

<bundles_post_ra>
// kernel: tpu_custom_call.1
= control target key start
LH: loop header
LB: loop body
LE: loop exit
PB: predicated region body
PF: predicated region fallthrough
CT: control target
= control target key end

     0   :  { %20 = vsyncpa [#allocation3], 0  ;;  %s7757_s0 = inlined_call_operand.vmem [shape: f32[64,16], index: 0, kind: input, shape index: {}]   ;;  %s7758_s1 = inlined_call_operand.vmem [shape: f32[8,8,1], index: 1, kind: input, shape index: {}]   ;;  %s7759_s2 = inlined_call_operand.hbm [shape: f32[8,16], index: 2, kind: input, shape index: {}]   ;;  %s7760_s3 = inlined_call_operand.vmem [shape: f32[16,16], index: 3, kind: input, shape index: {}]   ;;  %s7761_s4 = inlined_call_operand.hbm [shape: f32[16,128], index: 4, kind: input, shape index: {}]   ;;  %s7762_s5 = inlined_call_operand.hbm [shape: f32[32,128], index: 5, kind: input, shape index: {}]   ;;  %s7763_s6 = inlined_call_operand.vmem [shape: f32[1,128], index: 6, kind: input, shape index: {}]   ;;  %s7764_s7 = inlined_call_operand.vmem [shape: f32[64,128], index: 7, kind: input, shape index: {}]   ;;  %s7765_s8 = inlined_call_operand.vmem [shape: f32[1,128], index: 8, kind: input, shape index: {}]   ;;  %s7766_s9 = inlined_call_operand.vmem [shape: f32[48,128], index: 9, kind: input, shape index: {}]   ;;  %s7767_s10 = inlined_call_operand.vmem [shape: f32[1,128], index: 10, kind: input, shape index: {}]   ;;  %s7768_s11 = inlined_call_operand.vmem [shape: f32[64,128], index: 11, kind: input, shape index: {}]   ;;  %s7769_s12 = inlined_call_operand.vmem [shape: f32[1,128], index: 12, kind: input, shape index: {}]   ;;  %s7770_s13 = inlined_call_operand.vmem [shape: f32[32,16], index: 13, kind: input, shape index: {}]   ;;  %s7771_s14 = inlined_call_operand.vmem [shape: f32[1,16], index: 14, kind: input, shape index: {}]   ;;  %s7772_s15 = inlined_call_operand.hbm [shape: f32[8,128], index: 15, kind: output, shape index: {}]  }
   0x1   :  { %21 = vsyncpa [#allocation6], 0 }
   0x2   :  { %22 = vsyncpa [#allocation4], 0  ;;  %s6019_s18 = smov [#allocation5]  }
   0x3   :  { %s44_s19 = sshll.u32 %s6019_s18, 4  ;;  %s45_s19 = int_to_ptr.vmem [resolvable:$true] %s44_s19 }
   0x4   :  { %s5941_s20 = scalar_lea.vmem %s45_s19, 256  ;;  %p5946_p1 = scmp.lt.s32.totalorder %s45_s19, %s45_s19 }
   0x5   :  { %p5942_p0 = scmp.ne.s32.totalorder %s45_s19, %s5941_s20  ;;  %p5947_p2 = scmp.lt.s32.totalorder %s5941_s20, %s5941_s20 }
   0x7   :  { %p5948_p3 = por %p5947_p2, %p5946_p1 }
   0x9   :  { %p5949_p4 = pnand %p5948_p3, %p5942_p0 }
   0xb   :  { %5952 = shalt.err (!%p5949_p4)
}
   0xc   :  { %s6020_s21 = smov 128   ;;  %s6021_s22 = smov 8  }
   0xd   :  { %50 = dma.hbm_to_vmem [thread:$0]  %s7761_s4, 256, %s45_s19, [#allocation6], %s6020_s21, %s6020_s21, %s6021_s22  }
   0xe   :  { %s6022_s25 = smov [#allocation2]   ;;  %s6023_s27 = smov [#allocation7]  }
   0xf   :  { %s33_s26 = sshll.u32 %s6022_s25, 4  ;;  %s56_s28 = sshll.u32 %s6023_s27, 4  ;;  %s34_s26 = int_to_ptr.vmem [resolvable:$true] %s33_s26  ;;  %s57_s28 = int_to_ptr.vmem [resolvable:$true] %s56_s28 }
  0x10   :  { %s5961_s29 = scalar_lea.vmem %s34_s26, 128  ;;  %p5966_p6 = scmp.lt.s32.totalorder %s34_s26, %s34_s26 }
  0x11   :  { %p5962_p5 = scmp.ne.s32.totalorder %s34_s26, %s5961_s29  ;;  %p5967_p7 = scmp.lt.s32.totalorder %s5961_s29, %s5961_s29 }
  0x13   :  { %p5968_p8 = por %p5967_p7, %p5966_p6 }
  0x15   :  { %p5969_p9 = pnand %p5968_p8, %p5962_p5 }
  0x17   :  { %5972 = shalt.err (!%p5969_p9)
}
  0x18   :  { %36 = dma.hbm_to_vmem [thread:$0]  %s7759_s2, 128, %s34_s26, [#allocation3]  }
  0x19   :  { %s5981_s17 = scalar_lea.vmem %s57_s28, 512  ;;  %p5986_p11 = scmp.lt.s32.totalorder %s57_s28, %s57_s28 }
  0x1a   :  { %p5982_p10 = scmp.ne.s32.totalorder %s57_s28, %s5981_s17  ;;  %p5987_p12 = scmp.lt.s32.totalorder %s5981_s17, %s5981_s17 }
  0x1c   :  { %p5988_p13 = por %p5987_p12, %p5986_p11 }
  0x1e   :  { %p5989_p0 = pnand %p5988_p13, %p5982_p10 }
  0x20   :  { %5992 = shalt.err (!%p5989_p0)
}
  0x21   :  { %62 = dma.hbm_to_vmem [thread:$0]  %s7762_s5, 512, %s57_s28, [#allocation6], %s6020_s21, %s6020_s21, %s6021_s22  }
  0x22   :  { %6013 = dma.done.wait [#allocation3], 128  }
  0x23   :  { %6014 = vsyncadd [#allocation3], 4294967168 }
  0x24   :  { %6015 = dma.done.wait [#allocation6], 768  }
  0x25   :  { %6016 = vsyncadd [#allocation6], 4294966528  ;;  %v6024_v0 = vmov 0.0   ;;  %vm6025_vm0 = vmmov 0   ;;  %v113_v1 = vld [vmem:[#allocation5 + $0x8] sm:$0xff]  ;;  %v112_v3 = vld [vmem:[#allocation5] sm:$0xff] }
  0x26   :  { %5041 = vmatprep.subr.mxu1 %v6024_v0  ;;  %5049 = vmatprep.mubr.msk.f32.mxu1 %vm6025_vm0, %v6024_v0  ;;  %v6127_v2 = vld [vmem:[#allocation7 + $0x18] sm:$0xff]  ;;  %v6130_v4 = vld [vmem:[#allocation7 + $0x10] sm:$0xff]  ;;  %v104_v5 = vld [vmem:[%s7757_s0] sm:$0xff]  ;;  %vm120_vm1 = vcmask 130048   ;;  %v6026_v10 = vmov 0   ;;  %s6027_s25 = smov 32  }
  0x27   :  { %5025 = vmatprep.subr.mxu0 %v113_v1  ;;  %5042 = vmatpush3.msra.mxu1 %v6127_v2  ;;  %v105_v6 = vld [vmem:[%s7757_s0 + $0x8] sm:$0xff]  ;;  %v6140_v7 = vld [vmem:[#allocation7 + $0x8] sm:$0xff]  ;;  %v6145_v8 = vld [vmem:[#allocation7] sm:$0xff]  ;;  %s6028_s5 = smov 64   ;;  %vm252_vm4 = vcmask 261120   ;;  %vm362_vm5 = vcmask 523264  }
  0x28   :  { %5026 = vmatpush3.msra.mxu0 %v113_v1  ;;  %5043 = vmatprep.subr.mxu1 %v6024_v0  ;;  %v250_v9 = vld [vmem:[%s7758_s1] sm:$0xff]  ;;  %v6185_v29 = vld [vmem:[%s7764_s7 + $0x38] sm:$0xff]  ;;  %v106_v30 = vld [vmem:[%s7757_s0 + $0x10] sm:$0xff]  ;;  %s6029_s23 = smov 96   ;;  %s6032_s30 = smov 48  }
  0x29   :  { %5027 = vmatprep.subr.mxu0 %v112_v3  ;;  %5044 = vmatpush3.msra.mxu1 %v6130_v4  ;;  %vm251_vm2 = vcmp.gt.f32.partialorder %v250_v9, 0.0  ;;  %v6174_v13 = vld [vmem:[%s7763_s6] ss:$0 sm:$0xff]  ;;  %v107_v31 = vld [vmem:[%s7757_s0 + $0x18] sm:$0xff]  ;;  %v6198_v32 = vld [vmem:[%s7764_s7 + $0x30] sm:$0xff] }
  0x2a   :  { %5028 = vmatpush3.msra.mxu0 %v112_v3  ;;  %5029 = vmatprep.mubr.msk.f32.mxu0 %vm120_vm1, %v104_v5  ;;  %v460_v11 = vsel %vm251_vm2, 1, %v6026_v10  ;;  %v108_v33 = vld [vmem:[%s7757_s0 + $0x20] sm:$0xff]  ;;  %v6208_v34 = vld [vmem:[%s7764_s7 + $0x28] sm:$0xff]  ;;  %v110_v37 = vld [vmem:[%s7757_s0 + $0x30] sm:$0xff] }
  0x2b   :  { %5045 = vmatprep.subr.mxu1 %v6024_v0  ;;  %5030 = vmatmul.mubr.msk.f32.vlgmr.msra.gmra.mxu0 %vm120_vm1, %v105_v6  ;;  %v109_v35 = vld [vmem:[%s7757_s0 + $0x28] sm:$0xff]  ;;  %v6219_v36 = vld [vmem:[%s7764_s7 + $0x20] sm:$0xff]  ;;  %v6230_v38 = vld [vmem:[%s7764_s7 + $0x18] sm:$0xff] }
  0x2c   :  { %5046 = vmatpush3.msra.mxu1 %v6140_v7  ;;  %5052 = vmatprep.subr.mxu0 %v6024_v0  ;;  %v111_v39 = vld [vmem:[%s7757_s0 + $0x38] sm:$0xff]  ;;  %v6242_v41 = vld [vmem:[%s7764_s7 + $0x10] sm:$0xff]  ;;  %v6250_v42 = vld [vmem:[%s7764_s7 + $0x8] sm:$0xff] }
  0x2d   :  { %5047 = vmatprep.subr.mxu1 %v6024_v0  ;;  %5654 = vset.pattern.permute.xlu1 %v6026_v10  ;;  %v6259_v43 = vld [vmem:[%s7764_s7] sm:$0xff] }
  0x2e   :  { %5048 = vmatpush3.msra.mxu1 %v6145_v8  ;;  %5655 = vset.pattern.permute.xlu0 %v6026_v10  ;;  %v6321_v57 = vld [vmem:[%s7765_s8] ss:$0 sm:$0xff] }
  0x2f   :  { %5050 = vmatmul.mubr.f32.vlgmr.msra.gmra.mxu1 %v6024_v0  ;;  %5071 = vmatprep.subr.mxu1 %v6024_v0 }
  0x30   :  { %5072 = vmatpush3.msra.mxu1 %v6127_v2  ;;  %5079 = vmatprep.mubr.msk.f32.mxu1 %vm6025_vm0, %v6024_v0 }
  0x31   :  { %5073 = vmatprep.subr.mxu1 %v6024_v0  ;;  %462 = vperm.xlu1 %5654, %v460_v11  }
  0x32   :  { %5074 = vmatpush3.msra.mxu1 %v6130_v4  ;;  %5053 = vmatpush3.msra.mxu0 %v6185_v29 }
  0x33   :  { %5075 = vmatprep.subr.mxu1 %v6024_v0  ;;  %5032 = vmatprep.mubr.msk.f32.mxu0 %vm120_vm1, %v106_v30 }
  0x34   :  { %5076 = vmatpush3.msra.mxu1 %v6140_v7  ;;  %5054 = vmatprep.subr.mxu0 %v6024_v0 }
  0x35   :  { %5077 = vmatprep.subr.mxu1 %v6024_v0  ;;  %5033 = vmatmul.mubr.msk.f32.gmra.mxu0 %vm120_vm1, %v107_v31 }
  0x36   :  { %5078 = vmatpush3.msra.mxu1 %v6145_v8  ;;  %5055 = vmatpush3.msra.mxu0 %v6198_v32 }
  0x37   :  { %5082 = vmatprep.subr.mxu1 %v6024_v0  ;;  %5035 = vmatprep.mubr.msk.f32.mxu0 %vm120_vm1, %v108_v33 }
  0x38   :  { %5056 = vmatprep.subr.mxu0 %v6024_v0 }
  0x39   :  { %5057 = vmatpush3.msra.mxu0 %v6208_v34 }
  0x3a   :  { %5058 = vmatprep.subr.mxu0 %v6024_v0  ;;  %5036 = vmatmul.mubr.msk.f32.gmra.mxu0 %vm120_vm1, %v109_v35 }
  0x3b   :  { %5059 = vmatpush3.msra.mxu0 %v6219_v36  ;;  %5038 = vmatprep.mubr.msk.f32.mxu0 %vm120_vm1, %v110_v37 }
  0x3c   :  { %5060 = vmatprep.subr.mxu0 %v6024_v0 }
  0x3d   :  { %5061 = vmatpush3.msra.mxu0 %v6230_v38 }
  0x3e   :  { %5062 = vmatprep.subr.mxu0 %v6024_v0  ;;  %5039 = vmatmul.mubr.msk.f32.gmra.mxu0 %vm120_vm1, %v111_v39 }
  0x3f   :  { %5063 = vmatpush3.msra.mxu0 %v6242_v41  ;;  %5068 = vmatprep.mubr.msk.f32.mxu0 %vm6025_vm0, %v6024_v0 }
  0x40   :  { %5064 = vmatprep.subr.mxu0 %v6024_v0 }
  0x41   :  { %5065 = vmatpush3.msra.mxu0 %v6250_v42 }
  0x42   :  { %5066 = vmatprep.subr.mxu0 %v6024_v0 }
  0x43   :  { %5067 = vmatpush3.msra.mxu0 %v6259_v43 }
  0x44   :  { %5101 = vmatprep.subr.mxu0 %v6024_v0 }
  0xac   :  { %v6265_v44 = vpop.permute.xlu1 %462 }
  0xad   :  { %vm464_vm3 = vcmp.eq.s32.totalorder %v6265_v44, 1 }
  0xeb   :  { %v6169_v12 = vpop.f32.mrf.mxu0 }
  0xec   :  { %v217_v58 = vadd.f32 %v6169_v12, %v6174_v13 }
  0xed   :  { %v211_v14 = vpop.f32.mrf.mxu0 }
  0xee   :  { %v212_v15 = vadd.f32 %v6174_v13, %v211_v14 }
  0xef   :  { %v322_v16 = vpop.f32.mrf.mxu1 }
  0xf0   :  { %v326_v17 = vadd.f32 %v322_v16, %v212_v15  ;;  %v4653_v16 = vld [vmem:[%s7758_s1 + $0x8] sm:$0xff] }
  0xf1   :  { %v5051_v18 = vpop.f32.mrf.mxu1  ;;  %vm471_vm6 = vcmp.gt.f32.partialorder %v4653_v16, 0.0 }
  0xf2   :  { %5656 = vtanh.f32 %v326_v17  ;;  %v4649_v20 = vmul.f32 -1.442695, %v326_v17 }
  0xf4   :  { %5658 = vpow2.f32 %v4649_v20 }
  0xf5   :  { %v6306_v51 = vpop.f32.mrf.mxu0 }
  0xf7   :  { %v6308_v52 = vpop.f32.mrf.mxu0 }
  0xfa   :  { %v6310_v53 = vpop.f32.mrf.mxu0 }
  0xfc   :  { %v6312_v54 = vpop.f32.mrf.mxu0 }
  0xfe   :  { %v6314_v55 = vpop.f32.mrf.mxu0 }
  0xff   :  { %v5657_v19 = vpop.eup %5656 }
 0x100   :  { %336 = vrot.lane.b32.xlu0 %v5657_v19, %s6027_s25  ;;  %v6316_v56 = vpop.f32.mrf.mxu0 }
 0x101   :  { %v5659_v21 = vpop.eup %5658 }
 0x102   :  { %v330_v22 = vadd.f32 1.0, %v5659_v21 }
 0x104   :  { %5660 = vrcp.f32 %v330_v22 }
 0x111   :  { %v5661_v23 = vpop.eup %5660 }
 0x112   :  { %v334_v26 = vmul.f32 0.0, %v5661_v23 }
 0x172   :  { %v337_v24 = vpop.permute.xlu0 %336 }
 0x173   :  { %v339_v25 = vmul.f32 %v5661_v23, %v337_v24 }
 0x175   :  { %341 = vrot.lane.b32.xlu0 %v339_v25, %s6027_s25 }
 0x1e7   :  { %v342_v27 = vpop.permute.xlu0 %341 }
 0x1e8   :  { %v6179_v28 = vadd.f32 %v342_v27, %v334_v26 }
 0x1ea   :  { %5662 = vtanh.f32 %v6179_v28  ;;  %v6337_v26 = vsel %vm464_vm3, %v6179_v28, 0.0 }
 0x1f7   :  { %v5663_v40 = vpop.eup %5662 }
 0x1f8   :  { %347 = vrot.lane.b32.xlu1 %v5663_v40, %s6027_s25 }
 0x26a   :  { %v348_v45 = vpop.permute.xlu1 %347 }
 0x26b   :  { %v350_v46 = vmul.f32 %v5661_v23, %v348_v45  ;;  %v678_v23 = vsel %vm471_vm6, 1, %v6026_v10 }
 0x26d   :  { %352 = vrot.lane.b32.xlu0 %v350_v46, %s6028_s5  ;;  %v6271_v47 = vsel %vm464_vm3, %v350_v46, 0.0 }
 0x26e   :  { %473 = vrot.lane.b32.xlu1 %v6271_v47, %s6028_s5 }
 0x2df   :  { %v353_v48 = vpop.permute.xlu0 %352 }
 0x2e0   :  { %v355_v49 = vsel %vm252_vm4, %v353_v48, 0.0  ;;  %v474_v50 = vpop.permute.xlu1 %473 }
 0x2e1   :  { %5069 = vmatmul.mubr.msk.f32.vlgmr.msra.gmra.mxu0 %vm362_vm5, %v355_v49  ;;  %5080 = vmatmul.mubr.msk.f32.vlgmr.msra.gmra.mxu1 %vm252_vm4, %v474_v50 }
 0x2e2   :  { %5083 = vmatpush3.msra.mxu1 %v6185_v29  ;;  %5102 = vmatpush3.msra.mxu0 %v6127_v2 }
 0x2e3   :  { %5084 = vmatprep.subr.mxu1 %v6024_v0  ;;  %5103 = vmatprep.subr.mxu0 %v6024_v0 }
 0x2e4   :  { %5085 = vmatpush3.msra.mxu1 %v6198_v32  ;;  %5104 = vmatpush3.msra.mxu0 %v6130_v4 }
 0x2e5   :  { %5086 = vmatprep.subr.mxu1 %v6024_v0  ;;  %5098 = vmatprep.mubr.msk.f32.mxu1 %vm6025_vm0, %v6024_v0 }
 0x2e6   :  { %5087 = vmatpush3.msra.mxu1 %v6208_v34  ;;  %5105 = vmatprep.subr.mxu0 %v6024_v0 }
 0x2e7   :  { %5088 = vmatprep.subr.mxu1 %v6024_v0  ;;  %5106 = vmatpush3.msra.mxu0 %v6140_v7 }
 0x2e8   :  { %5089 = vmatpush3.msra.mxu1 %v6219_v36  ;;  %5107 = vmatprep.subr.mxu0 %v6024_v0 }
 0x2e9   :  { %5090 = vmatprep.subr.mxu1 %v6024_v0  ;;  %5108 = vmatpush3.msra.mxu0 %v6145_v8 }
 0x2ea   :  { %5091 = vmatpush3.msra.mxu1 %v6230_v38  ;;  %5109 = vmatprep.mubr.msk.f32.mxu0 %vm6025_vm0, %v6024_v0 }
 0x2eb   :  { %5092 = vmatprep.subr.mxu1 %v6024_v0  ;;  %5112 = vmatprep.subr.mxu0 %v6024_v0 }
 0x2ec   :  { %5093 = vmatpush3.msra.mxu1 %v6242_v41 }
 0x2ed   :  { %5094 = vmatprep.subr.mxu1 %v6024_v0 }
 0x2ee   :  { %5095 = vmatpush3.msra.mxu1 %v6250_v42 }
 0x2ef   :  { %5096 = vmatprep.subr.mxu1 %v6024_v0 }
 0x2f0   :  { %5097 = vmatpush3.msra.mxu1 %v6259_v43 }
 0x2f1   :  { %5131 = vmatprep.subr.mxu1 %v6024_v0 }
 0x3a1   :  { %v432_v59 = vpop.f32.mrf.mxu0  ;;  %v543_v60 = vpop.f32.mrf.mxu1 }
 0x3a2   :  { %v433_v61 = vadd.f32 %v6321_v57, %v432_v59  ;;  %v547_v62 = vadd.f32 %v543_v60, %v217_v58 }
 0x3a3   :  { %v5070_v63 = vpop.f32.mrf.mxu0  ;;  %v5081_v1 = vpop.f32.mrf.mxu1 }
 0x3a4   :  { %5664 = vtanh.f32 %v433_v61  ;;  %v4652_v6 = vmul.f32 -1.442695, %v433_v61  ;;  %v4655_v9 = vmul.f32 -1.442695, %v547_v62 }
 0x3a5   :  { %5666 = vtanh.f32 %v547_v62  ;;  %v222_v62 = vadd.f32 %v6174_v13, %v6308_v52 }
 0x3a6   :  { %5668 = vpow2.f32 %v4652_v6 }
 0x3a7   :  { %5670 = vpow2.f32 %v4655_v9 }
 0x3b1   :  { %v5665_v3 = vpop.eup %5664 }
 0x3b2   :  { %v5667_v5 = vpop.eup %5666  ;;  %445 = vrot.lane.b32.xlu0 %v5665_v3, %s6027_s25 }
 0x3b3   :  { %557 = vrot.lane.b32.xlu1 %v5667_v5, %s6027_s25  ;;  %v5669_v11 = vpop.eup %5668 }
 0x3b4   :  { %v5671_v12 = vpop.eup %5670  ;;  %v439_v14 = vadd.f32 1.0, %v5669_v11 }
 0x3b5   :  { %v551_v15 = vadd.f32 1.0, %v5671_v12 }
 0x3b6   :  { %5672 = vrcp.f32 %v439_v14 }
 0x3b7   :  { %5674 = vrcp.f32 %v551_v15 }
 0x3c3   :  { %v5673_v17 = vpop.eup %5672 }
 0x3c4   :  { %v5675_v19 = vpop.eup %5674  ;;  %v443_v24 = vmul.f32 0.0, %v5673_v17 }
 0x3c5   :  { %v555_v31 = vmul.f32 %v5675_v19, %v6337_v26 }
 0x424   :  { %v446_v18 = vpop.permute.xlu0 %445 }
 0x425   :  { %v448_v20 = vmul.f32 %v5673_v17, %v446_v18  ;;  %v558_v21 = vpop.permute.xlu1 %557 }
 0x426   :  { %v560_v22 = vmul.f32 %v5675_v19, %v558_v21 }
 0x427   :  { %450 = vrot.lane.b32.xlu0 %v448_v20, %s6027_s25 }
 0x428   :  { %562 = vrot.lane.b32.xlu1 %v560_v22, %s6027_s25 }
 0x42b   :  { %680 = vperm.xlu0 %5655, %v678_v23  }
 0x499   :  { %v451_v25 = vpop.permute.xlu0 %450 }
 0x49a   :  { %v6339_v27 = vadd.f32 %v451_v25, %v443_v24  ;;  %v563_v30 = vpop.permute.xlu1 %562 }
 0x49b   :  { %v6343_v33 = vadd.f32 %v563_v30, %v555_v31 }
 0x49c   :  { %5676 = vtanh.f32 %v6339_v27  ;;  %v6410_v25 = vsel %vm464_vm3, %v6339_v27, 0.0 }
 0x49d   :  { %5678 = vtanh.f32 %v6343_v33 }
 0x4a6   :  { %v6354_v48 = vpop.permute.xlu0 %680 }
 0x4a7   :  { %vm682_vm7 = vcmp.eq.s32.totalorder %v6354_v48, 1 }
 0x4a9   :  { %v5677_v35 = vpop.eup %5676 }
 0x4aa   :  { %456 = vrot.lane.b32.xlu1 %v5677_v35, %s6027_s25  ;;  %v5679_v37 = vpop.eup %5678 }
 0x4ae   :  { %568 = vrot.lane.b32.xlu1 %v5679_v37, %s6027_s25  ;;  %v6419_v37 = vsel %vm682_vm7, %v6343_v33, %v6337_v26 }
 0x51c   :  { %v457_v39 = vpop.permute.xlu1 %456 }
 0x51d   :  { %v459_v28 = vmul.f32 %v5673_v17, %v457_v39  ;;  %v4658_v17 = vld [vmem:[%s7758_s1 + $0x10] sm:$0xff] }
 0x51e   :  { %vm689_vm8 = vcmp.gt.f32.partialorder %v4658_v17, 0.0 }
 0x51f   :  { %v6350_v40 = vsel %vm464_vm3, %v459_v28, 0.0  ;;  %v896_v24 = vsel %vm689_vm8, 1, %v6026_v10  ;;  %vm2032_vm8 = vcmask 392192  }
 0x520   :  { %577 = vrot.lane.b32.xlu1 %v6350_v40, %s6029_s23  ;;  %v569_v45 = vpop.permute.xlu1 %568 }
 0x521   :  { %v571_v46 = vmul.f32 %v5675_v19, %v569_v45 }
 0x523   :  { %573 = vrot.lane.b32.xlu0 %v571_v46, %s6028_s5  ;;  %v6361_v49 = vsel %vm682_vm7, %v571_v46, %v6271_v47 }
 0x527   :  { %691 = vrot.lane.b32.xlu0 %v6361_v49, %s6028_s5 }
 0x592   :  { %v578_v50 = vpop.permute.xlu1 %577 }
 0x595   :  { %v574_v58 = vpop.permute.xlu0 %573 }
 0x596   :  { %v580_v59 = vsel %vm252_vm4, %v574_v58, %v578_v50 }
 0x597   :  { %5099 = vmatmul.mubr.msk.f32.vlgmr.msra.gmra.mxu1 %vm362_vm5, %v580_v59 }
 0x598   :  { %5132 = vmatpush3.msra.mxu1 %v6127_v2  ;;  %5139 = vmatprep.mubr.msk.f32.mxu1 %vm6025_vm0, %v6024_v0 }
 0x599   :  { %v692_v60 = vpop.permute.xlu0 %691  ;;  %5133 = vmatprep.subr.mxu1 %v6024_v0 }
 0x59a   :  { %5110 = vmatmul.mubr.msk.f32.vlgmr.msra.gmra.mxu0 %vm252_vm4, %v692_v60  ;;  %5134 = vmatpush3.msra.mxu1 %v6130_v4 }
 0x59b   :  { %5113 = vmatpush3.msra.mxu0 %v6185_v29  ;;  %5128 = vmatprep.mubr.msk.f32.mxu0 %vm6025_vm0, %v6024_v0 }
 0x59c   :  { %5114 = vmatprep.subr.mxu0 %v6024_v0  ;;  %5135 = vmatprep.subr.mxu1 %v6024_v0 }
 0x59d   :  { %5115 = vmatpush3.msra.mxu0 %v6198_v32  ;;  %5136 = vmatpush3.msra.mxu1 %v6140_v7 }
 0x59e   :  { %5116 = vmatprep.subr.mxu0 %v6024_v0  ;;  %5137 = vmatprep.subr.mxu1 %v6024_v0 }
 0x59f   :  { %5117 = vmatpush3.msra.mxu0 %v6208_v34  ;;  %5138 = vmatpush3.msra.mxu1 %v6145_v8 }
 0x5a0   :  { %5118 = vmatprep.subr.mxu0 %v6024_v0  ;;  %5142 = vmatprep.subr.mxu1 %v6024_v0 }
 0x5a1   :  { %5119 = vmatpush3.msra.mxu0 %v6219_v36 }
 0x5a2   :  { %5120 = vmatprep.subr.mxu0 %v6024_v0 }
 0x5a3   :  { %5121 = vmatpush3.msra.mxu0 %v6230_v38 }
 0x5a4   :  { %5122 = vmatprep.subr.mxu0 %v6024_v0 }
 0x5a5   :  { %5123 = vmatpush3.msra.mxu0 %v6242_v41 }
 0x5a6   :  { %5124 = vmatprep.subr.mxu0 %v6024_v0 }
 0x5a7   :  { %5125 = vmatpush3.msra.mxu0 %v6250_v42 }
 0x5a8   :  { %5126 = vmatprep.subr.mxu0 %v6024_v0 }
 0x5a9   :  { %5127 = vmatpush3.msra.mxu0 %v6259_v43 }
 0x5aa   :  { %5161 = vmatprep.subr.mxu0 %v6024_v0 }
 0x657   :  { %v650_v47 = vpop.f32.mrf.mxu1 }
 0x658   :  { %v651_v61 = vadd.f32 %v6321_v57, %v650_v47 }
 0x659   :  { %v5100_v63 = vpop.f32.mrf.mxu1 }
 0x65a   :  { %5680 = vtanh.f32 %v651_v61  ;;  %v761_v1 = vpop.f32.mrf.mxu0  ;;  %v4657_v11 = vmul.f32 -1.442695, %v651_v61 }
 0x65b   :  { %v765_v3 = vadd.f32 %v761_v1, %v222_v62  ;;  %v227_v1 = vadd.f32 %v6306_v51, %v6174_v13 }
 0x65c   :  { %v5111_v5 = vpop.f32.mrf.mxu0 }
 0x65d   :  { %5682 = vtanh.f32 %v765_v3  ;;  %v4660_v12 = vmul.f32 -1.442695, %v765_v3 }
 0x65e   :  { %5684 = vpow2.f32 %v4657_v11 }
 0x65f   :  { %5686 = vpow2.f32 %v4660_v12 }
 0x667   :  { %v5681_v6 = vpop.eup %5680 }
 0x668   :  { %663 = vrot.lane.b32.xlu1 %v5681_v6, %s6027_s25 }
 0x66a   :  { %v5683_v9 = vpop.eup %5682 }
 0x66b   :  { %775 = vrot.lane.b32.xlu0 %v5683_v9, %s6027_s25  ;;  %v5685_v14 = vpop.eup %5684 }
 0x66c   :  { %v5687_v15 = vpop.eup %5686  ;;  %v657_v16 = vadd.f32 1.0, %v5685_v14 }
 0x66d   :  { %v769_v52 = vadd.f32 1.0, %v5687_v15 }
 0x66e   :  { %5688 = vrcp.f32 %v657_v16 }
 0x66f   :  { %5690 = vrcp.f32 %v769_v52 }
 0x67b   :  { %v5689_v18 = vpop.eup %5688 }
 0x67c   :  { %v5691_v21 = vpop.eup %5690  ;;  %v661_v30 = vmul.f32 %v5689_v18, %v6410_v25 }
 0x67d   :  { %v773_v39 = vmul.f32 %v5691_v21, %v6419_v37 }
 0x6da   :  { %v664_v19 = vpop.permute.xlu1 %663 }
 0x6db   :  { %v666_v20 = vmul.f32 %v5689_v18, %v664_v19 }
 0x6dd   :  { %v776_v22 = vpop.permute.xlu0 %775  ;;  %668 = vrot.lane.b32.xlu1 %v666_v20, %s6027_s25 }
 0x6de   :  { %v778_v23 = vmul.f32 %v5691_v21, %v776_v22 }
 0x6e0   :  { %780 = vrot.lane.b32.xlu0 %v778_v23, %s6027_s25 }
 0x6e1   :  { %898 = vperm.xlu1 %5654, %v896_v24  }
 0x74f   :  { %v669_v31 = vpop.permute.xlu1 %668 }
 0x750   :  { %v6413_v35 = vadd.f32 %v669_v31, %v661_v30 }
 0x752   :  { %5692 = vtanh.f32 %v6413_v35  ;;  %v781_v28 = vpop.permute.xlu0 %780  ;;  %v6492_v31 = vsel %vm682_vm7, %v6413_v35, %v6410_v25 }
 0x753   :  { %v6423_v45 = vadd.f32 %v781_v28, %v773_v39 }
 0x755   :  { %5694 = vtanh.f32 %v6423_v45 }
 0x75c   :  { %v6428_v46 = vpop.permute.xlu1 %898 }
 0x75d   :  { %vm900_vm9 = vcmp.eq.s32.totalorder %v6428_v46, 1 }
 0x75f   :  { %v5693_v44 = vpop.eup %5692 }
 0x760   :  { %674 = vrot.lane.b32.xlu0 %v5693_v44, %s6027_s25 }
 0x762   :  { %v5695_v27 = vpop.eup %5694 }
 0x763   :  { %786 = vrot.lane.b32.xlu1 %v5695_v27, %s6027_s25  ;;  %v6501_v27 = vsel %vm900_vm9, %v6423_v45, %v6419_v37 }
 0x7d2   :  { %v675_v50 = vpop.permute.xlu0 %674 }
 0x7d3   :  { %v677_v26 = vmul.f32 %v5689_v18, %v675_v50  ;;  %v4663_v18 = vld [vmem:[%s7758_s1 + $0x18] sm:$0xff] }
 0x7d4   :  { %vm907_vm10 = vcmp.gt.f32.partialorder %v4663_v18, 0.0  ;;  %v4668_v18 = vld [vmem:[%s7758_s1 + $0x20] sm:$0xff] }
 0x7d5   :  { %v787_v33 = vpop.permute.xlu1 %786  ;;  %v6433_v58 = vsel %vm682_vm7, %v677_v26, %v6350_v40  ;;  %v1114_v30 = vsel %vm907_vm10, 1, %v6026_v10  ;;  %vm1125_vm12 = vcmp.gt.f32.partialorder %v4668_v18, 0.0 }
 0x7d6   :  { %v789_v59 = vmul.f32 %v5691_v21, %v787_v33  ;;  %795 = vrot.lane.b32.xlu1 %v6433_v58, %s6029_s23 }
 0x7d8   :  { %791 = vrot.lane.b32.xlu0 %v789_v59, %s6028_s5  ;;  %v6442_v60 = vsel %vm900_vm9, %v789_v59, %v6361_v49 }
 0x7dc   :  { %909 = vrot.lane.b32.xlu0 %v6442_v60, %s6028_s5 }
 0x848   :  { %v796_v47 = vpop.permute.xlu1 %795 }
 0x84a   :  { %v792_v61 = vpop.permute.xlu0 %791 }
 0x84b   :  { %v798_v40 = vsel %vm252_vm4, %v792_v61, %v796_v47 }
 0x84c   :  { %5129 = vmatmul.mubr.msk.f32.vlgmr.msra.gmra.mxu0 %vm362_vm5, %v798_v40 }
 0x84d   :  { %5162 = vmatpush3.msra.mxu0 %v6127_v2  ;;  %5169 = vmatprep.mubr.msk.f32.mxu0 %vm6025_vm0, %v6024_v0 }
 0x84e   :  { %v910_v62 = vpop.permute.xlu0 %909  ;;  %5163 = vmatprep.subr.mxu0 %v6024_v0 }
 0x84f   :  { %5140 = vmatmul.mubr.msk.f32.vlgmr.msra.gmra.mxu1 %vm252_vm4, %v910_v62  ;;  %5164 = vmatpush3.msra.mxu0 %v6130_v4 }
 0x850   :  { %5143 = vmatpush3.msra.mxu1 %v6185_v29  ;;  %5158 = vmatprep.mubr.msk.f32.mxu1 %vm6025_vm0, %v6024_v0 }
 0x851   :  { %5144 = vmatprep.subr.mxu1 %v6024_v0  ;;  %5165 = vmatprep.subr.mxu0 %v6024_v0 }
 0x852   :  { %5145 = vmatpush3.msra.mxu1 %v6198_v32  ;;  %5166 = vmatpush3.msra.mxu0 %v6140_v7 }
 0x853   :  { %5146 = vmatprep.subr.mxu1 %v6024_v0  ;;  %5167 = vmatprep.subr.mxu0 %v6024_v0 }
 0x854   :  { %5147 = vmatpush3.msra.mxu1 %v6208_v34  ;;  %5168 = vmatpush3.msra.mxu0 %v6145_v8 }
 0x855   :  { %5148 = vmatprep.subr.mxu1 %v6024_v0  ;;  %5172 = vmatprep.subr.mxu0 %v6024_v0 }
 0x856   :  { %5149 = vmatpush3.msra.mxu1 %v6219_v36 }
 0x857   :  { %5150 = vmatprep.subr.mxu1 %v6024_v0 }
 0x858   :  { %5151 = vmatpush3.msra.mxu1 %v6230_v38 }
 0x859   :  { %5152 = vmatprep.subr.mxu1 %v6024_v0 }
 0x85a   :  { %5153 = vmatpush3.msra.mxu1 %v6242_v41 }
 0x85b   :  { %5154 = vmatprep.subr.mxu1 %v6024_v0 }
 0x85c   :  { %5155 = vmatpush3.msra.mxu1 %v6250_v42 }
 0x85d   :  { %5156 = vmatprep.subr.mxu1 %v6024_v0 }
 0x85e   :  { %5157 = vmatpush3.msra.mxu1 %v6259_v43 }
 0x85f   :  { %5191 = vmatprep.subr.mxu1 %v6024_v0 }
 0x90c   :  { %v868_v49 = vpop.f32.mrf.mxu0 }
 0x90d   :  { %v869_v63 = vadd.f32 %v6321_v57, %v868_v49 }
 0x90e   :  { %v5130_v3 = vpop.f32.mrf.mxu0 }
 0x90f   :  { %5696 = vtanh.f32 %v869_v63  ;;  %v979_v5 = vpop.f32.mrf.mxu1  ;;  %v4662_v14 = vmul.f32 -1.442695, %v869_v63  ;;  %v232_v3 = vadd.f32 %v6174_v13, %v6312_v54 }
 0x910   :  { %v983_v6 = vadd.f32 %v979_v5, %v227_v1 }
 0x911   :  { %v5141_v9 = vpop.f32.mrf.mxu1 }
 0x912   :  { %5698 = vtanh.f32 %v983_v6  ;;  %v4665_v15 = vmul.f32 -1.442695, %v983_v6 }
 0x913   :  { %5700 = vpow2.f32 %v4662_v14 }
 0x914   :  { %5702 = vpow2.f32 %v4665_v15 }
 0x91c   :  { %v5697_v11 = vpop.eup %5696 }
 0x91d   :  { %881 = vrot.lane.b32.xlu1 %v5697_v11, %s6027_s25 }
 0x91f   :  { %v5699_v12 = vpop.eup %5698 }
 0x920   :  { %993 = vrot.lane.b32.xlu0 %v5699_v12, %s6027_s25  ;;  %v5701_v16 = vpop.eup %5700 }
 0x921   :  { %v5703_v52 = vpop.eup %5702  ;;  %v875_v17 = vadd.f32 1.0, %v5701_v16 }
 0x922   :  { %v987_v51 = vadd.f32 1.0, %v5703_v52 }
 0x923   :  { %5704 = vrcp.f32 %v875_v17 }
 0x924   :  { %5706 = vrcp.f32 %v987_v51 }
 0x930   :  { %v5705_v19 = vpop.eup %5704 }
 0x931   :  { %v5707_v22 = vpop.eup %5706  ;;  %v879_v39 = vmul.f32 %v5705_v19, %v6492_v31 }
 0x932   :  { %v991_v50 = vmul.f32 %v5707_v22, %v6501_v27 }
 0x98f   :  { %v882_v20 = vpop.permute.xlu1 %881 }
 0x990   :  { %v884_v21 = vmul.f32 %v5705_v19, %v882_v20 }
 0x992   :  { %886 = vrot.lane.b32.xlu1 %v884_v21, %s6027_s25  ;;  %v994_v23 = vpop.permute.xlu0 %993 }
 0x993   :  { %v996_v24 = vmul.f32 %v5707_v22, %v994_v23 }
 0x995   :  { %998 = vrot.lane.b32.xlu0 %v996_v24, %s6027_s25 }
 0x996   :  { %1116 = vperm.xlu1 %5654, %v1114_v30   ;;  %v1332_v30 = vsel %vm1125_vm12, 1, %v6026_v10 }
 0xa04   :  { %v887_v28 = vpop.permute.xlu1 %886 }
 0xa05   :  { %v6495_v44 = vadd.f32 %v887_v28, %v879_v39 }
 0xa07   :  { %5708 = vtanh.f32 %v6495_v44  ;;  %v999_v26 = vpop.permute.xlu0 %998  ;;  %v6574_v39 = vsel %vm900_vm9, %v6495_v44, %v6492_v31 }
 0xa08   :  { %v6505_v33 = vadd.f32 %v999_v26, %v991_v50 }
 0xa0a   :  { %5710 = vtanh.f32 %v6505_v33 }
 0xa11   :  { %v6510_v35 = vpop.permute.xlu1 %1116 }
 0xa12   :  { %vm1118_vm11 = vcmp.eq.s32.totalorder %v6510_v35, 1 }
 0xa14   :  { %v5709_v48 = vpop.eup %5708 }
 0xa15   :  { %892 = vrot.lane.b32.xlu0 %v5709_v48, %s6027_s25  ;;  %v6583_v48 = vsel %vm1118_vm11, %v6505_v33, %v6501_v27 }
 0xa17   :  { %v5711_v25 = vpop.eup %5710 }
 0xa18   :  { %1004 = vrot.lane.b32.xlu1 %v5711_v25, %s6027_s25 }
 0xa87   :  { %v893_v59 = vpop.permute.xlu0 %892 }
 0xa88   :  { %v895_v37 = vmul.f32 %v5705_v19, %v893_v59 }
 0xa8a   :  { %v1005_v45 = vpop.permute.xlu1 %1004  ;;  %v6515_v47 = vsel %vm900_vm9, %v895_v37, %v6433_v58 }
 0xa8b   :  { %v1007_v61 = vmul.f32 %v5707_v22, %v1005_v45  ;;  %1013 = vrot.lane.b32.xlu1 %v6515_v47, %s6029_s23 }
 0xa8d   :  { %1009 = vrot.lane.b32.xlu0 %v1007_v61, %s6028_s5  ;;  %v6524_v40 = vsel %vm1118_vm11, %v1007_v61, %v6442_v60 }
 0xa91   :  { %1127 = vrot.lane.b32.xlu0 %v6524_v40, %s6028_s5 }
 0xafd   :  { %v1014_v62 = vpop.permute.xlu1 %1013 }
 0xaff   :  { %v1010_v49 = vpop.permute.xlu0 %1009 }
 0xb00   :  { %v1016_v58 = vsel %vm252_vm4, %v1010_v49, %v1014_v62 }
 0xb01   :  { %5159 = vmatmul.mubr.msk.f32.vlgmr.msra.gmra.mxu1 %vm362_vm5, %v1016_v58 }
 0xb02   :  { %5192 = vmatpush3.msra.mxu1 %v6127_v2  ;;  %5199 = vmatprep.mubr.msk.f32.mxu1 %vm6025_vm0, %v6024_v0 }
 0xb03   :  { %v1128_v63 = vpop.permute.xlu0 %1127  ;;  %5193 = vmatprep.subr.mxu1 %v6024_v0 }
 0xb04   :  { %5170 = vmatmul.mubr.msk.f32.vlgmr.msra.gmra.mxu0 %vm252_vm4, %v1128_v63  ;;  %5194 = vmatpush3.msra.mxu1 %v6130_v4 }
 0xb05   :  { %5173 = vmatpush3.msra.mxu0 %v6185_v29  ;;  %5188 = vmatprep.mubr.msk.f32.mxu0 %vm6025_vm0, %v6024_v0 }
 0xb06   :  { %5174 = vmatprep.subr.mxu0 %v6024_v0  ;;  %5195 = vmatprep.subr.mxu1 %v6024_v0 }
 0xb07   :  { %5175 = vmatpush3.msra.mxu0 %v6198_v32  ;;  %5196 = vmatpush3.msra.mxu1 %v6140_v7 }
 0xb08   :  { %5176 = vmatprep.subr.mxu0 %v6024_v0  ;;  %5197 = vmatprep.subr.mxu1 %v6024_v0 }
 0xb09   :  { %5177 = vmatpush3.msra.mxu0 %v6208_v34  ;;  %5198 = vmatpush3.msra.mxu1 %v6145_v8 }
 0xb0a   :  { %5178 = vmatprep.subr.mxu0 %v6024_v0  ;;  %5202 = vmatprep.subr.mxu1 %v6024_v0 }
 0xb0b   :  { %5179 = vmatpush3.msra.mxu0 %v6219_v36 }
 0xb0c   :  { %5180 = vmatprep.subr.mxu0 %v6024_v0 }
 0xb0d   :  { %5181 = vmatpush3.msra.mxu0 %v6230_v38 }
 0xb0e   :  { %5182 = vmatprep.subr.mxu0 %v6024_v0 }
 0xb0f   :  { %5183 = vmatpush3.msra.mxu0 %v6242_v41 }
 0xb10   :  { %5184 = vmatprep.subr.mxu0 %v6024_v0 }
 0xb11   :  { %5185 = vmatpush3.msra.mxu0 %v6250_v42 }
 0xb12   :  { %5186 = vmatprep.subr.mxu0 %v6024_v0 }
 0xb13   :  { %5187 = vmatpush3.msra.mxu0 %v6259_v43 }
 0xb14   :  { %5221 = vmatprep.subr.mxu0 %v6024_v0 }
 0xbc1   :  { %v1086_v60 = vpop.f32.mrf.mxu1 }
 0xbc2   :  { %v1087_v1 = vadd.f32 %v6321_v57, %v1086_v60 }
 0xbc3   :  { %v5160_v5 = vpop.f32.mrf.mxu1 }
 0xbc4   :  { %5712 = vtanh.f32 %v1087_v1  ;;  %v1197_v6 = vpop.f32.mrf.mxu0  ;;  %v4667_v15 = vmul.f32 -1.442695, %v1087_v1 }
 0xbc5   :  { %v1201_v9 = vadd.f32 %v1197_v6, %v232_v3 }
 0xbc6   :  { %v5171_v11 = vpop.f32.mrf.mxu0 }
 0xbc7   :  { %5714 = vtanh.f32 %v1201_v9  ;;  %v4670_v16 = vmul.f32 -1.442695, %v1201_v9 }
 0xbc8   :  { %5716 = vpow2.f32 %v4667_v15 }
 0xbc9   :  { %5718 = vpow2.f32 %v4670_v16 }
 0xbd1   :  { %v5713_v12 = vpop.eup %5712 }
 0xbd2   :  { %1099 = vrot.lane.b32.xlu1 %v5713_v12, %s6027_s25 }
 0xbd4   :  { %v5715_v14 = vpop.eup %5714 }
 0xbd5   :  { %1211 = vrot.lane.b32.xlu0 %v5715_v14, %s6027_s25  ;;  %v5717_v52 = vpop.eup %5716 }
 0xbd6   :  { %v5719_v17 = vpop.eup %5718  ;;  %v1093_v51 = vadd.f32 1.0, %v5717_v52 }
 0xbd7   :  { %v1205_v54 = vadd.f32 1.0, %v5719_v17 }
 0xbd8   :  { %5720 = vrcp.f32 %v1093_v51 }
 0xbd9   :  { %5722 = vrcp.f32 %v1205_v54 }
 0xbe5   :  { %v5721_v19 = vpop.eup %5720 }
 0xbe6   :  { %v5723_v22 = vpop.eup %5722  ;;  %v1097_v28 = vmul.f32 %v5721_v19, %v6574_v39 }
 0xbe7   :  { %v1209_v25 = vmul.f32 %v5723_v22, %v6583_v48 }
 0xc44   :  { %v1100_v20 = vpop.permute.xlu1 %1099 }
 0xc45   :  { %v1102_v21 = vmul.f32 %v5721_v19, %v1100_v20 }
 0xc47   :  { %v1212_v23 = vpop.permute.xlu0 %1211  ;;  %1104 = vrot.lane.b32.xlu1 %v1102_v21, %s6027_s25 }
 0xc48   :  { %v1214_v24 = vmul.f32 %v5723_v22, %v1212_v23 }
 0xc4a   :  { %1216 = vrot.lane.b32.xlu0 %v1214_v24, %s6027_s25 }
 0xc4b   :  { %1334 = vperm.xlu1 %5654, %v1332_v30  }
 0xcb9   :  { %v1105_v50 = vpop.permute.xlu1 %1104 }
 0xcba   :  { %v6577_v26 = vadd.f32 %v1105_v50, %v1097_v28 }
 0xcbc   :  { %5724 = vtanh.f32 %v6577_v26  ;;  %v1217_v59 = vpop.permute.xlu0 %1216  ;;  %v6656_v16 = vsel %vm1118_vm11, %v6577_v26, %v6574_v39 }
 0xcbd   :  { %v6587_v37 = vadd.f32 %v1217_v59, %v1209_v25  ;;  %v5896_v59 = vld [vmem:[#allocation7 + $0x18] sm:$0xff] }
 0xcbf   :  { %5726 = vtanh.f32 %v6587_v37 }
 0xcc6   :  { %v6592_v44 = vpop.permute.xlu1 %1334 }
 0xcc7   :  { %vm1336_vm13 = vcmp.eq.s32.totalorder %v6592_v44, 1 }
 0xcc8   :  { %v6665_v54 = vsel %vm1336_vm13, %v6587_v37, %v6583_v48 }
 0xcc9   :  { %v5725_v46 = vpop.eup %5724 }
 0xcca   :  { %1110 = vrot.lane.b32.xlu0 %v5725_v46, %s6027_s25  ;;  %v5897_v46 = vld [vmem:[#allocation7 + $0x10] sm:$0xff] }
 0xccc   :  { %v5727_v31 = vpop.eup %5726 }
 0xccd   :  { %1222 = vrot.lane.b32.xlu1 %v5727_v31, %s6027_s25  ;;  %v6701_v31 = vld [vmem:[%s7764_s7 + $0x38] sm:$0xff] }
 0xd3c   :  { %v1111_v45 = vpop.permute.xlu0 %1110 }
 0xd3d   :  { %v1113_v27 = vmul.f32 %v5721_v19, %v1111_v45  ;;  %v6711_v45 = vld [vmem:[%s7764_s7 + $0x30] sm:$0xff] }
 0xd3f   :  { %v1223_v33 = vpop.permute.xlu1 %1222  ;;  %v6597_v61 = vsel %vm1118_vm11, %v1113_v27, %v6515_v47  ;;  %v5900_v27 = vld [vmem:[#allocation7 + $0x8] sm:$0xff] }
 0xd40   :  { %v1225_v62 = vmul.f32 %v5723_v22, %v1223_v33  ;;  %1231 = vrot.lane.b32.xlu1 %v6597_v61, %s6029_s23  ;;  %v6719_v33 = vld [vmem:[%s7764_s7 + $0x28] sm:$0xff] }
 0xd42   :  { %1227 = vrot.lane.b32.xlu0 %v1225_v62, %s6028_s5  ;;  %v6606_v49 = vsel %vm1336_vm13, %v1225_v62, %v6524_v40  ;;  %v6727_v62 = vld [vmem:[%s7764_s7 + $0x20] sm:$0xff] }
 0xd46   :  { %1345 = vrot.lane.b32.xlu0 %v6606_v49, %s6028_s5 }
 0xdb2   :  { %v1232_v58 = vpop.permute.xlu1 %1231 }
 0xdb4   :  { %v1228_v63 = vpop.permute.xlu0 %1227 }
 0xdb5   :  { %v1234_v47 = vsel %vm252_vm4, %v1228_v63, %v1232_v58  ;;  %v6741_v58 = vld [vmem:[%s7764_s7 + $0x10] sm:$0xff]  ;;  %v6748_v63 = vld [vmem:[%s7764_s7 + $0x8] sm:$0xff] }
 0xdb6   :  { %5189 = vmatmul.mubr.msk.f32.vlgmr.msra.gmra.mxu0 %vm362_vm5, %v1234_v47 }
 0xdb7   :  { %5222 = vmatpush3.msra.mxu0 %v6127_v2  ;;  %5229 = vmatprep.mubr.msk.f32.mxu0 %vm6025_vm0, %v6024_v0 }
 0xdb8   :  { %v1346_v60 = vpop.permute.xlu0 %1345  ;;  %5223 = vmatprep.subr.mxu0 %v6024_v0 }
 0xdb9   :  { %5200 = vmatmul.mubr.msk.f32.vlgmr.msra.gmra.mxu1 %vm252_vm4, %v1346_v60  ;;  %5224 = vmatpush3.msra.mxu0 %v6130_v4 }
 0xdba   :  { %5203 = vmatpush3.msra.mxu1 %v6185_v29  ;;  %5218 = vmatprep.mubr.msk.f32.mxu1 %vm6025_vm0, %v6024_v0 }
 0xdbb   :  { %5204 = vmatprep.subr.mxu1 %v6024_v0  ;;  %5225 = vmatprep.subr.mxu0 %v6024_v0 }
 0xdbc   :  { %5205 = vmatpush3.msra.mxu1 %v6198_v32  ;;  %5226 = vmatpush3.msra.mxu0 %v6140_v7  ;;  %v237_v7 = vadd.f32 %v6310_v53, %v6174_v13  ;;  %v4673_v53 = vld [vmem:[%s7758_s1 + $0x28] sm:$0xff] }
 0xdbd   :  { %5206 = vmatprep.subr.mxu1 %v6024_v0  ;;  %5227 = vmatprep.subr.mxu0 %v6024_v0  ;;  %vm1343_vm14 = vcmp.gt.f32.partialorder %v4673_v53, 0.0 }
 0xdbe   :  { %5207 = vmatpush3.msra.mxu1 %v6208_v34  ;;  %5228 = vmatpush3.msra.mxu0 %v6145_v8  ;;  %v1550_v15 = vsel %vm1343_vm14, 1, %v6026_v10 }
 0xdbf   :  { %5208 = vmatprep.subr.mxu1 %v6024_v0  ;;  %5232 = vmatprep.subr.mxu0 %v6024_v0 }
 0xdc0   :  { %5209 = vmatpush3.msra.mxu1 %v6219_v36 }
 0xdc1   :  { %5210 = vmatprep.subr.mxu1 %v6024_v0 }
 0xdc2   :  { %5211 = vmatpush3.msra.mxu1 %v6230_v38 }
 0xdc3   :  { %5212 = vmatprep.subr.mxu1 %v6024_v0 }
 0xdc4   :  { %5213 = vmatpush3.msra.mxu1 %v6242_v41 }
 0xdc5   :  { %5214 = vmatprep.subr.mxu1 %v6024_v0 }
 0xdc6   :  { %5215 = vmatpush3.msra.mxu1 %v6250_v42 }
 0xdc7   :  { %5216 = vmatprep.subr.mxu1 %v6024_v0 }
 0xdc8   :  { %5217 = vmatpush3.msra.mxu1 %v6259_v43 }
 0xdc9   :  { %5251 = vmatprep.subr.mxu1 %v6024_v0 }
 0xe76   :  { %v1304_v2 = vpop.f32.mrf.mxu0 }
 0xe77   :  { %v1305_v4 = vadd.f32 %v6321_v57, %v1304_v2  ;;  %v6758_v2 = vld [vmem:[%s7763_s6] ss:$0 sm:$0xff]  ;;  %s6030_s6 = smov 80  }
 0xe78   :  { %v5190_v8 = vpop.f32.mrf.mxu0 }
 0xe79   :  { %5728 = vtanh.f32 %v1305_v4  ;;  %v1415_v29 = vpop.f32.mrf.mxu1  ;;  %v4672_v41 = vmul.f32 -1.442695, %v1305_v4  ;;  %v242_v4 = vadd.f32 %v6758_v2, %v6316_v56 }
 0xe7a   :  { %v1419_v32 = vadd.f32 %v1415_v29, %v237_v7 }
 0xe7b   :  { %v5201_v34 = vpop.f32.mrf.mxu1 }
 0xe7c   :  { %5730 = vtanh.f32 %v1419_v32  ;;  %v4675_v42 = vmul.f32 -1.442695, %v1419_v32 }
 0xe7d   :  { %5732 = vpow2.f32 %v4672_v41 }
 0xe7e   :  { %5734 = vpow2.f32 %v4675_v42 }
 0xe86   :  { %v5729_v36 = vpop.eup %5728 }
 0xe87   :  { %1317 = vrot.lane.b32.xlu1 %v5729_v36, %s6027_s25 }
 0xe89   :  { %v5731_v38 = vpop.eup %5730 }
 0xe8a   :  { %1429 = vrot.lane.b32.xlu0 %v5731_v38, %s6027_s25  ;;  %v5733_v40 = vpop.eup %5732 }
 0xe8b   :  { %v5735_v1 = vpop.eup %5734  ;;  %v1311_v3 = vadd.f32 1.0, %v5733_v40  ;;  %v4678_v40 = vld [vmem:[%s7758_s1 + $0x30] sm:$0xff] }
 0xe8c   :  { %v1423_v13 = vadd.f32 1.0, %v5735_v1  ;;  %vm1561_vm2 = vcmp.gt.f32.partialorder %v4678_v40, 0.0  ;;  %v6879_v40 = vld [vmem:[%s7766_s9 + $0x20] sm:$0xff] }
 0xe8d   :  { %5736 = vrcp.f32 %v1311_v3 }
 0xe8e   :  { %5738 = vrcp.f32 %v1423_v13 }
 0xe9a   :  { %v5737_v5 = vpop.eup %5736 }
 0xe9b   :  { %v5739_v11 = vpop.eup %5738  ;;  %v1315_v52 = vmul.f32 %v5737_v5, %v6656_v16 }
 0xe9c   :  { %v1427_v18 = vmul.f32 %v5739_v11, %v6665_v54 }
 0xef9   :  { %v1318_v6 = vpop.permute.xlu1 %1317 }
 0xefa   :  { %v1320_v9 = vmul.f32 %v5737_v5, %v1318_v6 }
 0xefc   :  { %1322 = vrot.lane.b32.xlu1 %v1320_v9, %s6027_s25  ;;  %v1430_v12 = vpop.permute.xlu0 %1429  ;;  %v1768_v9 = vsel %vm1561_vm2, 1, %v6026_v10 }
 0xefd   :  { %v1432_v14 = vmul.f32 %v5739_v11, %v1430_v12 }
 0xeff   :  { %1434 = vrot.lane.b32.xlu0 %v1432_v14, %s6027_s25 }
 0xf00   :  { %1552 = vperm.xlu1 %5654, %v1550_v15  }
 0xf6e   :  { %v1323_v17 = vpop.permute.xlu1 %1322 }
 0xf6f   :  { %v6659_v51 = vadd.f32 %v1323_v17, %v1315_v52 }
 0xf71   :  { %5740 = vtanh.f32 %v6659_v51  ;;  %v1435_v19 = vpop.permute.xlu0 %1434 }
 0xf72   :  { %v6669_v20 = vadd.f32 %v1435_v19, %v1427_v18 }
 0xf74   :  { %5742 = vtanh.f32 %v6669_v20 }
 0xf7b   :  { %v6674_v22 = vpop.permute.xlu1 %1552 }
 0xf7c   :  { %vm1554_vm15 = vcmp.eq.s32.totalorder %v6674_v22, 1  ;;  %v6874_v22 = vld [vmem:[%s7766_s9 + $0x28] sm:$0xff] }
 0xf7d   :  { %v6783_v52 = vsel %vm1554_vm15, %v6669_v20, %v6665_v54 }
 0xf7e   :  { %v5741_v35 = vpop.eup %5740 }
 0xf7f   :  { %1328 = vrot.lane.b32.xlu0 %v5741_v35, %s6027_s25 }
 0xf81   :  { %v5743_v21 = vpop.eup %5742 }
 0xf82   :  { %1440 = vrot.lane.b32.xlu1 %v5743_v21, %s6027_s25 }
 0xff1   :  { %v1329_v23 = vpop.permute.xlu0 %1328 }
 0xff2   :  { %v1331_v24 = vmul.f32 %v5737_v5, %v1329_v23 }
 0xff4   :  { %v1441_v30 = vpop.permute.xlu1 %1440  ;;  %v6679_v39 = vsel %vm1336_vm13, %v1331_v24, %v6597_v61  ;;  %v5902_v61 = vld [vmem:[#allocation7] sm:$0xff] }
 0xff5   :  { %v1443_v28 = vmul.f32 %v5739_v11, %v1441_v30  ;;  %1449 = vrot.lane.b32.xlu1 %v6679_v39, %s6029_s23  ;;  %v6774_v11 = vsel %vm1336_vm13, %v6659_v51, %v6656_v16 }
 0xff7   :  { %1445 = vrot.lane.b32.xlu0 %v1443_v28, %s6028_s5  ;;  %v6688_v50 = vsel %vm1554_vm15, %v1443_v28, %v6606_v49  ;;  %v6734_v49 = vld [vmem:[%s7764_s7 + $0x18] sm:$0xff] }
 0xffb   :  { %1563 = vrot.lane.b32.xlu0 %v6688_v50, %s6028_s5 }
0x1067   :  { %v1450_v26 = vpop.permute.xlu1 %1449 }
0x1069   :  { %v1446_v48 = vpop.permute.xlu0 %1445 }
0x106a   :  { %v1452_v25 = vsel %vm252_vm4, %v1446_v48, %v1450_v26 }
0x106b   :  { %5219 = vmatmul.mubr.msk.f32.vlgmr.msra.gmra.mxu1 %vm362_vm5, %v1452_v25  ;;  %v6838_v25 = vld [vmem:[%s7765_s8] ss:$0 sm:$0xff] }
0x106c   :  { %5252 = vmatpush3.msra.mxu1 %v5896_v59  ;;  %5259 = vmatprep.mubr.msk.f32.mxu1 %vm6025_vm0, %v6024_v0 }
0x106d   :  { %v1564_v37 = vpop.permute.xlu0 %1563  ;;  %5253 = vmatprep.subr.mxu1 %v6024_v0 }
0x106e   :  { %5230 = vmatmul.mubr.msk.f32.vlgmr.msra.gmra.mxu0 %vm252_vm4, %v1564_v37  ;;  %5254 = vmatpush3.msra.mxu1 %v5897_v46  ;;  %v247_v37 = vadd.f32 %v6758_v2, %v6314_v55 }
0x106f   :  { %5233 = vmatpush3.msra.mxu0 %v6701_v31  ;;  %5248 = vmatprep.mubr.msk.f32.mxu0 %vm6025_vm0, %v6024_v0 }
0x1070   :  { %5234 = vmatprep.subr.mxu0 %v6024_v0  ;;  %5255 = vmatprep.subr.mxu1 %v6024_v0 }
0x1071   :  { %5235 = vmatpush3.msra.mxu0 %v6711_v45  ;;  %5256 = vmatpush3.msra.mxu1 %v5900_v27 }
0x1072   :  { %5236 = vmatprep.subr.mxu0 %v6024_v0  ;;  %5257 = vmatprep.subr.mxu1 %v6024_v0 }
0x1073   :  { %5237 = vmatpush3.msra.mxu0 %v6719_v33  ;;  %5258 = vmatpush3.msra.mxu1 %v5902_v61 }
0x1074   :  { %5238 = vmatprep.subr.mxu0 %v6024_v0  ;;  %5262 = vmatprep.subr.mxu1 %v6024_v0 }
0x1075   :  { %5239 = vmatpush3.msra.mxu0 %v6727_v62 }
0x1076   :  { %5240 = vmatprep.subr.mxu0 %v6024_v0 }
0x1077   :  { %5241 = vmatpush3.msra.mxu0 %v6734_v49 }
0x1078   :  { %5242 = vmatprep.subr.mxu0 %v6024_v0 }
0x1079   :  { %5243 = vmatpush3.msra.mxu0 %v6741_v58 }
0x107a   :  { %5244 = vmatprep.subr.mxu0 %v6024_v0 }
0x107b   :  { %5245 = vmatpush3.msra.mxu0 %v6748_v63 }
0x107c   :  { %5246 = vmatprep.subr.mxu0 %v6024_v0 }
0x107d   :  { %5247 = vmatpush3.msra.mxu0 %v6259_v43 }
0x107e   :  { %5281 = vmatprep.subr.mxu0 %v6024_v0 }
0x112b   :  { %v1522_v47 = vpop.f32.mrf.mxu1 }
0x112c   :  { %v1523_v60 = vadd.f32 %v6321_v57, %v1522_v47 }
0x112d   :  { %v5220_v7 = vpop.f32.mrf.mxu1 }
0x112e   :  { %5744 = vtanh.f32 %v1523_v60  ;;  %v1633_v8 = vpop.f32.mrf.mxu0  ;;  %v4677_v57 = vmul.f32 -1.442695, %v1523_v60  ;;  %v4683_v60 = vld [vmem:[%s7758_s1 + $0x38] sm:$0xff] }
0x112f   :  { %v1637_v29 = vadd.f32 %v1633_v8, %v242_v4  ;;  %vm1779_vm6 = vcmp.gt.f32.partialorder %v4683_v60, 0.0 }
0x1130   :  { %v5231_v32 = vpop.f32.mrf.mxu0 }
0x1131   :  { %5746 = vtanh.f32 %v1637_v29  ;;  %v4680_v36 = vmul.f32 -1.442695, %v1637_v29 }
0x1132   :  { %5748 = vpow2.f32 %v4677_v57 }
0x1133   :  { %5750 = vpow2.f32 %v4680_v36 }
0x113b   :  { %v5745_v43 = vpop.eup %5744 }
0x113c   :  { %1535 = vrot.lane.b32.xlu1 %v5745_v43, %s6027_s25  ;;  %v1986_v43 = vsel %vm1779_vm6, 1, %v6026_v10 }
0x113e   :  { %v5747_v34 = vpop.eup %5746 }
0x113f   :  { %1647 = vrot.lane.b32.xlu0 %v5747_v34, %s6027_s25  ;;  %v5749_v38 = vpop.eup %5748 }
0x1140   :  { %v5751_v41 = vpop.eup %5750  ;;  %v1529_v42 = vadd.f32 1.0, %v5749_v38 }
0x1141   :  { %v1641_v56 = vadd.f32 1.0, %v5751_v41 }
0x1142   :  { %5752 = vrcp.f32 %v1529_v42 }
0x1143   :  { %5754 = vrcp.f32 %v1641_v56 }
0x114f   :  { %v5753_v1 = vpop.eup %5752 }
0x1150   :  { %v5755_v53 = vpop.eup %5754  ;;  %v1533_v12 = vmul.f32 %v5753_v1, %v6774_v11 }
0x1151   :  { %v1645_v17 = vmul.f32 %v5755_v53, %v6783_v52 }
0x11ae   :  { %v1536_v3 = vpop.permute.xlu1 %1535 }
0x11af   :  { %v1538_v13 = vmul.f32 %v5753_v1, %v1536_v3 }
0x11b1   :  { %v1648_v5 = vpop.permute.xlu0 %1647  ;;  %1540 = vrot.lane.b32.xlu1 %v1538_v13, %s6027_s25  ;;  %v6890_v13 = vld [vmem:[%s7766_s9 + $0x18] sm:$0xff] }
0x11b2   :  { %v1650_v6 = vmul.f32 %v5755_v53, %v1648_v5  ;;  %v6903_v5 = vld [vmem:[%s7766_s9 + $0x8] sm:$0xff] }
0x11b4   :  { %1652 = vrot.lane.b32.xlu0 %v1650_v6, %s6027_s25  ;;  %v6911_v6 = vld [vmem:[%s7766_s9] sm:$0xff] }
0x11b5   :  { %1770 = vperm.xlu1 %5654, %v1768_v9  }
0x1223   :  { %v1541_v14 = vpop.permute.xlu1 %1540 }
0x1224   :  { %v6777_v15 = vadd.f32 %v1541_v14, %v1533_v12 }
0x1226   :  { %5756 = vtanh.f32 %v6777_v15  ;;  %v1653_v18 = vpop.permute.xlu0 %1652  ;;  %v6855_v34 = vsel %vm1554_vm15, %v6777_v15, %v6774_v11 }
0x1227   :  { %v6787_v19 = vadd.f32 %v1653_v18, %v1645_v17 }
0x1229   :  { %5758 = vtanh.f32 %v6787_v19 }
0x1230   :  { %v6792_v51 = vpop.permute.xlu1 %1770 }
0x1231   :  { %vm1772_vm3 = vcmp.eq.s32.totalorder %v6792_v51, 1  ;;  %v6969_v51 = vld [vmem:[%s7768_s11 + $0x38] sm:$0xff] }
0x1232   :  { %v6864_v41 = vsel %vm1772_vm3, %v6787_v19, %v6783_v52 }
0x1233   :  { %v5757_v44 = vpop.eup %5756 }
0x1234   :  { %1546 = vrot.lane.b32.xlu0 %v5757_v44, %s6027_s25 }
0x1236   :  { %v5759_v16 = vpop.eup %5758 }
0x1237   :  { %1658 = vrot.lane.b32.xlu1 %v5759_v16, %s6027_s25  ;;  %v2018_v16 = vld [vmem:[#allocation2] sm:$0xff] }
0x12a6   :  { %v1547_v35 = vpop.permute.xlu0 %1546 }
0x12a7   :  { %v1549_v54 = vmul.f32 %v5753_v1, %v1547_v35 }
0x12a9   :  { %v1659_v20 = vpop.permute.xlu1 %1658  ;;  %v6797_v21 = vsel %vm1554_vm15, %v1549_v54, %v6679_v39 }
0x12aa   :  { %v1661_v23 = vmul.f32 %v5755_v53, %v1659_v20  ;;  %1667 = vrot.lane.b32.xlu1 %v6797_v21, %s6029_s23  ;;  %v6897_v53 = vld [vmem:[%s7766_s9 + $0x10] sm:$0xff] }
0x12ac   :  { %1663 = vrot.lane.b32.xlu0 %v1661_v23, %s6028_s5  ;;  %v6806_v24 = vsel %vm1772_vm3, %v1661_v23, %v6688_v50  ;;  %v5908_v50 = vld [vmem:[%s7764_s7] sm:$0xff] }
0x12b0   :  { %1781 = vrot.lane.b32.xlu0 %v6806_v24, %s6028_s5 }
0x131c   :  { %v1668_v30 = vpop.permute.xlu1 %1667 }
0x131e   :  { %v1664_v28 = vpop.permute.xlu0 %1663 }
0x131f   :  { %v1670_v39 = vsel %vm252_vm4, %v1664_v28, %v1668_v30 }
0x1320   :  { %5249 = vmatmul.mubr.msk.f32.vlgmr.msra.gmra.mxu0 %vm362_vm5, %v1670_v39 }
0x1321   :  { %5293 = vmatprep.mubr.msk.f32.mxu0 %vm6025_vm0, %v6024_v0  ;;  %5282 = vmatpush3.msra.mxu0 %v6874_v22 }
0x1322   :  { %v1782_v26 = vpop.permute.xlu0 %1781  ;;  %5283 = vmatprep.subr.mxu0 %v6024_v0 }
0x1323   :  { %5260 = vmatmul.mubr.msk.f32.vlgmr.msra.gmra.mxu1 %vm252_vm4, %v1782_v26  ;;  %5284 = vmatpush3.msra.mxu0 %v6879_v40 }
0x1324   :  { %5263 = vmatpush3.msra.mxu1 %v6701_v31  ;;  %5278 = vmatprep.mubr.msk.f32.mxu1 %vm6025_vm0, %v6024_v0 }
0x1325   :  { %5264 = vmatprep.subr.mxu1 %v6024_v0  ;;  %5285 = vmatprep.subr.mxu0 %v6024_v0 }
0x1326   :  { %5265 = vmatpush3.msra.mxu1 %v6711_v45  ;;  %5286 = vmatpush3.msra.mxu0 %v6890_v13 }
0x1327   :  { %5266 = vmatprep.subr.mxu1 %v6024_v0  ;;  %5287 = vmatprep.subr.mxu0 %v6024_v0 }
0x1328   :  { %5267 = vmatpush3.msra.mxu1 %v6719_v33  ;;  %5288 = vmatpush3.msra.mxu0 %v6897_v53 }
0x1329   :  { %5268 = vmatprep.subr.mxu1 %v6024_v0  ;;  %5289 = vmatprep.subr.mxu0 %v6024_v0 }
0x132a   :  { %5269 = vmatpush3.msra.mxu1 %v6727_v62  ;;  %5290 = vmatpush3.msra.mxu0 %v6903_v5 }
0x132b   :  { %5270 = vmatprep.subr.mxu1 %v6024_v0  ;;  %5291 = vmatprep.subr.mxu0 %v6024_v0 }
0x132c   :  { %5271 = vmatpush3.msra.mxu1 %v6734_v49  ;;  %5292 = vmatpush3.msra.mxu0 %v6911_v6 }
0x132d   :  { %5272 = vmatprep.subr.mxu1 %v6024_v0  ;;  %5296 = vmatprep.subr.mxu0 %v6024_v0 }
0x132e   :  { %5273 = vmatpush3.msra.mxu1 %v6741_v58 }
0x132f   :  { %5274 = vmatprep.subr.mxu1 %v6024_v0 }
0x1330   :  { %5275 = vmatpush3.msra.mxu1 %v6748_v63 }
0x1331   :  { %5276 = vmatprep.subr.mxu1 %v6024_v0 }
0x1332   :  { %5277 = vmatpush3.msra.mxu1 %v5908_v50 }
0x1333   :  { %5315 = vmatprep.subr.mxu1 %v6024_v0 }
0x13e0   :  { %v1740_v48 = vpop.f32.mrf.mxu0 }
0x13e1   :  { %v1741_v59 = vadd.f32 %v6838_v25, %v1740_v48 }
0x13e2   :  { %v5250_v46 = vpop.f32.mrf.mxu0 }
0x13e3   :  { %5760 = vtanh.f32 %v1741_v59  ;;  %v1851_v31 = vpop.f32.mrf.mxu1  ;;  %v4682_v62 = vmul.f32 -1.442695, %v1741_v59 }
0x13e4   :  { %v1855_v45 = vadd.f32 %v1851_v31, %v247_v37 }
0x13e5   :  { %v5261_v27 = vpop.f32.mrf.mxu1 }
0x13e6   :  { %5762 = vtanh.f32 %v1855_v45  ;;  %v4685_v49 = vmul.f32 -1.442695, %v1855_v45 }
0x13e7   :  { %5764 = vpow2.f32 %v4682_v62 }
0x13e8   :  { %5766 = vpow2.f32 %v4685_v49 }
0x13f0   :  { %v5761_v33 = vpop.eup %5760 }
0x13f1   :  { %1753 = vrot.lane.b32.xlu1 %v5761_v33, %s6027_s25 }
0x13f3   :  { %v5763_v61 = vpop.eup %5762 }
0x13f4   :  { %1865 = vrot.lane.b32.xlu0 %v5763_v61, %s6027_s25  ;;  %v5765_v58 = vpop.eup %5764 }
0x13f5   :  { %v5767_v63 = vpop.eup %5766  ;;  %v1747_v47 = vadd.f32 1.0, %v5765_v58 }
0x13f6   :  { %v1859_v55 = vadd.f32 1.0, %v5767_v63 }
0x13f7   :  { %5768 = vrcp.f32 %v1747_v47 }
0x13f8   :  { %5770 = vrcp.f32 %v1859_v55 }
0x1404   :  { %v5769_v2 = vpop.eup %5768 }
0x1405   :  { %v5771_v8 = vpop.eup %5770  ;;  %v1751_v57 = vmul.f32 %v5769_v2, %v6855_v34 }
0x1406   :  { %v1863_v10 = vmul.f32 %v5771_v8, %v6864_v41 }
0x1463   :  { %v1754_v4 = vpop.permute.xlu1 %1753 }
0x1464   :  { %v1756_v7 = vmul.f32 %v5769_v2, %v1754_v4 }
0x1466   :  { %1758 = vrot.lane.b32.xlu1 %v1756_v7, %s6027_s25  ;;  %v1866_v29 = vpop.permute.xlu0 %1865 }
0x1467   :  { %v1868_v32 = vmul.f32 %v5771_v8, %v1866_v29  ;;  %v6981_v29 = vld [vmem:[%s7768_s11 + $0x28] sm:$0xff] }
0x1469   :  { %1870 = vrot.lane.b32.xlu0 %v1868_v32, %s6027_s25  ;;  %v6988_v32 = vld [vmem:[%s7768_s11 + $0x20] sm:$0xff] }
0x146a   :  { %1988 = vperm.xlu1 %5654, %v1986_v43  }
0x14d8   :  { %v1759_v36 = vpop.permute.xlu1 %1758 }
0x14d9   :  { %v6858_v38 = vadd.f32 %v1759_v36, %v1751_v57  ;;  %v7003_v57 = vld [vmem:[%s7768_s11 + $0x10] sm:$0xff] }
0x14db   :  { %5772 = vtanh.f32 %v6858_v38  ;;  %v1871_v42 = vpop.permute.xlu0 %1870  ;;  %v6953_v58 = vsel %vm1772_vm3, %v6858_v38, %v6855_v34  ;;  %v6995_v34 = vld [vmem:[%s7768_s11 + $0x18] sm:$0xff]  ;;  %v7013_v38 = vld [vmem:[%s7768_s11 + $0x8] sm:$0xff] }
0x14dc   :  { %v6868_v56 = vadd.f32 %v1871_v42, %v1863_v10 }
0x14de   :  { %5774 = vtanh.f32 %v6868_v56 }
0x14e5   :  { %v6914_v9 = vpop.permute.xlu1 %1988 }
0x14e6   :  { %vm1990_vm7 = vcmp.eq.s32.totalorder %v6914_v9, 1  ;;  %v7082_v9 = vld [vmem:[%s7770_s13 + $0x8] sm:$0xff] }
0x14e7   :  { %v1992_v60 = vsel %vm1990_vm7, %v6868_v56, %v6864_v41  ;;  %v7020_v41 = vld [vmem:[%s7768_s11] sm:$0xff] }
0x14e8   :  { %v5773_v1 = vpop.eup %5772 }
0x14e9   :  { %1764 = vrot.lane.b32.xlu0 %v5773_v1, %s6027_s25 }
0x14eb   :  { %v5775_v3 = vpop.eup %5774 }
0x14ec   :  { %1876 = vrot.lane.b32.xlu1 %v5775_v3, %s6027_s25 }
0x155b   :  { %v1765_v11 = vpop.permute.xlu0 %1764 }
0x155c   :  { %v1767_v12 = vmul.f32 %v5769_v2, %v1765_v11 }
0x155e   :  { %v1877_v14 = vpop.permute.xlu1 %1876  ;;  %v6920_v15 = vsel %vm1772_vm3, %v1767_v12, %v6797_v21 }
0x155f   :  { %v1879_v52 = vmul.f32 %v5771_v8, %v1877_v14  ;;  %1885 = vrot.lane.b32.xlu1 %v6920_v15, %s6029_s23  ;;  %v6974_v8 = vld [vmem:[%s7768_s11 + $0x30] sm:$0xff] }
0x1561   :  { %1881 = vrot.lane.b32.xlu0 %v1879_v52, %s6028_s5  ;;  %v1991_v17 = vsel %vm1990_vm7, %v1879_v52, %v6806_v24  ;;  %v6942_v24 = vld [vmem:[%s7767_s10] ss:$0 sm:$0xff] }
0x1565   :  { %2022 = vrot.lane.b32.xlu0 %v1991_v17, %s6030_s6 }
0x15d1   :  { %v1886_v18 = vpop.permute.xlu1 %1885 }
0x15d3   :  { %v1882_v19 = vpop.permute.xlu0 %1881 }
0x15d4   :  { %v1888_v44 = vsel %vm252_vm4, %v1882_v19, %v1886_v18 }
0x15d5   :  { %5279 = vmatmul.mubr.msk.f32.vlgmr.msra.gmra.mxu1 %vm362_vm5, %v1888_v44 }
0x15d6   :  { %5323 = vmatprep.mubr.msk.f32.mxu1 %vm6025_vm0, %v6024_v0 }
0x15d7   :  { %v2023_v35 = vpop.permute.xlu0 %2022 }
0x15d8   :  { %v2025_v54 = vsel %vm120_vm1, %v2018_v16, %v2023_v35 }
0x15d9   :  { %5294 = vmatmul.mubr.msk.f32.vlgmr.msra.gmra.mxu0 %vm2032_vm8, %v2025_v54 }
0x15da   :  { %5312 = vmatprep.mubr.msk.f32.mxu0 %vm6025_vm0, %v6024_v0  ;;  %5297 = vmatpush3.msra.mxu0 %v6969_v51 }
0x15db   :  { %5298 = vmatprep.subr.mxu0 %v6024_v0 }
0x15dc   :  { %5299 = vmatpush3.msra.mxu0 %v6974_v8 }
0x15dd   :  { %5300 = vmatprep.subr.mxu0 %v6024_v0 }
0x15de   :  { %5301 = vmatpush3.msra.mxu0 %v6981_v29 }
0x15df   :  { %5302 = vmatprep.subr.mxu0 %v6024_v0 }
0x15e0   :  { %5303 = vmatpush3.msra.mxu0 %v6988_v32 }
0x15e1   :  { %5304 = vmatprep.subr.mxu0 %v6024_v0 }
0x15e2   :  { %5305 = vmatpush3.msra.mxu0 %v6995_v34 }
0x15e3   :  { %5306 = vmatprep.subr.mxu0 %v6024_v0 }
0x15e4   :  { %5307 = vmatpush3.msra.mxu0 %v7003_v57 }
0x15e5   :  { %5308 = vmatprep.subr.mxu0 %v6024_v0 }
0x15e6   :  { %5309 = vmatpush3.msra.mxu0 %v7013_v38 }
0x15e7   :  { %5310 = vmatprep.subr.mxu0 %v6024_v0 }
0x15e8   :  { %5311 = vmatpush3.msra.mxu0 %v7020_v41 }
0x15e9   :  { %5348 = vmatprep.subr.mxu0 %v6024_v0 }
0x1695   :  { %v1958_v20 = vpop.f32.mrf.mxu1 }
0x1696   :  { %v1959_v21 = vadd.f32 %v6838_v25, %v1958_v20 }
0x1697   :  { %v5280_v23 = vpop.f32.mrf.mxu1 }
0x1698   :  { %5776 = vtanh.f32 %v1959_v21  ;;  %v4687_v48 = vmul.f32 -1.442695, %v1959_v21 }
0x1699   :  { %v2102_v30 = vpop.f32.mrf.mxu0 }
0x169a   :  { %v2103_v28 = vadd.f32 %v6942_v24, %v2102_v30 }
0x169b   :  { %v5295_v39 = vpop.f32.mrf.mxu0 }
0x169c   :  { %5778 = vtanh.f32 %v2103_v28  ;;  %v4690_v25 = vmul.f32 -1.442695, %v2103_v28 }
0x169d   :  { %5780 = vpow2.f32 %v4687_v48  ;;  %v7089_v48 = vld [vmem:[%s7770_s13] sm:$0xff] }
0x169e   :  { %5782 = vpow2.f32 %v4690_v25 }
0x16a5   :  { %v5777_v26 = vpop.eup %5776 }
0x16a6   :  { %1971 = vrot.lane.b32.xlu1 %v5777_v26, %s6027_s25  ;;  %v7070_v26 = vld [vmem:[%s7770_s13 + $0x18] sm:$0xff] }
0x16a7   :  { %5316 = vmatpush3.msra.mxu1 %v7070_v26 }
0x16a8   :  { %5317 = vmatprep.subr.mxu1 %v6024_v0 }
0x16a9   :  { %v5779_v50 = vpop.eup %5778 }
0x16aa   :  { %2115 = vrot.lane.b32.xlu0 %v5779_v50, %s6027_s25  ;;  %v5781_v59 = vpop.eup %5780  ;;  %v7075_v50 = vld [vmem:[%s7770_s13 + $0x10] sm:$0xff] }
0x16ab   :  { %v1965_v37 = vadd.f32 1.0, %v5781_v59  ;;  %v5783_v46 = vpop.eup %5782  ;;  %5318 = vmatpush3.msra.mxu1 %v7075_v50 }
0x16ac   :  { %v2109_v31 = vadd.f32 1.0, %v5783_v46  ;;  %5319 = vmatprep.subr.mxu1 %v6024_v0 }
0x16ad   :  { %5784 = vrcp.f32 %v1965_v37  ;;  %5320 = vmatpush3.msra.mxu1 %v7082_v9 }
0x16ae   :  { %5786 = vrcp.f32 %v2109_v31  ;;  %5321 = vmatprep.subr.mxu1 %v6024_v0  ;;  %v7106_v31 = vld [vmem:[%s7771_s14] ss:$0 sm:$0xff] }
0x16af   :  { %5322 = vmatpush3.msra.mxu1 %v7089_v48 }
0x16b0   :  { %5326 = vmatprep.subr.mxu1 %v6024_v0 }
0x16ba   :  { %v5785_v45 = vpop.eup %5784 }
0x16bb   :  { %v5787_v61 = vpop.eup %5786  ;;  %v1969_v63 = vmul.f32 %v5785_v45, %v6953_v58 }
0x16bc   :  { %v2113_v2 = vmul.f32 %v5787_v61, %v1992_v60 }
0x1718   :  { %v1972_v27 = vpop.permute.xlu1 %1971 }
0x1719   :  { %v1974_v33 = vmul.f32 %v5785_v45, %v1972_v27 }
0x171b   :  { %1976 = vrot.lane.b32.xlu1 %v1974_v33, %s6027_s25 }
0x171c   :  { %v2116_v62 = vpop.permute.xlu0 %2115 }
0x171d   :  { %v2118_v49 = vmul.f32 %v5787_v61, %v2116_v62  ;;  %v2019_v62 = vlaneseq }
0x171f   :  { %2120 = vrot.lane.b32.xlu0 %v2118_v49, %s6027_s25  ;;  %v7115_v49 = vand.u32 127, %v2019_v62 }
0x178d   :  { %v1977_v47 = vpop.permute.xlu1 %1976 }
0x178e   :  { %v6956_v55 = vadd.f32 %v1977_v47, %v1969_v63 }
0x1790   :  { %5788 = vtanh.f32 %v6956_v55  ;;  %v1994_v23 = vsel %vm1990_vm7, %v6956_v55, %v6953_v58 }
0x1791   :  { %v2121_v4 = vpop.permute.xlu0 %2120 }
0x1792   :  { %v6963_v7 = vadd.f32 %v2121_v4, %v2113_v2 }
0x1794   :  { %5790 = vtanh.f32 %v6963_v7 }
0x179d   :  { %v5789_v43 = vpop.eup %5788 }
0x179e   :  { %1982 = vrot.lane.b32.xlu1 %v5789_v43, %s6027_s25 }
0x17a1   :  { %v5791_v36 = vpop.eup %5790 }
0x17a2   :  { %2126 = vrot.lane.b32.xlu0 %v5791_v36, %s6027_s25 }
0x1810   :  { %v1983_v10 = vpop.permute.xlu1 %1982 }
0x1811   :  { %v1985_v42 = vmul.f32 %v5785_v45, %v1983_v10  ;;  %v7123_v10 = vld [vmem:[%s7760_s3 + $0x8] sm:$0xff] }
0x1813   :  { %v1993_v56 = vsel %vm1990_vm7, %v1985_v42, %v6920_v15  ;;  %v7055_v15 = vld [vmem:[%s7769_s12] ss:$0 sm:$0xff] }
0x1814   :  { %v2127_v1 = vpop.permute.xlu0 %2126  ;;  %2135 = vrot.lane.b32.xlu0 %v1993_v56, %s6029_s23  ;;  %v7130_v42 = vld [vmem:[%s7760_s3] sm:$0xff] }
0x1815   :  { %v7028_v3 = vmul.f32 %v5787_v61, %v2127_v1 }
0x1817   :  { %2131 = vrot.lane.b32.xlu1 %v7028_v3, %s6028_s5 }
0x1886   :  { %v2136_v11 = vpop.permute.xlu0 %2135 }
0x1889   :  { %v2132_v12 = vpop.permute.xlu1 %2131 }
0x188a   :  { %v2138_v14 = vsel %vm252_vm4, %v2132_v12, %v2136_v11 }
0x188b   :  { %5313 = vmatmul.mubr.msk.f32.vlgmr.msra.gmra.mxu0 %vm362_vm5, %v2138_v14 }
0x188c   :  { %5349 = vmatpush3.msra.mxu0 %v6969_v51  ;;  %5364 = vmatprep.mubr.msk.f32.mxu0 %vm6025_vm0, %v6024_v0 }
0x188d   :  { %5350 = vmatprep.subr.mxu0 %v6024_v0 }
0x188e   :  { %5351 = vmatpush3.msra.mxu0 %v6974_v8 }
0x188f   :  { %5352 = vmatprep.subr.mxu0 %v6024_v0 }
0x1890   :  { %5353 = vmatpush3.msra.mxu0 %v6981_v29 }
0x1891   :  { %5354 = vmatprep.subr.mxu0 %v6024_v0 }
0x1892   :  { %5355 = vmatpush3.msra.mxu0 %v6988_v32 }
0x1893   :  { %5356 = vmatprep.subr.mxu0 %v6024_v0 }
0x1894   :  { %5357 = vmatpush3.msra.mxu0 %v6995_v34 }
0x1895   :  { %5358 = vmatprep.subr.mxu0 %v6024_v0 }
0x1896   :  { %5359 = vmatpush3.msra.mxu0 %v7003_v57 }
0x1897   :  { %5360 = vmatprep.subr.mxu0 %v6024_v0 }
0x1898   :  { %5361 = vmatpush3.msra.mxu0 %v7013_v38 }
0x1899   :  { %5362 = vmatprep.subr.mxu0 %v6024_v0 }
0x189a   :  { %5363 = vmatpush3.msra.mxu0 %v7020_v41 }
0x189b   :  { %5378 = vmatprep.subr.mxu0 %v6024_v0 }
0x194b   :  { %v2214_v52 = vpop.f32.mrf.mxu0 }
0x194c   :  { %v2215_v17 = vadd.f32 %v7055_v15, %v2214_v52 }
0x194d   :  { %v5314_v18 = vpop.f32.mrf.mxu0 }
0x194e   :  { %5792 = vtanh.f32 %v2215_v17  ;;  %v4693_v44 = vmul.f32 -1.442695, %v2215_v17 }
0x1950   :  { %5794 = vpow2.f32 %v4693_v44 }
0x195b   :  { %v5793_v19 = vpop.eup %5792 }
0x195c   :  { %2227 = vrot.lane.b32.xlu1 %v5793_v19, %s6027_s25 }
0x195d   :  { %v5795_v16 = vpop.eup %5794 }
0x195e   :  { %v2221_v35 = vadd.f32 1.0, %v5795_v16 }
0x1960   :  { %5796 = vrcp.f32 %v2221_v35 }
0x196d   :  { %v5797_v54 = vpop.eup %5796 }
0x196e   :  { %v2225_v30 = vmul.f32 %v5797_v54, %v1994_v23 }
0x19ce   :  { %v2228_v20 = vpop.permute.xlu1 %2227 }
0x19cf   :  { %v2230_v21 = vmul.f32 %v5797_v54, %v2228_v20 }
0x19d1   :  { %2232 = vrot.lane.b32.xlu0 %v2230_v21, %s6027_s25 }
0x1a43   :  { %v2233_v28 = vpop.permute.xlu0 %2232 }
0x1a44   :  { %v7064_v39 = vadd.f32 %v2233_v28, %v2225_v30 }
0x1a46   :  { %5798 = vtanh.f32 %v7064_v39 }
0x1a53   :  { %v5799_v25 = vpop.eup %5798 }
0x1a54   :  { %2238 = vrot.lane.b32.xlu1 %v5799_v25, %s6027_s25 }
0x1ac6   :  { %v2239_v59 = vpop.permute.xlu1 %2238 }
0x1ac7   :  { %v7096_v37 = vmul.f32 %v5797_v54, %v2239_v59 }
0x1ac9   :  { %2249 = vrot.lane.b32.xlu0 %v7096_v37, %s6028_s5 }
0x1b3b   :  { %v2250_v46 = vpop.permute.xlu0 %2249 }
0x1b3c   :  { %5324 = vmatmul.mubr.msk.f32.vlgmr.msra.gmra.mxu1 %vm252_vm4, %v2250_v46 }
0x1b3d   :  { %5330 = vmatprep.mubr.msk.f32.mxu1 %vm6025_vm0, %v6024_v0  ;;  %5327 = vmatpush3.msra.mxu1 %v7123_v10 }
0x1b3e   :  { %5328 = vmatprep.subr.mxu1 %v6024_v0 }
0x1b3f   :  { %5329 = vmatpush3.msra.mxu1 %v7130_v42 }
0x1b40   :  { %5333 = vmatprep.subr.mxu1 %v6024_v0 }
0x1bfc   :  { %v2319_v45 = vpop.f32.mrf.mxu1 }
0x1bfd   :  { %v7109_v27 = vadd.f32 %v7106_v31, %v2319_v45 }
0x1bfe   :  { %v5325_v33 = vpop.f32.mrf.mxu1 }
0x1bff   :  { %v2323_v61 = vsel %vm120_vm1, %v7109_v27, -inf }
0x1c00   :  { %2324 = vmax.xlane.f32.xlu1 %v2323_v61 }
0x1c11   :  { %2419 = vrot.lane.b32.xlu1 %v7028_v3, %s6030_s6 }
0x1c89   :  { %v2325_v58 = vpop.xlane.xlu1 %2324 }
0x1c8a   :  { %vm2326_vm9 = vcmp.eq.f32.partialorder %v7109_v27, %v2325_v58 }
0x1c8b   :  { %v2327_v63 = vsel %vm2326_vm9, %v7115_v49, 16 }
0x1c8c   :  { %v2328_v47 = vsel %vm120_vm1, %v2327_v63, 2147483647 }
0x1c8d   :  { %v2330_v55 = vshra.s32 %v2328_v47, 16  ;;  %v2329_v2 = vand.u32 65535, %v2328_v47  ;;  %v2420_v52 = vpop.permute.xlu1 %2419 }
0x1c8f   :  { %v2332_v60 = vcvt.s32.f32 %v2330_v55  ;;  %v2331_v43 = vcvt.s32.f32 %v2329_v2 }
0x1c91   :  { %2333 = vmin.xlane.f32.xlu0 %v2332_v60 }
0x1d1a   :  { %v2334_v4 = vpop.xlane.xlu0 %2333 }
0x1d1b   :  { %vm2335_vm10 = vcmp.eq.f32.partialorder %v2332_v60, %v2334_v4  ;;  %v2340_v56 = vcvt.f32.s32 %v2334_v4 }
0x1d1c   :  { %v2336_v36 = vsel %vm2335_vm10, %v2331_v43, inf }
0x1d1d   :  { %2337 = vmin.xlane.f32.xlu0 %v2336_v36  ;;  %v2341_v3 = vshll.u32 %v2340_v56, 16 }
0x1da6   :  { %v2338_v1 = vpop.xlane.xlu0 %2337 }
0x1da7   :  { %v2339_v11 = vcvt.f32.s32 %v2338_v1 }
0x1da9   :  { %v2342_v12 = vadd.s32 %v2341_v3, %v2339_v11 }
0x1dab   :  { %vm2343_vm11 = vcmp.eq.s32.totalorder %v7115_v49, %v2342_v12 }
0x1dac   :  { %v4696_v14 = vsel %vm2343_vm11, 1.0, %v6024_v0 }
0x1dad   :  { %5331 = vmatmul.mubr.msk.f32.vlgmr.msra.gmra.mxu1 %vm120_vm1, %v4696_v14 }
0x1dae   :  { %5334 = vmatpush3.msra.mxu1 %v6874_v22  ;;  %5345 = vmatprep.mubr.msk.f32.mxu1 %vm6025_vm0, %v6024_v0 }
0x1daf   :  { %5335 = vmatprep.subr.mxu1 %v6024_v0 }
0x1db0   :  { %5336 = vmatpush3.msra.mxu1 %v6879_v40 }
0x1db1   :  { %5337 = vmatprep.subr.mxu1 %v6024_v0 }
0x1db2   :  { %5338 = vmatpush3.msra.mxu1 %v6890_v13 }
0x1db3   :  { %5339 = vmatprep.subr.mxu1 %v6024_v0 }
0x1db4   :  { %5340 = vmatpush3.msra.mxu1 %v6897_v53 }
0x1db5   :  { %5341 = vmatprep.subr.mxu1 %v6024_v0 }
0x1db6   :  { %5342 = vmatpush3.msra.mxu1 %v6903_v5 }
0x1db7   :  { %5343 = vmatprep.subr.mxu1 %v6024_v0 }
0x1db8   :  { %5344 = vmatpush3.msra.mxu1 %v6911_v6 }
0x1db9   :  { %5367 = vmatprep.subr.mxu1 %v6024_v0 }
0x1e6d   :  { %v2415_v17 = vpop.f32.mrf.mxu1 }
0x1e6e   :  { %v2422_v18 = vsel %vm120_vm1, %v2415_v17, %v2420_v52 }
0x1e6f   :  { %v5332_v19 = vpop.f32.mrf.mxu1  ;;  %5346 = vmatmul.mubr.msk.f32.vlgmr.msra.gmra.mxu1 %vm2032_vm8, %v2422_v18 }
0x1e70   :  { %5368 = vmatpush3.msra.mxu1 %v7070_v26  ;;  %5375 = vmatprep.mubr.msk.f32.mxu1 %vm6025_vm0, %v6024_v0 }
0x1e71   :  { %5369 = vmatprep.subr.mxu1 %v6024_v0 }
0x1e72   :  { %5370 = vmatpush3.msra.mxu1 %v7075_v50 }
0x1e73   :  { %5371 = vmatprep.subr.mxu1 %v6024_v0 }
0x1e74   :  { %5372 = vmatpush3.msra.mxu1 %v7082_v9 }
0x1e75   :  { %5373 = vmatprep.subr.mxu1 %v6024_v0 }
0x1e76   :  { %5374 = vmatpush3.msra.mxu1 %v7089_v48 }
0x1e77   :  { %5385 = vmatprep.subr.mxu1 %v6024_v0 }
0x1f2f   :  { %v2492_v44 = vpop.f32.mrf.mxu1 }
0x1f30   :  { %v2493_v16 = vadd.f32 %v6942_v24, %v2492_v44 }
0x1f31   :  { %v5347_v35 = vpop.f32.mrf.mxu1 }
0x1f32   :  { %5800 = vtanh.f32 %v2493_v16  ;;  %v4699_v20 = vmul.f32 -1.442695, %v2493_v16 }
0x1f34   :  { %5802 = vpow2.f32 %v4699_v20 }
0x1f3f   :  { %v5801_v54 = vpop.eup %5800 }
0x1f40   :  { %2505 = vrot.lane.b32.xlu0 %v5801_v54, %s6027_s25 }
0x1f41   :  { %v5803_v21 = vpop.eup %5802 }
0x1f42   :  { %v2499_v23 = vadd.f32 1.0, %v5803_v21 }
0x1f44   :  { %5804 = vrcp.f32 %v2499_v23 }
0x1f51   :  { %v5805_v30 = vpop.eup %5804 }
0x1f52   :  { %v2503_v59 = vmul.f32 %v5805_v30, %v6963_v7 }
0x1fb2   :  { %v2506_v28 = vpop.permute.xlu0 %2505 }
0x1fb3   :  { %v2508_v25 = vmul.f32 %v5805_v30, %v2506_v28 }
0x1fb5   :  { %2510 = vrot.lane.b32.xlu1 %v2508_v25, %s6027_s25 }
0x2027   :  { %v2511_v46 = vpop.permute.xlu1 %2510 }
0x2028   :  { %v7167_v45 = vadd.f32 %v2511_v46, %v2503_v59 }
0x202a   :  { %5806 = vtanh.f32 %v7167_v45 }
0x2037   :  { %v5807_v33 = vpop.eup %5806 }
0x2038   :  { %2516 = vrot.lane.b32.xlu1 %v5807_v33, %s6027_s25 }
0x203c   :  { %2524 = vrot.lane.b32.xlu1 %v7096_v37, %s6029_s23 }
0x20aa   :  { %v2517_v61 = vpop.permute.xlu1 %2516 }
0x20ab   :  { %v7173_v62 = vmul.f32 %v5805_v30, %v2517_v61 }
0x20ad   :  { %2521 = vrot.lane.b32.xlu0 %v7173_v62, %s6028_s5 }
0x20ae   :  { %v2525_v58 = vpop.permute.xlu1 %2524 }
0x211f   :  { %v2522_v63 = vpop.permute.xlu0 %2521 }
0x2120   :  { %v2527_v7 = vsel %vm252_vm4, %v2522_v63, %v2525_v58 }
0x2121   :  { %5365 = vmatmul.mubr.msk.f32.vlgmr.msra.gmra.mxu0 %vm362_vm5, %v2527_v7 }
0x2122   :  { %5379 = vmatpush3.msra.mxu0 %v7123_v10  ;;  %5382 = vmatprep.mubr.msk.f32.mxu0 %vm6025_vm0, %v6024_v0 }
0x2123   :  { %5380 = vmatprep.subr.mxu0 %v6024_v0 }
0x2124   :  { %5381 = vmatpush3.msra.mxu0 %v7130_v42 }
0x2125   :  { %5400 = vmatprep.subr.mxu0 %v6024_v0 }
0x21e1   :  { %v2597_v37 = vpop.f32.mrf.mxu0 }
0x21e2   :  { %v2598_v47 = vadd.f32 %v7055_v15, %v2597_v37 }
0x21e3   :  { %v5366_v55 = vpop.f32.mrf.mxu0 }
0x21e4   :  { %5808 = vtanh.f32 %v2598_v47  ;;  %v4701_v2 = vmul.f32 -1.442695, %v2598_v47 }
0x21e6   :  { %5810 = vpow2.f32 %v4701_v2 }
0x21f1   :  { %v5809_v60 = vpop.eup %5808 }
0x21f2   :  { %2610 = vrot.lane.b32.xlu0 %v5809_v60, %s6027_s25 }
0x21f3   :  { %v5811_v4 = vpop.eup %5810 }
0x21f4   :  { %v2604_v43 = vadd.f32 1.0, %v5811_v4 }
0x21f6   :  { %5812 = vrcp.f32 %v2604_v43 }
0x2203   :  { %v5813_v36 = vpop.eup %5812 }
0x2204   :  { %v2608_v3 = vmul.f32 %v5813_v36, %v7064_v39 }
0x2264   :  { %v2611_v56 = vpop.permute.xlu0 %2610 }
0x2265   :  { %v2613_v1 = vmul.f32 %v5813_v36, %v2611_v56 }
0x2267   :  { %2615 = vrot.lane.b32.xlu1 %v2613_v1, %s6027_s25 }
0x22d9   :  { %v2616_v11 = vpop.permute.xlu1 %2615 }
0x22da   :  { %v7189_v12 = vadd.f32 %v2616_v11, %v2608_v3 }
0x22dc   :  { %5814 = vtanh.f32 %v7189_v12 }
0x22e9   :  { %v5815_v14 = vpop.eup %5814 }
0x22ea   :  { %2621 = vrot.lane.b32.xlu0 %v5815_v14, %s6027_s25 }
0x235c   :  { %v2622_v52 = vpop.permute.xlu0 %2621 }
0x235d   :  { %v7193_v17 = vmul.f32 %v5813_v36, %v2622_v52 }
0x235f   :  { %2626 = vrot.lane.b32.xlu1 %v7193_v17, %s6028_s5 }
0x23d1   :  { %v2627_v18 = vpop.permute.xlu1 %2626 }
0x23d2   :  { %5376 = vmatmul.mubr.msk.f32.vlgmr.msra.gmra.mxu1 %vm252_vm4, %v2627_v18 }
0x23d3   :  { %5386 = vmatpush3.msra.mxu1 %v6874_v22  ;;  %5397 = vmatprep.mubr.msk.f32.mxu1 %vm6025_vm0, %v6024_v0 }
0x23d4   :  { %5387 = vmatprep.subr.mxu1 %v6024_v0 }
0x23d5   :  { %5388 = vmatpush3.msra.mxu1 %v6879_v40 }
0x23d6   :  { %5389 = vmatprep.subr.mxu1 %v6024_v0 }
0x23d7   :  { %5390 = vmatpush3.msra.mxu1 %v6890_v13 }
0x23d8   :  { %5391 = vmatprep.subr.mxu1 %v6024_v0 }
0x23d9   :  { %5392 = vmatpush3.msra.mxu1 %v6897_v53 }
0x23da   :  { %5393 = vmatprep.subr.mxu1 %v6024_v0 }
0x23db   :  { %5394 = vmatpush3.msra.mxu1 %v6903_v5 }
0x23dc   :  { %5395 = vmatprep.subr.mxu1 %v6024_v0 }
0x23dd   :  { %5396 = vmatpush3.msra.mxu1 %v6911_v6 }
0x23de   :  { %5419 = vmatprep.subr.mxu1 %v6024_v0 }
0x2492   :  { %v2696_v39 = vpop.f32.mrf.mxu1 }
0x2493   :  { %v7213_v19 = vadd.f32 %v7106_v31, %v2696_v39 }
0x2494   :  { %v5377_v44 = vpop.f32.mrf.mxu1 }
0x2495   :  { %v2700_v16 = vsel %vm120_vm1, %v7213_v19, -inf }
0x2496   :  { %2701 = vmax.xlane.f32.xlu0 %v2700_v16 }
0x251f   :  { %v2702_v35 = vpop.xlane.xlu0 %2701 }
0x2520   :  { %vm2703_vm12 = vcmp.eq.f32.partialorder %v7213_v19, %v2702_v35 }
0x2521   :  { %v2704_v54 = vsel %vm2703_vm12, %v7115_v49, 16 }
0x2522   :  { %v2705_v20 = vsel %vm120_vm1, %v2704_v54, 2147483647 }
0x2523   :  { %v2707_v21 = vshra.s32 %v2705_v20, 16  ;;  %v2706_v30 = vand.u32 65535, %v2705_v20 }
0x2525   :  { %v2709_v23 = vcvt.s32.f32 %v2707_v21  ;;  %v2708_v25 = vcvt.s32.f32 %v2706_v30 }
0x2527   :  { %2710 = vmin.xlane.f32.xlu1 %v2709_v23 }
0x25b0   :  { %v2711_v28 = vpop.xlane.xlu1 %2710 }
0x25b1   :  { %vm2712_vm13 = vcmp.eq.f32.partialorder %v2709_v23, %v2711_v28  ;;  %v2717_v46 = vcvt.f32.s32 %v2711_v28 }
0x25b2   :  { %v2713_v59 = vsel %vm2712_vm13, %v2708_v25, inf }
0x25b3   :  { %2714 = vmin.xlane.f32.xlu0 %v2713_v59  ;;  %v2718_v61 = vshll.u32 %v2717_v46, 16 }
0x25c9   :  { %2796 = vrot.lane.b32.xlu0 %v7173_v62, %s6030_s6 }
0x263c   :  { %v2715_v33 = vpop.xlane.xlu0 %2714 }
0x263d   :  { %v2716_v58 = vcvt.f32.s32 %v2715_v33 }
0x263f   :  { %v2719_v63 = vadd.s32 %v2718_v61, %v2716_v58 }
0x2640   :  { %v2797_v62 = vpop.permute.xlu0 %2796 }
0x2641   :  { %vm2720_vm14 = vcmp.eq.s32.totalorder %v7115_v49, %v2719_v63 }
0x2642   :  { %v4703_v7 = vsel %vm2720_vm14, 1.0, %v6024_v0 }
0x2643   :  { %5383 = vmatmul.mubr.msk.f32.vlgmr.msra.gmra.mxu0 %vm120_vm1, %v4703_v7 }
0x2644   :  { %5401 = vmatpush3.msra.mxu0 %v6969_v51  ;;  %5416 = vmatprep.mubr.msk.f32.mxu0 %vm6025_vm0, %v6024_v0 }
0x2645   :  { %5402 = vmatprep.subr.mxu0 %v6024_v0 }
0x2646   :  { %5403 = vmatpush3.msra.mxu0 %v6974_v8 }
0x2647   :  { %5404 = vmatprep.subr.mxu0 %v6024_v0 }
0x2648   :  { %5405 = vmatpush3.msra.mxu0 %v6981_v29 }
0x2649   :  { %5406 = vmatprep.subr.mxu0 %v6024_v0 }
0x264a   :  { %5407 = vmatpush3.msra.mxu0 %v6988_v32 }
0x264b   :  { %5408 = vmatprep.subr.mxu0 %v6024_v0 }
0x264c   :  { %5409 = vmatpush3.msra.mxu0 %v6995_v34 }
0x264d   :  { %5410 = vmatprep.subr.mxu0 %v6024_v0 }
0x264e   :  { %5411 = vmatpush3.msra.mxu0 %v7003_v57 }
0x264f   :  { %5412 = vmatprep.subr.mxu0 %v6024_v0 }
0x2650   :  { %5413 = vmatpush3.msra.mxu0 %v7013_v38 }
0x2651   :  { %5414 = vmatprep.subr.mxu0 %v6024_v0 }
0x2652   :  { %5415 = vmatpush3.msra.mxu0 %v7020_v41 }
0x2653   :  { %5430 = vmatprep.subr.mxu0 %v6024_v0 }
0x2703   :  { %v2792_v37 = vpop.f32.mrf.mxu0 }
0x2704   :  { %v2799_v47 = vsel %vm120_vm1, %v2792_v37, %v2797_v62 }
0x2705   :  { %v5384_v55 = vpop.f32.mrf.mxu0  ;;  %5398 = vmatmul.mubr.msk.f32.vlgmr.msra.gmra.mxu1 %vm2032_vm8, %v2799_v47 }
0x2706   :  { %5420 = vmatpush3.msra.mxu1 %v7070_v26  ;;  %5427 = vmatprep.mubr.msk.f32.mxu1 %vm6025_vm0, %v6024_v0 }
0x2707   :  { %5421 = vmatprep.subr.mxu1 %v6024_v0 }
0x2708   :  { %5422 = vmatpush3.msra.mxu1 %v7075_v50 }
0x2709   :  { %5423 = vmatprep.subr.mxu1 %v6024_v0 }
0x270a   :  { %5424 = vmatpush3.msra.mxu1 %v7082_v9 }
0x270b   :  { %5425 = vmatprep.subr.mxu1 %v6024_v0 }
0x270c   :  { %5426 = vmatpush3.msra.mxu1 %v7089_v48 }
0x270d   :  { %5437 = vmatprep.subr.mxu1 %v6024_v0 }
0x27c5   :  { %v2869_v60 = vpop.f32.mrf.mxu1 }
0x27c6   :  { %v2870_v2 = vadd.f32 %v6942_v24, %v2869_v60 }
0x27c7   :  { %v5399_v4 = vpop.f32.mrf.mxu1 }
0x27c8   :  { %5816 = vtanh.f32 %v2870_v2  ;;  %v4706_v36 = vmul.f32 -1.442695, %v2870_v2 }
0x27ca   :  { %5818 = vpow2.f32 %v4706_v36 }
0x27d5   :  { %v5817_v43 = vpop.eup %5816 }
0x27d6   :  { %2882 = vrot.lane.b32.xlu1 %v5817_v43, %s6027_s25 }
0x27d7   :  { %v5819_v56 = vpop.eup %5818 }
0x27d8   :  { %v2876_v1 = vadd.f32 1.0, %v5819_v56 }
0x27da   :  { %5820 = vrcp.f32 %v2876_v1 }
0x27e7   :  { %v5821_v3 = vpop.eup %5820 }
0x27e8   :  { %v2880_v52 = vmul.f32 %v5821_v3, %v7167_v45 }
0x2848   :  { %v2883_v11 = vpop.permute.xlu1 %2882 }
0x2849   :  { %v2885_v14 = vmul.f32 %v5821_v3, %v2883_v11 }
0x284b   :  { %2887 = vrot.lane.b32.xlu1 %v2885_v14, %s6027_s25 }
0x28bd   :  { %v2888_v18 = vpop.permute.xlu1 %2887 }
0x28be   :  { %v7259_v39 = vadd.f32 %v2888_v18, %v2880_v52 }
0x28c0   :  { %5822 = vtanh.f32 %v7259_v39 }
0x28cd   :  { %v5823_v44 = vpop.eup %5822 }
0x28ce   :  { %2893 = vrot.lane.b32.xlu0 %v5823_v44, %s6027_s25 }
0x28d2   :  { %2901 = vrot.lane.b32.xlu0 %v7193_v17, %s6029_s23 }
0x2940   :  { %v2894_v16 = vpop.permute.xlu0 %2893 }
0x2941   :  { %v2896_v35 = vmul.f32 %v5821_v3, %v2894_v16 }
0x2943   :  { %2898 = vrot.lane.b32.xlu1 %v2896_v35, %s6028_s5 }
0x2944   :  { %v2902_v54 = vpop.permute.xlu0 %2901 }
0x29b5   :  { %v2899_v20 = vpop.permute.xlu1 %2898 }
0x29b6   :  { %v2904_v21 = vsel %vm252_vm4, %v2899_v20, %v2902_v54 }
0x29b7   :  { %5417 = vmatmul.mubr.msk.f32.vlgmr.msra.gmra.mxu0 %vm362_vm5, %v2904_v21 }
0x29b8   :  { %5431 = vmatpush3.msra.mxu0 %v7123_v10  ;;  %5434 = vmatprep.mubr.msk.f32.mxu0 %vm6025_vm0, %v6024_v0 }
0x29b9   :  { %5432 = vmatprep.subr.mxu0 %v6024_v0 }
0x29ba   :  { %5433 = vmatpush3.msra.mxu0 %v7130_v42 }
0x29bb   :  { %5452 = vmatprep.subr.mxu0 %v6024_v0 }
0x2a77   :  { %v2974_v45 = vpop.f32.mrf.mxu0 }
0x2a78   :  { %v2975_v17 = vadd.f32 %v7055_v15, %v2974_v45 }
0x2a79   :  { %v5418_v23 = vpop.f32.mrf.mxu0 }
0x2a7a   :  { %5824 = vtanh.f32 %v2975_v17  ;;  %v4708_v28 = vmul.f32 -1.442695, %v2975_v17 }
0x2a7c   :  { %5826 = vpow2.f32 %v4708_v28 }
0x2a87   :  { %v5825_v30 = vpop.eup %5824 }
0x2a88   :  { %2987 = vrot.lane.b32.xlu1 %v5825_v30, %s6027_s25 }
0x2a89   :  { %v5827_v25 = vpop.eup %5826 }
0x2a8a   :  { %v2981_v59 = vadd.f32 1.0, %v5827_v25 }
0x2a8c   :  { %5828 = vrcp.f32 %v2981_v59 }
0x2a99   :  { %v5829_v46 = vpop.eup %5828 }
0x2a9a   :  { %v2985_v58 = vmul.f32 %v5829_v46, %v7189_v12 }
0x2afa   :  { %v2988_v33 = vpop.permute.xlu1 %2987 }
0x2afb   :  { %v2990_v61 = vmul.f32 %v5829_v46, %v2988_v33 }
0x2afd   :  { %2992 = vrot.lane.b32.xlu0 %v2990_v61, %s6027_s25 }
0x2b6f   :  { %v2993_v63 = vpop.permute.xlu0 %2992 }
0x2b70   :  { %v7278_v7 = vadd.f32 %v2993_v63, %v2985_v58 }
0x2b72   :  { %5830 = vtanh.f32 %v7278_v7 }
0x2b7f   :  { %v5831_v62 = vpop.eup %5830 }
0x2b80   :  { %2998 = vrot.lane.b32.xlu1 %v5831_v62, %s6027_s25 }
0x2bf2   :  { %v2999_v37 = vpop.permute.xlu1 %2998 }
0x2bf3   :  { %v7282_v47 = vmul.f32 %v5829_v46, %v2999_v37 }
0x2bf5   :  { %3003 = vrot.lane.b32.xlu0 %v7282_v47, %s6028_s5 }
0x2c67   :  { %v3004_v55 = vpop.permute.xlu0 %3003 }
0x2c68   :  { %5428 = vmatmul.mubr.msk.f32.vlgmr.msra.gmra.mxu1 %vm252_vm4, %v3004_v55 }
0x2c69   :  { %5438 = vmatpush3.msra.mxu1 %v6874_v22  ;;  %5449 = vmatprep.mubr.msk.f32.mxu1 %vm6025_vm0, %v6024_v0 }
0x2c6a   :  { %5439 = vmatprep.subr.mxu1 %v6024_v0 }
0x2c6b   :  { %5440 = vmatpush3.msra.mxu1 %v6879_v40 }
0x2c6c   :  { %5441 = vmatprep.subr.mxu1 %v6024_v0 }
0x2c6d   :  { %5442 = vmatpush3.msra.mxu1 %v6890_v13 }
0x2c6e   :  { %5443 = vmatprep.subr.mxu1 %v6024_v0 }
0x2c6f   :  { %5444 = vmatpush3.msra.mxu1 %v6897_v53 }
0x2c70   :  { %5445 = vmatprep.subr.mxu1 %v6024_v0 }
0x2c71   :  { %5446 = vmatpush3.msra.mxu1 %v6903_v5 }
0x2c72   :  { %5447 = vmatprep.subr.mxu1 %v6024_v0 }
0x2c73   :  { %5448 = vmatpush3.msra.mxu1 %v6911_v6 }
0x2c74   :  { %5471 = vmatprep.subr.mxu1 %v6024_v0 }
0x2d28   :  { %v3073_v22 = vpop.f32.mrf.mxu1 }
0x2d29   :  { %v7302_v40 = vadd.f32 %v7106_v31, %v3073_v22 }
0x2d2a   :  { %v5429_v12 = vpop.f32.mrf.mxu1 }
0x2d2b   :  { %v3077_v13 = vsel %vm120_vm1, %v7302_v40, -inf }
0x2d2c   :  { %3078 = vmax.xlane.f32.xlu1 %v3077_v13 }
0x2d3d   :  { %3173 = vrot.lane.b32.xlu1 %v2896_v35, %s6030_s6 }
0x2db5   :  { %v3079_v53 = vpop.xlane.xlu1 %3078 }
0x2db6   :  { %vm3080_vm15 = vcmp.eq.f32.partialorder %v7302_v40, %v3079_v53 }
0x2db7   :  { %v3081_v5 = vsel %vm3080_vm15, %v7115_v49, 16 }
0x2db8   :  { %v3082_v6 = vsel %vm120_vm1, %v3081_v5, 2147483647 }
0x2db9   :  { %v3084_v60 = vshra.s32 %v3082_v6, 16  ;;  %v3083_v4 = vand.u32 65535, %v3082_v6 }
0x2dbb   :  { %v3086_v2 = vcvt.s32.f32 %v3084_v60  ;;  %v3085_v36 = vcvt.s32.f32 %v3083_v4  ;;  %v7397_v4 = vld [vmem:[%s7766_s9 + $0x18] sm:$0xff] }
0x2dbd   :  { %3087 = vmin.xlane.f32.xlu0 %v3086_v2 }
0x2e46   :  { %v3088_v43 = vpop.xlane.xlu0 %3087 }
0x2e47   :  { %vm3089_vm2 = vcmp.eq.f32.partialorder %v3086_v2, %v3088_v43  ;;  %v3094_v1 = vcvt.f32.s32 %v3088_v43  ;;  %v7390_v2 = vld [vmem:[%s7766_s9 + $0x20] sm:$0xff]  ;;  %v7404_v43 = vld [vmem:[%s7766_s9 + $0x10] sm:$0xff] }
0x2e48   :  { %v3090_v56 = vsel %vm3089_vm2, %v3085_v36, inf  ;;  %v7411_v36 = vld [vmem:[%s7766_s9 + $0x8] sm:$0xff]  ;;  %vm4619_vm2 = vcmask 785408  }
0x2e49   :  { %3091 = vmin.xlane.f32.xlu0 %v3090_v56  ;;  %v3095_v11 = vshll.u32 %v3094_v1, 16  ;;  %v7418_v56 = vld [vmem:[%s7766_s9] sm:$0xff] }
0x2ed2   :  { %v3092_v3 = vpop.xlane.xlu0 %3091 }
0x2ed3   :  { %v3093_v14 = vcvt.f32.s32 %v3092_v3 }
0x2ed5   :  { %v3096_v52 = vadd.s32 %v3095_v11, %v3093_v14 }
0x2ed7   :  { %vm3097_vm3 = vcmp.eq.s32.totalorder %v7115_v49, %v3096_v52 }
0x2ed8   :  { %v4710_v18 = vsel %vm3097_vm3, 1.0, %v6024_v0  ;;  %vm4621_vm3 = vcmask 916480  }
0x2ed9   :  { %5435 = vmatmul.mubr.msk.f32.vlgmr.msra.gmra.mxu0 %vm120_vm1, %v4710_v18 }
0x2eda   :  { %5453 = vmatpush3.msra.mxu0 %v6969_v51  ;;  %5468 = vmatprep.mubr.msk.f32.mxu0 %vm6025_vm0, %v6024_v0  ;;  %v3174_v51 = vpop.permute.xlu1 %3173 }
0x2edb   :  { %5454 = vmatprep.subr.mxu0 %v6024_v0 }
0x2edc   :  { %5455 = vmatpush3.msra.mxu0 %v6974_v8 }
0x2edd   :  { %5456 = vmatprep.subr.mxu0 %v6024_v0 }
0x2ede   :  { %5457 = vmatpush3.msra.mxu0 %v6981_v29 }
0x2edf   :  { %5458 = vmatprep.subr.mxu0 %v6024_v0 }
0x2ee0   :  { %5459 = vmatpush3.msra.mxu0 %v6988_v32 }
0x2ee1   :  { %5460 = vmatprep.subr.mxu0 %v6024_v0 }
0x2ee2   :  { %5461 = vmatpush3.msra.mxu0 %v6995_v34 }
0x2ee3   :  { %5462 = vmatprep.subr.mxu0 %v6024_v0 }
0x2ee4   :  { %5463 = vmatpush3.msra.mxu0 %v7003_v57 }
0x2ee5   :  { %5464 = vmatprep.subr.mxu0 %v6024_v0 }
0x2ee6   :  { %5465 = vmatpush3.msra.mxu0 %v7013_v38 }
0x2ee7   :  { %5466 = vmatprep.subr.mxu0 %v6024_v0 }
0x2ee8   :  { %5467 = vmatpush3.msra.mxu0 %v7020_v41 }
0x2ee9   :  { %5482 = vmatprep.subr.mxu0 %v6024_v0 }
0x2f99   :  { %v3169_v8 = vpop.f32.mrf.mxu0 }
0x2f9a   :  { %v3176_v29 = vsel %vm120_vm1, %v3169_v8, %v3174_v51 }
0x2f9b   :  { %v5436_v32 = vpop.f32.mrf.mxu0  ;;  %5450 = vmatmul.mubr.msk.f32.vlgmr.msra.gmra.mxu1 %vm2032_vm8, %v3176_v29 }
0x2f9c   :  { %5472 = vmatpush3.msra.mxu1 %v7070_v26  ;;  %5479 = vmatprep.mubr.msk.f32.mxu1 %vm6025_vm0, %v6024_v0 }
0x2f9d   :  { %5473 = vmatprep.subr.mxu1 %v6024_v0 }
0x2f9e   :  { %5474 = vmatpush3.msra.mxu1 %v7075_v50 }
0x2f9f   :  { %5475 = vmatprep.subr.mxu1 %v6024_v0 }
0x2fa0   :  { %5476 = vmatpush3.msra.mxu1 %v7082_v9 }
0x2fa1   :  { %5477 = vmatprep.subr.mxu1 %v6024_v0 }
0x2fa2   :  { %5478 = vmatpush3.msra.mxu1 %v7089_v48 }
0x2fa3   :  { %5489 = vmatprep.subr.mxu1 %v6024_v0 }
0x305b   :  { %v3246_v34 = vpop.f32.mrf.mxu1 }
0x305c   :  { %v3247_v57 = vadd.f32 %v6942_v24, %v3246_v34 }
0x305d   :  { %v5451_v38 = vpop.f32.mrf.mxu1 }
0x305e   :  { %5832 = vtanh.f32 %v3247_v57  ;;  %v4713_v44 = vmul.f32 -1.442695, %v3247_v57 }
0x3060   :  { %5834 = vpow2.f32 %v4713_v44 }
0x306b   :  { %v5833_v41 = vpop.eup %5832 }
0x306c   :  { %3259 = vrot.lane.b32.xlu0 %v5833_v41, %s6027_s25 }
0x306d   :  { %v5835_v16 = vpop.eup %5834 }
0x306e   :  { %v3253_v35 = vadd.f32 1.0, %v5835_v16 }
0x3070   :  { %5836 = vrcp.f32 %v3253_v35 }
0x307d   :  { %v5837_v54 = vpop.eup %5836 }
0x307e   :  { %v3257_v45 = vmul.f32 %v5837_v54, %v7259_v39 }
0x30de   :  { %v3260_v20 = vpop.permute.xlu0 %3259 }
0x30df   :  { %v3262_v21 = vmul.f32 %v5837_v54, %v3260_v20  ;;  %v7438_v20 = vld [vmem:[%s7768_s11 + $0x38] sm:$0xff] }
0x30e1   :  { %3264 = vrot.lane.b32.xlu1 %v3262_v21, %s6027_s25  ;;  %v7447_v21 = vld [vmem:[%s7768_s11 + $0x30] sm:$0xff] }
0x3153   :  { %v3265_v17 = vpop.permute.xlu1 %3264 }
0x3154   :  { %v7347_v23 = vadd.f32 %v3265_v17, %v3257_v45  ;;  %v7454_v45 = vld [vmem:[%s7768_s11 + $0x28] sm:$0xff]  ;;  %v7461_v17 = vld [vmem:[%s7768_s11 + $0x20] sm:$0xff] }
0x3156   :  { %5838 = vtanh.f32 %v7347_v23 }
0x3163   :  { %v5839_v24 = vpop.eup %5838 }
0x3164   :  { %3270 = vrot.lane.b32.xlu1 %v5839_v24, %s6027_s25  ;;  %v7468_v24 = vld [vmem:[%s7768_s11 + $0x18] sm:$0xff] }
0x3168   :  { %3278 = vrot.lane.b32.xlu1 %v7282_v47, %s6029_s23 }
0x31d6   :  { %v3271_v30 = vpop.permute.xlu1 %3270 }
0x31d7   :  { %v7353_v28 = vmul.f32 %v5837_v54, %v3271_v30  ;;  %v7475_v30 = vld [vmem:[%s7768_s11 + $0x10] sm:$0xff] }
0x31d9   :  { %3275 = vrot.lane.b32.xlu0 %v7353_v28, %s6028_s5 }
0x31da   :  { %v3279_v25 = vpop.permute.xlu1 %3278 }
0x324b   :  { %v3276_v59 = vpop.permute.xlu0 %3275 }
0x324c   :  { %v3281_v39 = vsel %vm252_vm4, %v3276_v59, %v3279_v25  ;;  %v7489_v25 = vld [vmem:[%s7768_s11] sm:$0xff] }
0x324d   :  { %5469 = vmatmul.mubr.msk.f32.vlgmr.msra.gmra.mxu0 %vm362_vm5, %v3281_v39 }
0x324e   :  { %5483 = vmatpush3.msra.mxu0 %v7123_v10  ;;  %5486 = vmatprep.mubr.msk.f32.mxu0 %vm6025_vm0, %v6024_v0 }
0x324f   :  { %5484 = vmatprep.subr.mxu0 %v6024_v0 }
0x3250   :  { %5485 = vmatpush3.msra.mxu0 %v7130_v42 }
0x3251   :  { %5504 = vmatprep.subr.mxu0 %v6024_v0 }
0x330d   :  { %v3351_v46 = vpop.f32.mrf.mxu0 }
0x330e   :  { %v3352_v33 = vadd.f32 %v7055_v15, %v3351_v46 }
0x330f   :  { %v5470_v61 = vpop.f32.mrf.mxu0 }
0x3310   :  { %5840 = vtanh.f32 %v3352_v33  ;;  %v4715_v63 = vmul.f32 -1.442695, %v3352_v33 }
0x3312   :  { %5842 = vpow2.f32 %v4715_v63 }
0x331d   :  { %v5841_v58 = vpop.eup %5840 }
0x331e   :  { %3364 = vrot.lane.b32.xlu0 %v5841_v58, %s6027_s25 }
0x331f   :  { %v5843_v62 = vpop.eup %5842 }
0x3320   :  { %v3358_v37 = vadd.f32 1.0, %v5843_v62 }
0x3322   :  { %5844 = vrcp.f32 %v3358_v37 }
0x332f   :  { %v5845_v47 = vpop.eup %5844 }
0x3330   :  { %v3362_v12 = vmul.f32 %v5845_v47, %v7278_v7  ;;  %v7381_v7 = vld [vmem:[%s7766_s9 + $0x28] sm:$0xff] }
0x3390   :  { %v3365_v55 = vpop.permute.xlu0 %3364 }
0x3391   :  { %v3367_v22 = vmul.f32 %v5845_v47, %v3365_v55 }
0x3393   :  { %3369 = vrot.lane.b32.xlu1 %v3367_v22, %s6027_s25 }
0x3405   :  { %v3370_v13 = vpop.permute.xlu1 %3369 }
0x3406   :  { %v7369_v53 = vadd.f32 %v3370_v13, %v3362_v12 }
0x3408   :  { %5846 = vtanh.f32 %v7369_v53 }
0x3415   :  { %v5847_v15 = vpop.eup %5846 }
0x3416   :  { %3375 = vrot.lane.b32.xlu0 %v5847_v15, %s6027_s25 }
0x3488   :  { %v3376_v5 = vpop.permute.xlu0 %3375 }
0x3489   :  { %v7373_v6 = vmul.f32 %v5845_v47, %v3376_v5 }
0x348b   :  { %3380 = vrot.lane.b32.xlu1 %v7373_v6, %s6028_s5 }
0x34fd   :  { %v3381_v60 = vpop.permute.xlu1 %3380 }
0x34fe   :  { %5480 = vmatmul.mubr.msk.f32.vlgmr.msra.gmra.mxu1 %vm252_vm4, %v3381_v60 }
0x34ff   :  { %5490 = vmatpush3.msra.mxu1 %v7381_v7  ;;  %5501 = vmatprep.mubr.msk.f32.mxu1 %vm6025_vm0, %v6024_v0 }
0x3500   :  { %5491 = vmatprep.subr.mxu1 %v6024_v0 }
0x3501   :  { %5492 = vmatpush3.msra.mxu1 %v7390_v2 }
0x3502   :  { %5493 = vmatprep.subr.mxu1 %v6024_v0 }
0x3503   :  { %5494 = vmatpush3.msra.mxu1 %v7397_v4 }
0x3504   :  { %5495 = vmatprep.subr.mxu1 %v6024_v0 }
0x3505   :  { %5496 = vmatpush3.msra.mxu1 %v7404_v43 }
0x3506   :  { %5497 = vmatprep.subr.mxu1 %v6024_v0 }
0x3507   :  { %5498 = vmatpush3.msra.mxu1 %v7411_v36 }
0x3508   :  { %5499 = vmatprep.subr.mxu1 %v6024_v0 }
0x3509   :  { %5500 = vmatpush3.msra.mxu1 %v7418_v56 }
0x350a   :  { %5523 = vmatprep.subr.mxu1 %v6024_v0 }
0x35be   :  { %v3450_v1 = vpop.f32.mrf.mxu1 }
0x35bf   :  { %v7423_v3 = vadd.f32 %v7106_v31, %v3450_v1 }
0x35c0   :  { %v5481_v11 = vpop.f32.mrf.mxu1 }
0x35c1   :  { %v3454_v14 = vsel %vm120_vm1, %v7423_v3, -inf }
0x35c2   :  { %3455 = vmax.xlane.f32.xlu0 %v3454_v14 }
0x364b   :  { %v3456_v52 = vpop.xlane.xlu0 %3455 }
0x364c   :  { %vm3457_vm6 = vcmp.eq.f32.partialorder %v7423_v3, %v3456_v52 }
0x364d   :  { %v3458_v18 = vsel %vm3457_vm6, %v7115_v49, 16 }
0x364e   :  { %v3459_v51 = vsel %vm120_vm1, %v3458_v18, 2147483647 }
0x364f   :  { %v3461_v8 = vshra.s32 %v3459_v51, 16  ;;  %v3460_v32 = vand.u32 65535, %v3459_v51 }
0x3651   :  { %v3463_v29 = vcvt.s32.f32 %v3461_v8  ;;  %v3462_v57 = vcvt.s32.f32 %v3460_v32 }
0x3653   :  { %3464 = vmin.xlane.f32.xlu1 %v3463_v29 }
0x36dc   :  { %v3465_v34 = vpop.xlane.xlu1 %3464 }
0x36dd   :  { %vm3466_vm7 = vcmp.eq.f32.partialorder %v3463_v29, %v3465_v34  ;;  %v3471_v38 = vcvt.f32.s32 %v3465_v34 }
0x36de   :  { %v3467_v31 = vsel %vm3466_vm7, %v3462_v57, inf }
0x36df   :  { %3468 = vmin.xlane.f32.xlu0 %v3467_v31  ;;  %v3472_v44 = vshll.u32 %v3471_v38, 16 }
0x36f5   :  { %3550 = vrot.lane.b32.xlu0 %v7353_v28, %s6030_s6  ;;  %v7482_v28 = vld [vmem:[%s7768_s11 + $0x8] sm:$0xff] }
0x3768   :  { %v3469_v41 = vpop.xlane.xlu0 %3468 }
0x3769   :  { %v3470_v16 = vcvt.f32.s32 %v3469_v41 }
0x376b   :  { %v3473_v35 = vadd.s32 %v3472_v44, %v3470_v16 }
0x376c   :  { %v3551_v59 = vpop.permute.xlu0 %3550 }
0x376d   :  { %vm3474_vm9 = vcmp.eq.s32.totalorder %v7115_v49, %v3473_v35 }
0x376e   :  { %v4717_v54 = vsel %vm3474_vm9, 1.0, %v6024_v0 }
0x376f   :  { %5487 = vmatmul.mubr.msk.f32.vlgmr.msra.gmra.mxu0 %vm120_vm1, %v4717_v54  ;;  %v7564_v54 = vld [vmem:[%s7771_s14] ss:$0 sm:$0xff] }
0x3770   :  { %5505 = vmatpush3.msra.mxu0 %v7438_v20  ;;  %5520 = vmatprep.mubr.msk.f32.mxu0 %vm6025_vm0, %v6024_v0 }
0x3771   :  { %5506 = vmatprep.subr.mxu0 %v6024_v0 }
0x3772   :  { %5507 = vmatpush3.msra.mxu0 %v7447_v21 }
0x3773   :  { %5508 = vmatprep.subr.mxu0 %v6024_v0 }
0x3774   :  { %5509 = vmatpush3.msra.mxu0 %v7454_v45 }
0x3775   :  { %5510 = vmatprep.subr.mxu0 %v6024_v0 }
0x3776   :  { %5511 = vmatpush3.msra.mxu0 %v7461_v17 }
0x3777   :  { %5512 = vmatprep.subr.mxu0 %v6024_v0 }
0x3778   :  { %5513 = vmatpush3.msra.mxu0 %v7468_v24 }
0x3779   :  { %5514 = vmatprep.subr.mxu0 %v6024_v0 }
0x377a   :  { %5515 = vmatpush3.msra.mxu0 %v7475_v30 }
0x377b   :  { %5516 = vmatprep.subr.mxu0 %v6024_v0 }
0x377c   :  { %5517 = vmatpush3.msra.mxu0 %v7482_v28 }
0x377d   :  { %5518 = vmatprep.subr.mxu0 %v6024_v0 }
0x377e   :  { %5519 = vmatpush3.msra.mxu0 %v7489_v25 }
0x377f   :  { %5534 = vmatprep.subr.mxu0 %v6024_v0 }
0x382f   :  { %v3546_v39 = vpop.f32.mrf.mxu0 }
0x3830   :  { %v3553_v46 = vsel %vm120_vm1, %v3546_v39, %v3551_v59 }
0x3831   :  { %v5488_v33 = vpop.f32.mrf.mxu0  ;;  %5502 = vmatmul.mubr.msk.f32.vlgmr.msra.gmra.mxu1 %vm2032_vm8, %v3553_v46 }
0x3832   :  { %5524 = vmatpush3.msra.mxu1 %v7070_v26  ;;  %5531 = vmatprep.mubr.msk.f32.mxu1 %vm6025_vm0, %v6024_v0  ;;  %v7508_v26 = vld [vmem:[%s7767_s10] ss:$0 sm:$0xff] }
0x3833   :  { %5525 = vmatprep.subr.mxu1 %v6024_v0 }
0x3834   :  { %5526 = vmatpush3.msra.mxu1 %v7075_v50 }
0x3835   :  { %5527 = vmatprep.subr.mxu1 %v6024_v0 }
0x3836   :  { %5528 = vmatpush3.msra.mxu1 %v7082_v9 }
0x3837   :  { %5529 = vmatprep.subr.mxu1 %v6024_v0 }
0x3838   :  { %5530 = vmatpush3.msra.mxu1 %v7089_v48 }
0x3839   :  { %5541 = vmatprep.subr.mxu1 %v6024_v0 }
0x38f1   :  { %v3623_v61 = vpop.f32.mrf.mxu1 }
0x38f2   :  { %v3624_v58 = vadd.f32 %v7508_v26, %v3623_v61 }
0x38f3   :  { %v5503_v63 = vpop.f32.mrf.mxu1 }
0x38f4   :  { %5848 = vtanh.f32 %v3624_v58  ;;  %v4720_v9 = vmul.f32 -1.442695, %v3624_v58 }
0x38f6   :  { %5850 = vpow2.f32 %v4720_v9 }
0x3901   :  { %v5849_v50 = vpop.eup %5848 }
0x3902   :  { %3636 = vrot.lane.b32.xlu1 %v5849_v50, %s6027_s25 }
0x3903   :  { %v5851_v62 = vpop.eup %5850 }
0x3904   :  { %v3630_v37 = vadd.f32 1.0, %v5851_v62 }
0x3906   :  { %5852 = vrcp.f32 %v3630_v37 }
0x3913   :  { %v5853_v48 = vpop.eup %5852 }
0x3914   :  { %v3634_v22 = vmul.f32 %v5853_v48, %v7347_v23 }
0x3974   :  { %v3637_v47 = vpop.permute.xlu1 %3636 }
0x3975   :  { %v3639_v55 = vmul.f32 %v5853_v48, %v3637_v47 }
0x3977   :  { %3641 = vrot.lane.b32.xlu1 %v3639_v55, %s6027_s25 }
0x39e9   :  { %v3642_v12 = vpop.permute.xlu1 %3641 }
0x39ea   :  { %v7514_v13 = vadd.f32 %v3642_v12, %v3634_v22 }
0x39ec   :  { %5854 = vtanh.f32 %v7514_v13 }
0x39f9   :  { %v5855_v15 = vpop.eup %5854 }
0x39fa   :  { %3647 = vrot.lane.b32.xlu0 %v5855_v15, %s6027_s25 }
0x39fe   :  { %3655 = vrot.lane.b32.xlu0 %v7373_v6, %s6029_s23  ;;  %v7532_v6 = vld [vmem:[%s7769_s12] ss:$0 sm:$0xff] }
0x3a6c   :  { %v3648_v5 = vpop.permute.xlu0 %3647 }
0x3a6d   :  { %v3650_v60 = vmul.f32 %v5853_v48, %v3648_v5 }
0x3a6f   :  { %3652 = vrot.lane.b32.xlu1 %v3650_v60, %s6028_s5 }
0x3a70   :  { %v3656_v1 = vpop.permute.xlu0 %3655 }
0x3ae1   :  { %v3653_v11 = vpop.permute.xlu1 %3652 }
0x3ae2   :  { %v3658_v14 = vsel %vm252_vm4, %v3653_v11, %v3656_v1 }
0x3ae3   :  { %5521 = vmatmul.mubr.msk.f32.vlgmr.msra.gmra.mxu0 %vm362_vm5, %v3658_v14 }
0x3ae4   :  { %5535 = vmatpush3.msra.mxu0 %v7123_v10  ;;  %5538 = vmatprep.mubr.msk.f32.mxu0 %vm6025_vm0, %v6024_v0 }
0x3ae5   :  { %5536 = vmatprep.subr.mxu0 %v6024_v0 }
0x3ae6   :  { %5537 = vmatpush3.msra.mxu0 %v7130_v42 }
0x3ae7   :  { %5556 = vmatprep.subr.mxu0 %v6024_v0 }
0x3ba3   :  { %v3728_v23 = vpop.f32.mrf.mxu0 }
0x3ba4   :  { %v3729_v52 = vadd.f32 %v7532_v6, %v3728_v23  ;;  %v7601_v23 = vld [vmem:[%s7770_s13 + $0x18] sm:$0xff] }
0x3ba5   :  { %v5522_v18 = vpop.f32.mrf.mxu0 }
0x3ba6   :  { %5856 = vtanh.f32 %v3729_v52  ;;  %v4722_v51 = vmul.f32 -1.442695, %v3729_v52  ;;  %v7610_v52 = vld [vmem:[%s7770_s13 + $0x10] sm:$0xff]  ;;  %v7617_v18 = vld [vmem:[%s7770_s13 + $0x8] sm:$0xff] }
0x3ba8   :  { %5858 = vpow2.f32 %v4722_v51 }
0x3bb3   :  { %v5857_v10 = vpop.eup %5856 }
0x3bb4   :  { %3741 = vrot.lane.b32.xlu1 %v5857_v10, %s6027_s25  ;;  %v7624_v10 = vld [vmem:[%s7770_s13] sm:$0xff] }
0x3bb5   :  { %v5859_v8 = vpop.eup %5858 }
0x3bb6   :  { %v3735_v29 = vadd.f32 1.0, %v5859_v8 }
0x3bb8   :  { %5860 = vrcp.f32 %v3735_v29 }
0x3bc5   :  { %v5861_v42 = vpop.eup %5860 }
0x3bc6   :  { %v3739_v57 = vmul.f32 %v5861_v42, %v7369_v53 }
0x3c26   :  { %v3742_v32 = vpop.permute.xlu1 %3741 }
0x3c27   :  { %v3744_v34 = vmul.f32 %v5861_v42, %v3742_v32 }
0x3c29   :  { %3746 = vrot.lane.b32.xlu0 %v3744_v34, %s6027_s25 }
0x3c9b   :  { %v3747_v31 = vpop.permute.xlu0 %3746 }
0x3c9c   :  { %v7538_v38 = vadd.f32 %v3747_v31, %v3739_v57 }
0x3c9e   :  { %5862 = vtanh.f32 %v7538_v38 }
0x3cab   :  { %v5863_v41 = vpop.eup %5862 }
0x3cac   :  { %3752 = vrot.lane.b32.xlu1 %v5863_v41, %s6027_s25 }
0x3d1e   :  { %v3753_v44 = vpop.permute.xlu1 %3752 }
0x3d1f   :  { %v7542_v16 = vmul.f32 %v5861_v42, %v3753_v44 }
0x3d21   :  { %3757 = vrot.lane.b32.xlu0 %v7542_v16, %s6028_s5 }
0x3d93   :  { %v3758_v35 = vpop.permute.xlu0 %3757 }
0x3d94   :  { %5532 = vmatmul.mubr.msk.f32.vlgmr.msra.gmra.mxu1 %vm252_vm4, %v3758_v35 }
0x3d95   :  { %5542 = vmatpush3.msra.mxu1 %v7381_v7  ;;  %5553 = vmatprep.mubr.msk.f32.mxu1 %vm6025_vm0, %v6024_v0 }
0x3d96   :  { %5543 = vmatprep.subr.mxu1 %v6024_v0 }
0x3d97   :  { %5544 = vmatpush3.msra.mxu1 %v7390_v2 }
0x3d98   :  { %5545 = vmatprep.subr.mxu1 %v6024_v0 }
0x3d99   :  { %5546 = vmatpush3.msra.mxu1 %v7397_v4 }
0x3d9a   :  { %5547 = vmatprep.subr.mxu1 %v6024_v0 }
0x3d9b   :  { %5548 = vmatpush3.msra.mxu1 %v7404_v43 }
0x3d9c   :  { %5549 = vmatprep.subr.mxu1 %v6024_v0 }
0x3d9d   :  { %5550 = vmatpush3.msra.mxu1 %v7411_v36 }
0x3d9e   :  { %5551 = vmatprep.subr.mxu1 %v6024_v0 }
0x3d9f   :  { %5552 = vmatpush3.msra.mxu1 %v7418_v56 }
0x3da0   :  { %5575 = vmatprep.subr.mxu1 %v6024_v0 }
0x3e54   :  { %v3827_v53 = vpop.f32.mrf.mxu1 }
0x3e55   :  { %v7567_v59 = vadd.f32 %v7564_v54, %v3827_v53 }
0x3e56   :  { %v5533_v39 = vpop.f32.mrf.mxu1 }
0x3e57   :  { %v3831_v46 = vsel %vm120_vm1, %v7567_v59, -inf }
0x3e58   :  { %3832 = vmax.xlane.f32.xlu1 %v3831_v46 }
0x3e69   :  { %3927 = vrot.lane.b32.xlu1 %v3650_v60, %s6030_s6 }
0x3ee1   :  { %v3833_v33 = vpop.xlane.xlu1 %3832 }
0x3ee2   :  { %vm3834_vm10 = vcmp.eq.f32.partialorder %v7567_v59, %v3833_v33 }
0x3ee3   :  { %v3835_v61 = vsel %vm3834_vm10, %v7115_v49, 16 }
0x3ee4   :  { %v3836_v58 = vsel %vm120_vm1, %v3835_v61, 2147483647 }
0x3ee5   :  { %v3838_v63 = vshra.s32 %v3836_v58, 16  ;;  %v3837_v9 = vand.u32 65535, %v3836_v58  ;;  %v3928_v60 = vpop.permute.xlu1 %3927 }
0x3ee7   :  { %v3840_v50 = vcvt.s32.f32 %v3838_v63  ;;  %v3839_v37 = vcvt.s32.f32 %v3837_v9 }
0x3ee9   :  { %3841 = vmin.xlane.f32.xlu0 %v3840_v50 }
0x3f72   :  { %v3842_v62 = vpop.xlane.xlu0 %3841 }
0x3f73   :  { %vm3843_vm11 = vcmp.eq.f32.partialorder %v3840_v50, %v3842_v62  ;;  %v3848_v47 = vcvt.f32.s32 %v3842_v62  ;;  %v5931_v50 = vld [vmem:[%s7760_s3 + $0x8] sm:$0xff] }
0x3f74   :  { %v3844_v48 = vsel %vm3843_vm11, %v3839_v37, inf }
0x3f75   :  { %3845 = vmin.xlane.f32.xlu0 %v3844_v48  ;;  %v3849_v22 = vshll.u32 %v3848_v47, 16 }
0x3ffe   :  { %v3846_v55 = vpop.xlane.xlu0 %3845 }
0x3fff   :  { %v3847_v12 = vcvt.f32.s32 %v3846_v55 }
0x4001   :  { %v3850_v15 = vadd.s32 %v3849_v22, %v3847_v12 }
0x4003   :  { %vm3851_vm12 = vcmp.eq.s32.totalorder %v7115_v49, %v3850_v15 }
0x4004   :  { %v4724_v5 = vsel %vm3851_vm12, 1.0, %v6024_v0 }
0x4005   :  { %5539 = vmatmul.mubr.msk.f32.vlgmr.msra.gmra.mxu0 %vm120_vm1, %v4724_v5 }
0x4006   :  { %5557 = vmatpush3.msra.mxu0 %v7438_v20  ;;  %5572 = vmatprep.mubr.msk.f32.mxu0 %vm6025_vm0, %v6024_v0 }
0x4007   :  { %5558 = vmatprep.subr.mxu0 %v6024_v0 }
0x4008   :  { %5559 = vmatpush3.msra.mxu0 %v7447_v21 }
0x4009   :  { %5560 = vmatprep.subr.mxu0 %v6024_v0 }
0x400a   :  { %5561 = vmatpush3.msra.mxu0 %v7454_v45 }
0x400b   :  { %5562 = vmatprep.subr.mxu0 %v6024_v0 }
0x400c   :  { %5563 = vmatpush3.msra.mxu0 %v7461_v17 }
0x400d   :  { %5564 = vmatprep.subr.mxu0 %v6024_v0 }
0x400e   :  { %5565 = vmatpush3.msra.mxu0 %v7468_v24 }
0x400f   :  { %5566 = vmatprep.subr.mxu0 %v6024_v0 }
0x4010   :  { %5567 = vmatpush3.msra.mxu0 %v7475_v30 }
0x4011   :  { %5568 = vmatprep.subr.mxu0 %v6024_v0 }
0x4012   :  { %5569 = vmatpush3.msra.mxu0 %v7482_v28 }
0x4013   :  { %5570 = vmatprep.subr.mxu0 %v6024_v0 }
0x4014   :  { %5571 = vmatpush3.msra.mxu0 %v7489_v25 }
0x4015   :  { %5586 = vmatprep.subr.mxu0 %v6024_v0 }
0x40c5   :  { %v3923_v1 = vpop.f32.mrf.mxu0 }
0x40c6   :  { %v3930_v11 = vsel %vm120_vm1, %v3923_v1, %v3928_v60 }
0x40c7   :  { %v5540_v14 = vpop.f32.mrf.mxu0  ;;  %5554 = vmatmul.mubr.msk.f32.vlgmr.msra.gmra.mxu1 %vm2032_vm8, %v3930_v11 }
0x40c8   :  { %5576 = vmatpush3.msra.mxu1 %v7601_v23  ;;  %5583 = vmatprep.mubr.msk.f32.mxu1 %vm6025_vm0, %v6024_v0 }
0x40c9   :  { %5577 = vmatprep.subr.mxu1 %v6024_v0 }
0x40ca   :  { %5578 = vmatpush3.msra.mxu1 %v7610_v52 }
0x40cb   :  { %5579 = vmatprep.subr.mxu1 %v6024_v0 }
0x40cc   :  { %5580 = vmatpush3.msra.mxu1 %v7617_v18 }
0x40cd   :  { %5581 = vmatprep.subr.mxu1 %v6024_v0 }
0x40ce   :  { %5582 = vmatpush3.msra.mxu1 %v7624_v10 }
0x40cf   :  { %5593 = vmatprep.subr.mxu1 %v6024_v0 }
0x4187   :  { %v4000_v51 = vpop.f32.mrf.mxu1 }
0x4188   :  { %v4001_v8 = vadd.f32 %v7508_v26, %v4000_v51 }
0x4189   :  { %v5555_v29 = vpop.f32.mrf.mxu1 }
0x418a   :  { %5864 = vtanh.f32 %v4001_v8  ;;  %v4727_v32 = vmul.f32 -1.442695, %v4001_v8 }
0x418c   :  { %5866 = vpow2.f32 %v4727_v32 }
0x4197   :  { %v5865_v42 = vpop.eup %5864 }
0x4198   :  { %4013 = vrot.lane.b32.xlu0 %v5865_v42, %s6027_s25 }
0x4199   :  { %v5867_v34 = vpop.eup %5866 }
0x419a   :  { %v4007_v57 = vadd.f32 1.0, %v5867_v34 }
0x419c   :  { %5868 = vrcp.f32 %v4007_v57 }
0x41a9   :  { %v5869_v31 = vpop.eup %5868 }
0x41aa   :  { %v4011_v35 = vmul.f32 %v5869_v31, %v7514_v13 }
0x420a   :  { %v4014_v41 = vpop.permute.xlu0 %4013 }
0x420b   :  { %v4016_v44 = vmul.f32 %v5869_v31, %v4014_v41 }
0x420d   :  { %4018 = vrot.lane.b32.xlu1 %v4016_v44, %s6027_s25 }
0x427f   :  { %v4019_v53 = vpop.permute.xlu1 %4018 }
0x4280   :  { %v7632_v39 = vadd.f32 %v4019_v53, %v4011_v35 }
0x4282   :  { %5870 = vtanh.f32 %v7632_v39 }
0x428f   :  { %v5871_v46 = vpop.eup %5870 }
0x4290   :  { %4024 = vrot.lane.b32.xlu1 %v5871_v46, %s6027_s25 }
0x4294   :  { %4032 = vrot.lane.b32.xlu1 %v7542_v16, %s6029_s23  ;;  %v5932_v16 = vld [vmem:[%s7760_s3] sm:$0xff]  ;;  %s6031_s3 = smov 16  }
0x4302   :  { %v4025_v33 = vpop.permute.xlu1 %4024 }
0x4303   :  { %v7638_v61 = vmul.f32 %v5869_v31, %v4025_v33 }
0x4305   :  { %4029 = vrot.lane.b32.xlu0 %v7638_v61, %s6028_s5 }
0x4306   :  { %v4033_v58 = vpop.permute.xlu1 %4032 }
0x4377   :  { %v4030_v63 = vpop.permute.xlu0 %4029 }
0x4378   :  { %v4035_v13 = vsel %vm252_vm4, %v4030_v63, %v4033_v58 }
0x4379   :  { %5573 = vmatmul.mubr.msk.f32.vlgmr.msra.gmra.mxu0 %vm362_vm5, %v4035_v13 }
0x437a   :  { %5587 = vmatpush3.msra.mxu0 %v5931_v50  ;;  %5590 = vmatprep.mubr.msk.f32.mxu0 %vm6025_vm0, %v6024_v0 }
0x437b   :  { %5588 = vmatprep.subr.mxu0 %v6024_v0 }
0x437c   :  { %5589 = vmatpush3.msra.mxu0 %v5932_v16 }
0x437d   :  { %5608 = vmatprep.subr.mxu0 %v6024_v0 }
0x4439   :  { %v4105_v9 = vpop.f32.mrf.mxu0 }
0x443a   :  { %v4106_v62 = vadd.f32 %v7532_v6, %v4105_v9 }
0x443b   :  { %v5574_v37 = vpop.f32.mrf.mxu0 }
0x443c   :  { %5872 = vtanh.f32 %v4106_v62  ;;  %v4729_v47 = vmul.f32 -1.442695, %v4106_v62 }
0x443e   :  { %5874 = vpow2.f32 %v4729_v47 }
0x4449   :  { %v5873_v48 = vpop.eup %5872 }
0x444a   :  { %4118 = vrot.lane.b32.xlu0 %v5873_v48, %s6027_s25 }
0x444b   :  { %v5875_v55 = vpop.eup %5874 }
0x444c   :  { %v4112_v22 = vadd.f32 1.0, %v5875_v55 }
0x444e   :  { %5876 = vrcp.f32 %v4112_v22 }
0x445b   :  { %v5877_v12 = vpop.eup %5876 }
0x445c   :  { %v4116_v60 = vmul.f32 %v5877_v12, %v7538_v38 }
0x44bc   :  { %v4119_v15 = vpop.permute.xlu0 %4118 }
0x44bd   :  { %v4121_v5 = vmul.f32 %v5877_v12, %v4119_v15 }
0x44bf   :  { %4123 = vrot.lane.b32.xlu1 %v4121_v5, %s6027_s25 }
0x4531   :  { %v4124_v1 = vpop.permute.xlu1 %4123 }
0x4532   :  { %v7658_v11 = vadd.f32 %v4124_v1, %v4116_v60 }
0x4534   :  { %5878 = vtanh.f32 %v7658_v11 }
0x4541   :  { %v5879_v14 = vpop.eup %5878 }
0x4542   :  { %4129 = vrot.lane.b32.xlu0 %v5879_v14, %s6027_s25 }
0x45b4   :  { %v4130_v51 = vpop.permute.xlu0 %4129 }
0x45b5   :  { %v7662_v8 = vmul.f32 %v5877_v12, %v4130_v51 }
0x45b7   :  { %4134 = vrot.lane.b32.xlu1 %v7662_v8, %s6028_s5 }
0x4629   :  { %v4135_v29 = vpop.permute.xlu1 %4134 }
0x462a   :  { %5584 = vmatmul.mubr.msk.f32.vlgmr.msra.gmra.mxu1 %vm252_vm4, %v4135_v29 }
0x462b   :  { %5594 = vmatpush3.msra.mxu1 %v7381_v7  ;;  %5605 = vmatprep.mubr.msk.f32.mxu1 %vm6025_vm0, %v6024_v0 }
0x462c   :  { %5595 = vmatprep.subr.mxu1 %v6024_v0 }
0x462d   :  { %5596 = vmatpush3.msra.mxu1 %v7390_v2 }
0x462e   :  { %5597 = vmatprep.subr.mxu1 %v6024_v0 }
0x462f   :  { %5598 = vmatpush3.msra.mxu1 %v7397_v4 }
0x4630   :  { %5599 = vmatprep.subr.mxu1 %v6024_v0 }
0x4631   :  { %5600 = vmatpush3.msra.mxu1 %v7404_v43 }
0x4632   :  { %5601 = vmatprep.subr.mxu1 %v6024_v0 }
0x4633   :  { %5602 = vmatpush3.msra.mxu1 %v7411_v36 }
0x4634   :  { %5603 = vmatprep.subr.mxu1 %v6024_v0 }
0x4635   :  { %5604 = vmatpush3.msra.mxu1 %v7418_v56 }
0x4636   :  { %5627 = vmatprep.subr.mxu1 %v6024_v0 }
0x46ea   :  { %v4204_v7 = vpop.f32.mrf.mxu1 }
0x46eb   :  { %v7682_v2 = vadd.f32 %v7564_v54, %v4204_v7 }
0x46ec   :  { %v5585_v38 = vpop.f32.mrf.mxu1 }
0x46ed   :  { %v4208_v4 = vsel %vm120_vm1, %v7682_v2, -inf }
0x46ee   :  { %4209 = vmax.xlane.f32.xlu0 %v4208_v4 }
0x4777   :  { %v4210_v43 = vpop.xlane.xlu0 %4209 }
0x4778   :  { %vm4211_vm13 = vcmp.eq.f32.partialorder %v7682_v2, %v4210_v43 }
0x4779   :  { %v4212_v36 = vsel %vm4211_vm13, %v7115_v49, 16 }
0x477a   :  { %v4213_v42 = vsel %vm120_vm1, %v4212_v36, 2147483647 }
0x477b   :  { %v4215_v32 = vshra.s32 %v4213_v42, 16  ;;  %v4214_v34 = vand.u32 65535, %v4213_v42 }
0x477d   :  { %v4217_v56 = vcvt.s32.f32 %v4215_v32  ;;  %v4216_v31 = vcvt.s32.f32 %v4214_v34 }
0x477f   :  { %4218 = vmin.xlane.f32.xlu1 %v4217_v56 }
0x4808   :  { %v4219_v57 = vpop.xlane.xlu1 %4218 }
0x4809   :  { %vm4220_vm14 = vcmp.eq.f32.partialorder %v4217_v56, %v4219_v57  ;;  %v4225_v44 = vcvt.f32.s32 %v4219_v57 }
0x480a   :  { %v4221_v41 = vsel %vm4220_vm14, %v4216_v31, inf }
0x480b   :  { %4222 = vmin.xlane.f32.xlu0 %v4221_v41  ;;  %v4226_v53 = vshll.u32 %v4225_v44, 16 }
0x4821   :  { %4304 = vrot.lane.b32.xlu0 %v7638_v61, %s6030_s6 }
0x4894   :  { %v4223_v35 = vpop.xlane.xlu0 %4222 }
0x4895   :  { %v4224_v46 = vcvt.f32.s32 %v4223_v35 }
0x4897   :  { %v4227_v33 = vadd.s32 %v4226_v53, %v4224_v46 }
0x4899   :  { %vm4228_vm15 = vcmp.eq.s32.totalorder %v7115_v49, %v4227_v33  ;;  %v4305_v49 = vpop.permute.xlu0 %4304 }
0x489a   :  { %v4731_v58 = vsel %vm4228_vm15, 1.0, %v6024_v0 }
0x489b   :  { %5591 = vmatmul.mubr.msk.f32.vlgmr.msra.gmra.mxu0 %vm120_vm1, %v4731_v58 }
0x489c   :  { %5609 = vmatpush3.msra.mxu0 %v7438_v20  ;;  %5624 = vmatprep.mubr.msk.f32.mxu0 %vm6025_vm0, %v6024_v0 }
0x489d   :  { %5610 = vmatprep.subr.mxu0 %v6024_v0 }
0x489e   :  { %5611 = vmatpush3.msra.mxu0 %v7447_v21 }
0x489f   :  { %5612 = vmatprep.subr.mxu0 %v6024_v0 }
0x48a0   :  { %5613 = vmatpush3.msra.mxu0 %v7454_v45 }
0x48a1   :  { %5614 = vmatprep.subr.mxu0 %v6024_v0 }
0x48a2   :  { %5615 = vmatpush3.msra.mxu0 %v7461_v17 }
0x48a3   :  { %5616 = vmatprep.subr.mxu0 %v6024_v0 }
0x48a4   :  { %5617 = vmatpush3.msra.mxu0 %v7468_v24 }
0x48a5   :  { %5618 = vmatprep.subr.mxu0 %v6024_v0 }
0x48a6   :  { %5619 = vmatpush3.msra.mxu0 %v7475_v30 }
0x48a7   :  { %5620 = vmatprep.subr.mxu0 %v6024_v0 }
0x48a8   :  { %5621 = vmatpush3.msra.mxu0 %v7482_v28 }
0x48a9   :  { %5622 = vmatprep.subr.mxu0 %v6024_v0 }
0x48aa   :  { %5623 = vmatpush3.msra.mxu0 %v7489_v25 }
0x495b   :  { %v4300_v20 = vpop.f32.mrf.mxu0 }
0x495c   :  { %v4307_v21 = vsel %vm120_vm1, %v4300_v20, %v4305_v49 }
0x495d   :  { %v5592_v45 = vpop.f32.mrf.mxu0  ;;  %5606 = vmatmul.mubr.msk.f32.vlgmr.msra.gmra.mxu1 %vm2032_vm8, %v4307_v21 }
0x495e   :  { %5628 = vmatpush3.msra.mxu1 %v7601_v23  ;;  %5635 = vmatprep.mubr.msk.f32.mxu1 %vm6025_vm0, %v6024_v0  ;;  %vm4617_vm0 = vcmask 654336  }
0x495f   :  { %5629 = vmatprep.subr.mxu1 %v6024_v0 }
0x4960   :  { %5630 = vmatpush3.msra.mxu1 %v7610_v52 }
0x4961   :  { %5631 = vmatprep.subr.mxu1 %v6024_v0 }
0x4962   :  { %5632 = vmatpush3.msra.mxu1 %v7617_v18 }
0x4963   :  { %5633 = vmatprep.subr.mxu1 %v6024_v0 }
0x4964   :  { %5634 = vmatpush3.msra.mxu1 %v7624_v10 }
0x4a1d   :  { %v4377_v17 = vpop.f32.mrf.mxu1 }
0x4a1e   :  { %v4378_v24 = vadd.f32 %v7508_v26, %v4377_v17 }
0x4a1f   :  { %v5607_v30 = vpop.f32.mrf.mxu1 }
0x4a20   :  { %5880 = vtanh.f32 %v4378_v24  ;;  %v4734_v25 = vmul.f32 -1.442695, %v4378_v24 }
0x4a22   :  { %5882 = vpow2.f32 %v4734_v25 }
0x4a2d   :  { %v5881_v28 = vpop.eup %5880 }
0x4a2e   :  { %4390 = vrot.lane.b32.xlu1 %v5881_v28, %s6027_s25 }
0x4a2f   :  { %v5883_v23 = vpop.eup %5882 }
0x4a30   :  { %v4384_v52 = vadd.f32 1.0, %v5883_v23 }
0x4a32   :  { %5884 = vrcp.f32 %v4384_v52 }
0x4a3f   :  { %v5885_v61 = vpop.eup %5884 }
0x4a40   :  { %v4388_v0 = vmul.f32 %v5885_v61, %v7632_v39 }
0x4aa0   :  { %v4391_v63 = vpop.permute.xlu1 %4390 }
0x4aa1   :  { %v4393_v18 = vmul.f32 %v5885_v61, %v4391_v63 }
0x4aa3   :  { %4395 = vrot.lane.b32.xlu1 %v4393_v18, %s6027_s25 }
0x4b15   :  { %v4396_v10 = vpop.permute.xlu1 %4395 }
0x4b16   :  { %v4398_v13 = vadd.f32 %v4396_v10, %v4388_v0 }
0x4b18   :  { %5886 = vtanh.f32 %v4398_v13 }
0x4b25   :  { %v5887_v26 = vpop.eup %5886 }
0x4b26   :  { %4401 = vrot.lane.b32.xlu0 %v5887_v26, %s6027_s25 }
0x4b2a   :  { %4409 = vrot.lane.b32.xlu0 %v7662_v8, %s6029_s23 }
0x4b98   :  { %v4402_v50 = vpop.permute.xlu0 %4401 }
0x4b99   :  { %v4404_v16 = vmul.f32 %v5885_v61, %v4402_v50 }
0x4b9b   :  { %4406 = vrot.lane.b32.xlu1 %v4404_v16, %s6028_s5 }
0x4b9c   :  { %v4410_v9 = vpop.permute.xlu0 %4409 }
0x4c0d   :  { %v4407_v62 = vpop.permute.xlu1 %4406 }
0x4c0e   :  { %v4412_v37 = vsel %vm252_vm4, %v4407_v62, %v4410_v9 }
0x4c0f   :  { %5625 = vmatmul.mubr.msk.f32.vlgmr.msra.gmra.mxu0 %vm362_vm5, %v4412_v37 }
0x4ccf   :  { %v4482_v39 = vpop.f32.mrf.mxu0 }
0x4cd0   :  { %v4483_v48 = vadd.f32 %v7532_v6, %v4482_v39 }
0x4cd1   :  { %v5626_v47 = vpop.f32.mrf.mxu0 }
0x4cd2   :  { %5888 = vtanh.f32 %v4483_v48  ;;  %v4736_v22 = vmul.f32 -1.442695, %v4483_v48 }
0x4cd4   :  { %5890 = vpow2.f32 %v4736_v22 }
0x4cdf   :  { %v5889_v55 = vpop.eup %5888 }
0x4ce0   :  { %4495 = vrot.lane.b32.xlu1 %v5889_v55, %s6027_s25 }
0x4ce1   :  { %v5891_v12 = vpop.eup %5890 }
0x4ce2   :  { %v4489_v15 = vadd.f32 1.0, %v5891_v12 }
0x4ce4   :  { %5892 = vrcp.f32 %v4489_v15 }
0x4cf1   :  { %v5893_v5 = vpop.eup %5892 }
0x4cf2   :  { %v4493_v14 = vmul.f32 %v5893_v5, %v7658_v11 }
0x4d52   :  { %v4496_v60 = vpop.permute.xlu1 %4495 }
0x4d53   :  { %v4498_v1 = vmul.f32 %v5893_v5, %v4496_v60 }
0x4d55   :  { %4500 = vrot.lane.b32.xlu0 %v4498_v1, %s6027_s25 }
0x4dc7   :  { %v4501_v51 = vpop.permute.xlu0 %4500 }
0x4dc8   :  { %v4503_v8 = vadd.f32 %v4501_v51, %v4493_v14 }
0x4dca   :  { %5894 = vtanh.f32 %v4503_v8 }
0x4dd7   :  { %v5895_v6 = vpop.eup %5894 }
0x4dd8   :  { %4506 = vrot.lane.b32.xlu1 %v5895_v6, %s6027_s25 }
0x4ddc   :  { %4586 = vrot.lane.b32.xlu1 %v7109_v27, %s6031_s3 }
0x4de0   :  { %4594 = vrot.lane.b32.xlu1 %v7302_v40, %s6032_s30 }
0x4de4   :  { %4602 = vrot.lane.b32.xlu1 %v7567_v59, %s6030_s6  ;;  %s6033_s6 = smov 112  }
0x4e4a   :  { %v4507_v29 = vpop.permute.xlu1 %4506 }
0x4e4b   :  { %v4509_v7 = vmul.f32 %v5893_v5, %v4507_v29 }
0x4e4d   :  { %4511 = vrot.lane.b32.xlu0 %v4509_v7, %s6028_s5 }
0x4e4e   :  { %v4587_v38 = vpop.permute.xlu1 %4586 }
0x4e51   :  { %4590 = vrot.lane.b32.xlu0 %v7213_v19, %s6027_s25  ;;  %v4613_v19 = vsel %vm120_vm1, 0.0, %v4587_v38  ;;  %s6034_s25 = smov [#allocation8]  }
0x4e52   :  { %v4595_v43 = vpop.permute.xlu1 %4594 }
0x4e55   :  { %4598 = vrot.lane.b32.xlu0 %v7423_v3, %s6028_s5  ;;  %s4630_s5 = sshll.u32 %s6034_s25, 4  ;;  %s4631_s5 = int_to_ptr.vmem [resolvable:$true] %s4630_s5 }
0x4e56   :  { %p5998_p2 = scmp.lt.s32.totalorder %s4631_s5, %s4631_s5 }
0x4e59   :  { %4606 = vrot.lane.b32.xlu0 %v7682_v2, %s6029_s23  ;;  %v4603_v2 = vpop.permute.xlu1 %4602  ;;  %s5993_s23 = scalar_lea.vmem %s4631_s5, 128 }
0x4e5a   :  { %p5994_p1 = scmp.ne.s32.totalorder %s4631_s5, %s5993_s23  ;;  %p5999_p3 = scmp.lt.s32.totalorder %s5993_s23, %s5993_s23 }
0x4e5c   :  { %p6000_p4 = por %p5999_p3, %p5998_p2 }
0x4e5e   :  { %p6001_p5 = pnand %p6000_p4, %p5994_p1 }
0x4ebf   :  { %v4512_v27 = vpop.permute.xlu0 %4511 }
0x4ec0   :  { %5636 = vmatmul.mubr.msk.f32.vlgmr.msra.gmra.mxu1 %vm252_vm4, %v4512_v27 }
0x4ec3   :  { %v4591_v4 = vpop.permute.xlu0 %4590 }
0x4ec4   :  { %v4614_v3 = vsel %vm252_vm4, %v4613_v19, %v4591_v4 }
0x4ec5   :  { %v4615_v42 = vsel %vm2032_vm8, %v4614_v3, %v4595_v43 }
0x4ec7   :  { %v4599_v36 = vpop.permute.xlu0 %4598 }
0x4ec8   :  { %v4616_v32 = vsel %vm362_vm5, %v4615_v42, %v4599_v36 }
0x4ecb   :  { %v4607_v56 = vpop.permute.xlu0 %4606 }
0x4f80   :  { %v4581_v40 = vpop.f32.mrf.mxu1 }
0x4f81   :  { %v4582_v11 = vadd.f32 %v7564_v54, %v4581_v40  ;;  %v4618_v54 = vsel %vm4617_vm0, %v4616_v32, %v4603_v2 }
0x4f82   :  { %v5637_v59 = vpop.f32.mrf.mxu1  ;;  %v4620_v34 = vsel %vm4619_vm2, %v4618_v54, %v4607_v56 }
0x4f83   :  { %4610 = vrot.lane.b32.xlu1 %v4582_v11, %s6033_s6 }
0x4ff5   :  { %v4611_v57 = vpop.permute.xlu1 %4610 }
0x4ff6   :  { %v4622_v31 = vsel %vm4621_vm3, %v4620_v34, %v4611_v57 }
0x4ff7   :  { %4623 = vst [vmem:[#allocation8] sm:$0xff] %v4622_v31 }
0x4ff8   :  { %6004 = shalt.err (!%p6001_p5)
}
0x4ff9   :  { %4633 = dma.vmem_to_hbm [thread:$0]  %s4631_s5, 128, %s7772_s15, [#allocation4]  }
0x4ffa   :  { %6017 = dma.done.wait [#allocation4], 128  }
0x4ffb   :  { %6018 = vsyncadd [#allocation4], 4294967168 }
0x4ffc   :  { %4637 = vsyncpa [#allocation3], 1 }
0x4ffd   :  { %4638 = vsyncpa [#allocation6], 1 }
0x4ffe   :  { %4639 = vsyncpa [#allocation4], 1 }

</bundles_post_ra>
